<compile_context>
chip_gen: v7x
topology: tpu7x:2x2x1
jax: 0.10.0
libtpu: 0.0.40
codegen_flags: <defaults>
</compile_context>

<pallas_src>
import jax
import jax.numpy as jnp
from jax import lax
from jax.experimental import pallas as pl
from jax.experimental.pallas import tpu as pltpu

BN_EPS = 1e-5
LRELU_SLOPE = 0.01  # nn.LeakyReLU() default


def _vmem():
    return pl.BlockSpec(memory_space=pltpu.MemorySpace.VMEM)


def _round_up(x, m):
    return (x + m - 1) // m * m


# ---------------------------------------------------------------------------
# Kernel A: conv-as-matmul (bf16 operands, f32 accum) + BatchNorm1d (batch
# stats, gamma=1, beta=0) + LeakyReLU.  Conv bias omitted: BatchNorm subtracts
# the batch mean, so a per-channel constant bias cancels exactly.
# ---------------------------------------------------------------------------
def conv_bn_lrelu_kernel(x_ref, w_ref, o_ref):
    y = jnp.dot(x_ref[...], w_ref[...], preferred_element_type=jnp.float32)  # (N, C)
    mean = jnp.mean(y, axis=0, keepdims=True)
    var = jnp.maximum(jnp.mean(y * y, axis=0, keepdims=True) - mean * mean, 0.0)
    yn = (y - mean) * lax.rsqrt(var + BN_EPS)
    o_ref[...] = jnp.where(yn > 0, yn, LRELU_SLOPE * yn)


def conv_block(cols2d, w_mat):
    n = cols2d.shape[0]
    cpad = w_mat.shape[1]
    return pl.pallas_call(
        conv_bn_lrelu_kernel,
        out_shape=jax.ShapeDtypeStruct((n, cpad), jnp.float32),
        in_specs=[_vmem(), _vmem()],
        out_specs=_vmem(),
    )(cols2d, w_mat)


# ---------------------------------------------------------------------------
# Kernel B: conv block 0 with MaxPool1d(kernel=3, stride=2, padding=1) fused.
# The im2col rows are ordered (batch, parity, j) by the glue, so even / odd
# conv time positions of each batch element are contiguous row blocks and the
# pool is three static slices + a shifted max (all in VMEM).
# ---------------------------------------------------------------------------
def conv0_bn_lrelu_pool_kernel(x_ref, w_ref, o_ref):
    y = jnp.dot(x_ref[...], w_ref[...], preferred_element_type=jnp.float32)  # (B*Lout, C)
    mean = jnp.mean(y, axis=0, keepdims=True)
    var = jnp.maximum(jnp.mean(y * y, axis=0, keepdims=True) - mean * mean, 0.0)
    yn = (y - mean) * lax.rsqrt(var + BN_EPS)
    ya = jnp.where(yn > 0, yn, LRELU_SLOPE * yn)                              # (B*Lout, C)

    B, Lp, C = o_ref.shape          # Lp = Lout // 2 (pool output length)
    neg = jnp.full((1, C), -jnp.inf, dtype=ya.dtype)
    for b in range(B):              # B is a static Python int -> unrolled
        even = ya[(2 * b) * Lp:(2 * b + 1) * Lp, :]      # conv positions 2j
        odd = ya[(2 * b + 1) * Lp:(2 * b + 2) * Lp, :]   # conv positions 2j+1
        prev = jnp.concatenate([neg, odd[:Lp - 1, :]], axis=0)  # positions 2j-1
        o_ref[b] = jnp.maximum(jnp.maximum(even, odd), prev)


def conv0_block(cols2d, w_mat, B, Lp):
    cpad = w_mat.shape[1]
    return pl.pallas_call(
        conv0_bn_lrelu_pool_kernel,
        out_shape=jax.ShapeDtypeStruct((B, Lp, cpad), jnp.float32),
        in_specs=[_vmem(), _vmem()],
        out_specs=_vmem(),
    )(cols2d, w_mat)


# ---------------------------------------------------------------------------
# Kernel C: fused 2-layer bidirectional GRU (PyTorch gate order [r, z, n],
# zero initial state) + mean over time + fc_mu / fc_logvar + reparameterize.
#   * gi (input projection) for both directions is one matmul per layer.
#   * forward / backward cells interleaved in one fori_loop.
#   * batch is pre-padded to a multiple of 8 -> every dynamic slice/store
#     start is a multiple of 8 (pl.multiple_of hints -> unmasked ops).
#   * layer-2 outputs are summed on the fly, so the (T, B, 2H) layer-2
#     activation never materialises.
# ---------------------------------------------------------------------------
def gru_head_kernel(x_ref,
                    wih1_ref, whf1_ref, whb1_ref, bi1_ref, bhf1_ref, bhb1_ref,
                    wih2_ref, whf2_ref, whb2_ref, bi2_ref, bhf2_ref, bhb2_ref,
                    wmu_ref, bmu_ref, wlv_ref, blv_ref, eps_ref,
                    z_ref, mu_ref, lv_ref,
                    gi1_scr, o1f_scr, o1b_scr, gi2_scr):
    TB = x_ref.shape[0]
    H = whf1_ref.shape[0]
    B = eps_ref.shape[0]            # sublane-padded batch (multiple of 8)
    T = TB // B

    def cell(gi, gh, h):
        # PyTorch GRU: r, z, n gate order; r scales only the hidden-side n term.
        r = jax.nn.sigmoid(gi[:, 0:H] + gh[:, 0:H])
        z = jax.nn.sigmoid(gi[:, H:2 * H] + gh[:, H:2 * H])
        n = jnp.tanh(gi[:, 2 * H:3 * H] + r * gh[:, 2 * H:3 * H])
        return (1.0 - z) * n + z * h

    h0 = jnp.zeros((B, H), jnp.float32)

    # ------------------------- layer 1 -------------------------
    # Hoisted input projection: one (T*B, H) x (H, 6H) bf16 matmul covering
    # forward (cols 0:3H) and backward (cols 3H:6H) directions.
    gi1_scr[...] = (
        jnp.dot(x_ref[...], wih1_ref[...], preferred_element_type=jnp.float32)
        + bi1_ref[...])

    def body1(t, carry):
        h_f, h_b = carry
        s = T - 1 - t
        rf = pl.multiple_of(t * B, 8)
        rb = pl.multiple_of(s * B, 8)
        gi_f = gi1_scr[pl.ds(rf, B), :]   # time t     (fwd gates in [:, :3H])
        gi_b = gi1_scr[pl.ds(rb, B), :]   # time T-1-t (bwd gates in [:, 3H:])
        gh_f = jnp.dot(h_f.astype(jnp.bfloat16), whf1_ref[...],
                       preferred_element_type=jnp.float32) + bhf1_ref[...]
        gh_b = jnp.dot(h_b.astype(jnp.bfloat16), whb1_ref[...],
                       preferred_element_type=jnp.float32) + bhb1_ref[...]
        h_f = cell(gi_f[:, 0:3 * H], gh_f, h_f)
        h_b = cell(gi_b[:, 3 * H:6 * H], gh_b, h_b)
        o1f_scr[pl.ds(rf, B), :] = h_f
        o1b_scr[pl.ds(rb, B), :] = h_b
        return h_f, h_b

    lax.fori_loop(0, T, body1, (h0, h0))

    # ------------------------- layer 2 -------------------------
    x2 = jnp.concatenate([o1f_scr[...], o1b_scr[...]], axis=-1).astype(jnp.bfloat16)
    gi2_scr[...] = (
        jnp.dot(x2, wih2_ref[...], preferred_element_type=jnp.float32)
        + bi2_ref[...])

    def body2(t, carry):
        h_f, h_b, a_f, a_b = carry
        s = T - 1 - t
        rf = pl.multiple_of(t * B, 8)
        rb = pl.multiple_of(s * B, 8)
        gi_f = gi2_scr[pl.ds(rf, B), :]
        gi_b = gi2_scr[pl.ds(rb, B), :]
        gh_f = jnp.dot(h_f.astype(jnp.bfloat16), whf2_ref[...],
                       preferred_element_type=jnp.float32) + bhf2_ref[...]
        gh_b = jnp.dot(h_b.astype(jnp.bfloat16), whb2_ref[...],
                       preferred_element_type=jnp.float32) + bhb2_ref[...]
        h_f = cell(gi_f[:, 0:3 * H], gh_f, h_f)
        h_b = cell(gi_b[:, 3 * H:6 * H], gh_b, h_b)
        return h_f, h_b, a_f + h_f, a_b + h_b

    _, _, a_f, a_b = lax.fori_loop(0, T, body2, (h0, h0, h0, h0))

    # ------------------------- head -------------------------
    feat = (jnp.concatenate([a_f, a_b], axis=-1) * (1.0 / T)).astype(jnp.bfloat16)
    mu = jnp.dot(feat, wmu_ref[...], preferred_element_type=jnp.float32) + bmu_ref[...]
    lv = jnp.dot(feat, wlv_ref[...], preferred_element_type=jnp.float32) + blv_ref[...]
    z_ref[...] = mu + eps_ref[...] * jnp.exp(0.5 * lv)
    mu_ref[...] = mu
    lv_ref[...] = lv


def gru_head(x_tb, p, eps, T, B):
    H = p["gru"][0]["whf"].shape[0]
    Ld = p["wmu"].shape[1]
    TB = T * B
    g1, g2 = p["gru"]
    return pl.pallas_call(
        gru_head_kernel,
        out_shape=tuple(jax.ShapeDtypeStruct((B, Ld), jnp.float32) for _ in range(3)),
        in_specs=[_vmem()] * 18,
        out_specs=(_vmem(),) * 3,
        scratch_shapes=[
            pltpu.VMEM((TB, 6 * H), jnp.float32),  # layer-1 hoisted input projections
            pltpu.VMEM((TB, H), jnp.float32),      # layer-1 forward outputs (time-major)
            pltpu.VMEM((TB, H), jnp.float32),      # layer-1 backward outputs (time-major)
            pltpu.VMEM((TB, 6 * H), jnp.float32),  # layer-2 hoisted input projections
        ],
    )(x_tb,
      g1["wih"], g1["whf"], g1["whb"], g1["bi"], g1["bhf"], g1["bhb"],
      g2["wih"], g2["whf"], g2["whb"], g2["bi"], g2["bhf"], g2["bhb"],
      p["wmu"], p["bmu"], p["wlv"], p["blv"], eps)


# ---------------------------------------------------------------------------
# Glue: channels-last im2col for 1-D conv.  (B, L, C) -> (B, Lout, K*C) with
# feature ordering (k, c), matching the (K*Cin, Cout) weight layout.
# ---------------------------------------------------------------------------
def im2col_cl(x_blc, K, stride, pad):
    B, L, C = x_blc.shape
    Lout = (L + 2 * pad - K) // stride + 1
    xp = jnp.pad(x_blc, ((0, 0), (pad, pad), (0, 0)))
    taps = [
        lax.slice(xp, (0, k, 0), (B, k + stride * (Lout - 1) + 1, C), (1, stride, 1))
        for k in range(K)
    ]
    return jnp.concatenate(taps, axis=2), Lout       # (B, Lout, K*C)


# ---------------------------------------------------------------------------
# Parameters (deterministic; shapes/init match the PyTorch module).  Weights
# used as matmul operands are stored in bf16 (f32 accumulation in-kernel).
# ---------------------------------------------------------------------------
def init_params(key, n_channels, hidden_dims, latent_dim):
    keys = iter(jax.random.split(key, 64))
    p = {"conv": []}
    in_c = n_channels
    for i, out_c in enumerate(hidden_dims):
        K, stride, pad = (7, 2, 3) if i == 0 else (3, 2, 1)
        gain = 2.0 ** 0.5                                    # kaiming, leaky_relu (a=0)
        std = gain / (out_c * K) ** 0.5                      # fan_out
        w = jax.random.normal(next(keys), (out_c, in_c, K), jnp.float32) * std
        # (Cout, Cin, K) -> (K*Cin, Cout), feature order (k, c).
        w_mat = jnp.transpose(w, (2, 1, 0)).reshape(K * in_c, out_c)
        cpad = _round_up(out_c, 128)                         # lane-dense output
        if cpad != out_c:
            w_mat = jnp.pad(w_mat, ((0, 0), (0, cpad - out_c)))
        # Conv bias omitted on purpose: BatchNorm (batch stats, beta=0) cancels it.
        p["conv"].append({"w": w_mat.astype(jnp.bfloat16),
                          "cout": out_c, "cpad": cpad, "ksp": (K, stride, pad)})
        in_c = out_c

    H = hidden_dims[-1]
    bound = 1.0 / H ** 0.5

    def u(shape):
        return jax.random.uniform(next(keys), shape, jnp.float32, -bound, bound)

    p["gru"] = []
    for layer in range(2):
        din = H if layer == 0 else 2 * H
        wih_f, wih_b = u((din, 3 * H)), u((din, 3 * H))      # stored transposed (x @ W)
        p["gru"].append({
            "wih": jnp.concatenate([wih_f, wih_b], axis=1).astype(jnp.bfloat16),  # (din, 6H)
            "whf": u((H, 3 * H)).astype(jnp.bfloat16),
            "whb": u((H, 3 * H)).astype(jnp.bfloat16),
            "bi": jnp.concatenate([u((1, 3 * H)), u((1, 3 * H))], axis=1),        # (1, 6H)
            "bhf": u((1, 3 * H)),
            "bhb": u((1, 3 * H)),
        })

    din = 2 * H
    std = (2.0 / (din + latent_dim)) ** 0.5                  # xavier_normal
    p["wmu"] = (jax.random.normal(next(keys), (din, latent_dim), jnp.float32) * std).astype(jnp.bfloat16)
    p["bmu"] = jnp.zeros((1, latent_dim), jnp.float32)
    p["wlv"] = (jax.random.normal(next(keys), (din, latent_dim), jnp.float32) * std).astype(jnp.bfloat16)
    p["blv"] = jnp.zeros((1, latent_dim), jnp.float32)
    return p


# ---------------------------------------------------------------------------
# Full forward: (z, mu, logvar)
# ---------------------------------------------------------------------------
def forward(x, eps, params):
    B = x.shape[0]
    h = jnp.transpose(x, (0, 2, 1))                   # (B, L, C) channels-last, once
    for i, cp in enumerate(params["conv"]):
        K, stride, pad = cp["ksp"]
        cols, Lout = im2col_cl(h, K, stride, pad)     # (B, Lout, K*Cin)
        cols = cols.astype(jnp.bfloat16)
        if i == 0:
            # Fused MaxPool(k3,s2,p1) path: rows reordered to (b, parity, j).
            assert Lout % 2 == 0, "fused MaxPool path assumes an even conv0 length"
            Lp = Lout // 2
            kc = cols.shape[-1]
            cols = (cols.reshape(B, Lp, 2, kc)
                        .transpose(0, 2, 1, 3)
                        .reshape(B * Lout, kc))
            y = conv0_block(cols, cp["w"], B, Lp)     # (B, Lp, cpad)
        else:
            y = conv_block(cols.reshape(B * Lout, -1), cp["w"]).reshape(B, Lout, cp["cpad"])
        h = y[:, :, :cp["cout"]]                      # strip lane padding (no-op if aligned)

    T, C = h.shape[1], h.shape[2]
    # Pad batch to a multiple of 8 so every dynamic sublane slice in the GRU
    # loop is tile-aligned; padded rows carry garbage that is sliced off below.
    Bp = _round_up(max(B, 8), 8)
    x_tb = jnp.transpose(h, (1, 0, 2))                # (T, B, C) -- single tiny transpose
    if Bp != B:
        x_tb = jnp.pad(x_tb, ((0, 0), (0, Bp - B), (0, 0)))
        eps_p = jnp.pad(eps, ((0, Bp - B), (0, 0)))
    else:
        eps_p = eps
    x_tb = x_tb.reshape(T * Bp, C).astype(jnp.bfloat16)   # rows = t*Bp + b
    # TODO(synk): torch.randn_like is replaced by a host-supplied eps; an
    # in-kernel pltpu.prng_seed/prng_random_bits path could generate it on-chip.
    z, mu, lv = gru_head(x_tb, params, eps_p, T, Bp)
    return z[:B], mu[:B], lv[:B]


if __name__ == "__main__":
    # Small shapes consistent with the module: x is (batch, n_channels, n_times)
    B, n_channels, n_times = 2, 16, 64
    hidden_dims = [64, 128]
    latent_dim = 128

    key = jax.random.PRNGKey(0)
    kx, kp, ke = jax.random.split(key, 3)
    x = jax.random.normal(kx, (B, n_channels, n_times), jnp.float32)
    params = init_params(kp, n_channels, hidden_dims, latent_dim)
    eps = jax.random.normal(ke, (B, latent_dim), jnp.float32)  # reparameterization noise

    @jax.jit
    def fwd(x, eps):
        return forward(x, eps, params)

    z, mu, logvar = fwd(x, eps)
    jax.block_until_ready((z, mu, logvar))
    assert z.shape == (B, latent_dim) and mu.shape == (B, latent_dim) and logvar.shape == (B, latent_dim)
    assert bool(jnp.all(jnp.isfinite(z))) and bool(jnp.all(jnp.isfinite(mu))) and bool(jnp.all(jnp.isfinite(logvar)))
    print("KERNEL_OK")
</pallas_src>

<mosaic_0001>
module attributes {stable_mosaic.version = 11 : i64} {
  func.func @conv0_bn_lrelu_pool_kernel(%arg0: memref<64x112xbf16, #tpu.memory_space<vmem>>, %arg1: memref<112x128xbf16, #tpu.memory_space<vmem>>, %arg2: memref<2x16x128xf32, #tpu.memory_space<vmem>>) attributes {dimension_semantics = [], scalar_prefetch = 0 : i64, scratch_operands = 0 : i64, tpu.core_type = #tpu.core_type<tc>} {
    %c0 = arith.constant 0 : index
    %c0_0 = arith.constant 0 : index
    %0 = vector.load %arg0[%c0, %c0_0] : memref<64x112xbf16, #tpu.memory_space<vmem>>, vector<64x112xbf16>
    %c0_1 = arith.constant 0 : index
    %c0_2 = arith.constant 0 : index
    %1 = vector.load %arg1[%c0_1, %c0_2] : memref<112x128xbf16, #tpu.memory_space<vmem>>, vector<112x128xbf16>
    %cst = arith.constant dense<0.000000e+00> : vector<64x128xf32>
    %2 = tpu.matmul %0, %1, %cst {dimension_numbers = #tpu.dot_dimension_numbers<[1], [0], [0], [1], [0, 0, 1, 1], [], []>} : vector<64x112xbf16>, vector<112x128xbf16>, vector<64x128xf32> -> vector<64x128xf32>
    %cst_3 = arith.constant dense<0.000000e+00> : vector<128xf32>
    %3 = vector.multi_reduction <add>, %2, %cst_3 [0] : vector<64x128xf32> to vector<128xf32>
    %4 = vector.shape_cast %3 : vector<128xf32> to vector<1x128xf32>
    %cst_4 = arith.constant 6.400000e+01 : f32
    %5 = vector.broadcast %cst_4 : f32 to vector<1x128xf32>
    %6 = arith.divf %4, %5 : vector<1x128xf32>
    %7 = arith.mulf %2, %2 : vector<64x128xf32>
    %cst_5 = arith.constant dense<0.000000e+00> : vector<128xf32>
    %8 = vector.multi_reduction <add>, %7, %cst_5 [0] : vector<64x128xf32> to vector<128xf32>
    %9 = vector.shape_cast %8 : vector<128xf32> to vector<1x128xf32>
    %cst_6 = arith.constant 6.400000e+01 : f32
    %10 = vector.broadcast %cst_6 : f32 to vector<1x128xf32>
    %11 = arith.divf %9, %10 : vector<1x128xf32>
    %12 = arith.mulf %6, %6 : vector<1x128xf32>
    %13 = arith.subf %11, %12 : vector<1x128xf32>
    %cst_7 = arith.constant 0.000000e+00 : f32
    %14 = vector.broadcast %cst_7 : f32 to vector<1x128xf32>
    %15 = arith.maximumf %13, %14 : vector<1x128xf32>
    %16 = vector.broadcast %6 : vector<1x128xf32> to vector<64x128xf32>
    %17 = arith.subf %2, %16 : vector<64x128xf32>
    %cst_8 = arith.constant 9.99999974E-6 : f32
    %18 = vector.broadcast %cst_8 : f32 to vector<1x128xf32>
    %19 = arith.addf %15, %18 : vector<1x128xf32>
    %20 = math.rsqrt %19 : vector<1x128xf32>
    %21 = vector.broadcast %20 : vector<1x128xf32> to vector<64x128xf32>
    %22 = arith.mulf %17, %21 : vector<64x128xf32>
    %cst_9 = arith.constant 0.000000e+00 : f32
    %23 = vector.broadcast %cst_9 : f32 to vector<64x128xf32>
    %24 = arith.cmpf ogt, %22, %23 : vector<64x128xf32>
    %cst_10 = arith.constant 0.00999999977 : f32
    %25 = vector.broadcast %cst_10 : f32 to vector<64x128xf32>
    %26 = arith.mulf %25, %22 : vector<64x128xf32>
    %27 = arith.select %24, %22, %26 : vector<64x128xi1>, vector<64x128xf32>
    %cst_11 = arith.constant 0xFF800000 : f32
    %28 = vector.broadcast %cst_11 : f32 to vector<1x128xf32>
    %29 = vector.extract_strided_slice %27 {offsets = [0, 0], sizes = [16, 128], strides = [1, 1]} : vector<64x128xf32> to vector<16x128xf32>
    %30 = vector.extract_strided_slice %27 {offsets = [16, 0], sizes = [16, 128], strides = [1, 1]} : vector<64x128xf32> to vector<16x128xf32>
    %31 = vector.extract_strided_slice %30 {offsets = [0, 0], sizes = [15, 128], strides = [1, 1]} : vector<16x128xf32> to vector<15x128xf32>
    %32 = tpu.concatenate %28, %31 in 0 : vector<1x128xf32>, vector<15x128xf32> -> vector<16x128xf32>
    %33 = arith.maximumf %29, %30 : vector<16x128xf32>
    %34 = arith.maximumf %33, %32 : vector<16x128xf32>
    %c0_12 = arith.constant 0 : index
    %c0_13 = arith.constant 0 : index
    %c0_14 = arith.constant 0 : index
    %35 = vector.load %arg2[%c0_12, %c0_13, %c0_14] : memref<2x16x128xf32, #tpu.memory_space<vmem>>, vector<1x16x128xf32>
    %36 = vector.shape_cast %35 : vector<1x16x128xf32> to vector<16x128xf32>
    %37 = vector.shape_cast %34 : vector<16x128xf32> to vector<1x16x128xf32>
    tpu.vector_store %arg2[%c0_12, %c0_13, %c0_14], %37 {strides = array<i32>} : memref<2x16x128xf32, #tpu.memory_space<vmem>>, vector<1x16x128xf32>,
    %38 = vector.extract_strided_slice %27 {offsets = [32, 0], sizes = [16, 128], strides = [1, 1]} : vector<64x128xf32> to vector<16x128xf32>
    %39 = vector.extract_strided_slice %27 {offsets = [48, 0], sizes = [16, 128], strides = [1, 1]} : vector<64x128xf32> to vector<16x128xf32>
    %40 = vector.extract_strided_slice %39 {offsets = [0, 0], sizes = [15, 128], strides = [1, 1]} : vector<16x128xf32> to vector<15x128xf32>
    %41 = tpu.concatenate %28, %40 in 0 : vector<1x128xf32>, vector<15x128xf32> -> vector<16x128xf32>
    %42 = arith.maximumf %38, %39 : vector<16x128xf32>
    %43 = arith.maximumf %42, %41 : vector<16x128xf32>
    %c1 = arith.constant 1 : index
    %c0_15 = arith.constant 0 : index
    %c0_16 = arith.constant 0 : index
    %44 = vector.load %arg2[%c1, %c0_15, %c0_16] : memref<2x16x128xf32, #tpu.memory_space<vmem>>, vector<1x16x128xf32>
    %45 = vector.shape_cast %44 : vector<1x16x128xf32> to vector<16x128xf32>
    %46 = vector.shape_cast %43 : vector<16x128xf32> to vector<1x16x128xf32>
    tpu.vector_store %arg2[%c1, %c0_15, %c0_16], %46 {strides = array<i32>} : memref<2x16x128xf32, #tpu.memory_space<vmem>>, vector<1x16x128xf32>,
    return
  }
}

module attributes {stable_mosaic.version = 11 : i64} {
  func.func @conv_bn_lrelu_kernel(%arg0: memref<16x192xbf16, #tpu.memory_space<vmem>>, %arg1: memref<192x128xbf16, #tpu.memory_space<vmem>>, %arg2: memref<16x128xf32, #tpu.memory_space<vmem>>) attributes {dimension_semantics = [], scalar_prefetch = 0 : i64, scratch_operands = 0 : i64, tpu.core_type = #tpu.core_type<tc>} {
    %c0 = arith.constant 0 : index
    %c0_0 = arith.constant 0 : index
    %0 = vector.load %arg0[%c0, %c0_0] : memref<16x192xbf16, #tpu.memory_space<vmem>>, vector<16x192xbf16>
    %c0_1 = arith.constant 0 : index
    %c0_2 = arith.constant 0 : index
    %1 = vector.load %arg1[%c0_1, %c0_2] : memref<192x128xbf16, #tpu.memory_space<vmem>>, vector<192x128xbf16>
    %cst = arith.constant dense<0.000000e+00> : vector<16x128xf32>
    %2 = tpu.matmul %0, %1, %cst {dimension_numbers = #tpu.dot_dimension_numbers<[1], [0], [0], [1], [0, 0, 1, 1], [], []>} : vector<16x192xbf16>, vector<192x128xbf16>, vector<16x128xf32> -> vector<16x128xf32>
    %cst_3 = arith.constant dense<0.000000e+00> : vector<128xf32>
    %3 = vector.multi_reduction <add>, %2, %cst_3 [0] : vector<16x128xf32> to vector<128xf32>
    %4 = vector.shape_cast %3 : vector<128xf32> to vector<1x128xf32>
    %cst_4 = arith.constant 1.600000e+01 : f32
    %5 = vector.broadcast %cst_4 : f32 to vector<1x128xf32>
    %6 = arith.divf %4, %5 : vector<1x128xf32>
    %7 = arith.mulf %2, %2 : vector<16x128xf32>
    %cst_5 = arith.constant dense<0.000000e+00> : vector<128xf32>
    %8 = vector.multi_reduction <add>, %7, %cst_5 [0] : vector<16x128xf32> to vector<128xf32>
    %9 = vector.shape_cast %8 : vector<128xf32> to vector<1x128xf32>
    %cst_6 = arith.constant 1.600000e+01 : f32
    %10 = vector.broadcast %cst_6 : f32 to vector<1x128xf32>
    %11 = arith.divf %9, %10 : vector<1x128xf32>
    %12 = arith.mulf %6, %6 : vector<1x128xf32>
    %13 = arith.subf %11, %12 : vector<1x128xf32>
    %cst_7 = arith.constant 0.000000e+00 : f32
    %14 = vector.broadcast %cst_7 : f32 to vector<1x128xf32>
    %15 = arith.maximumf %13, %14 : vector<1x128xf32>
    %16 = vector.broadcast %6 : vector<1x128xf32> to vector<16x128xf32>
    %17 = arith.subf %2, %16 : vector<16x128xf32>
    %cst_8 = arith.constant 9.99999974E-6 : f32
    %18 = vector.broadcast %cst_8 : f32 to vector<1x128xf32>
    %19 = arith.addf %15, %18 : vector<1x128xf32>
    %20 = math.rsqrt %19 : vector<1x128xf32>
    %21 = vector.broadcast %20 : vector<1x128xf32> to vector<16x128xf32>
    %22 = arith.mulf %17, %21 : vector<16x128xf32>
    %cst_9 = arith.constant 0.000000e+00 : f32
    %23 = vector.broadcast %cst_9 : f32 to vector<16x128xf32>
    %24 = arith.cmpf ogt, %22, %23 : vector<16x128xf32>
    %cst_10 = arith.constant 0.00999999977 : f32
    %25 = vector.broadcast %cst_10 : f32 to vector<16x128xf32>
    %26 = arith.mulf %25, %22 : vector<16x128xf32>
    %27 = arith.select %24, %22, %26 : vector<16x128xi1>, vector<16x128xf32>
    %c0_11 = arith.constant 0 : index
    %c0_12 = arith.constant 0 : index
    %28 = vector.load %arg2[%c0_11, %c0_12] : memref<16x128xf32, #tpu.memory_space<vmem>>, vector<16x128xf32>
    tpu.vector_store %arg2[%c0_11, %c0_12], %27 {strides = array<i32>} : memref<16x128xf32, #tpu.memory_space<vmem>>, vector<16x128xf32>,
    return
  }
}

module attributes {stable_mosaic.version = 11 : i64} {
  func.func @gru_head_kernel(%arg0: memref<64x128xbf16, #tpu.memory_space<vmem>>, %arg1: memref<128x768xbf16, #tpu.memory_space<vmem>>, %arg2: memref<128x384xbf16, #tpu.memory_space<vmem>>, %arg3: memref<128x384xbf16, #tpu.memory_space<vmem>>, %arg4: memref<1x768xf32, #tpu.memory_space<vmem>>, %arg5: memref<1x384xf32, #tpu.memory_space<vmem>>, %arg6: memref<1x384xf32, #tpu.memory_space<vmem>>, %arg7: memref<256x768xbf16, #tpu.memory_space<vmem>>, %arg8: memref<128x384xbf16, #tpu.memory_space<vmem>>, %arg9: memref<128x384xbf16, #tpu.memory_space<vmem>>, %arg10: memref<1x768xf32, #tpu.memory_space<vmem>>, %arg11: memref<1x384xf32, #tpu.memory_space<vmem>>, %arg12: memref<1x384xf32, #tpu.memory_space<vmem>>, %arg13: memref<256x128xbf16, #tpu.memory_space<vmem>>, %arg14: memref<1x128xf32, #tpu.memory_space<vmem>>, %arg15: memref<256x128xbf16, #tpu.memory_space<vmem>>, %arg16: memref<1x128xf32, #tpu.memory_space<vmem>>, %arg17: memref<8x128xf32, #tpu.memory_space<vmem>>, %arg18: memref<8x128xf32, #tpu.memory_space<vmem>>, %arg19: memref<8x128xf32, #tpu.memory_space<vmem>>, %arg20: memref<8x128xf32, #tpu.memory_space<vmem>>, %arg21: memref<64x768xf32, #tpu.memory_space<vmem>>, %arg22: memref<64x128xf32, #tpu.memory_space<vmem>>, %arg23: memref<64x128xf32, #tpu.memory_space<vmem>>, %arg24: memref<64x768xf32, #tpu.memory_space<vmem>>) attributes {dimension_semantics = [], scalar_prefetch = 0 : i64, scratch_operands = 4 : i64, tpu.core_type = #tpu.core_type<tc>} {
    %cst = arith.constant 0.000000e+00 : f32
    %0 = vector.broadcast %cst : f32 to vector<8x128xf32>
    %c0 = arith.constant 0 : index
    %c0_0 = arith.constant 0 : index
    %1 = vector.load %arg0[%c0, %c0_0] : memref<64x128xbf16, #tpu.memory_space<vmem>>, vector<64x128xbf16>
    %c0_1 = arith.constant 0 : index
    %c0_2 = arith.constant 0 : index
    %2 = vector.load %arg1[%c0_1, %c0_2] : memref<128x768xbf16, #tpu.memory_space<vmem>>, vector<128x768xbf16>
    %cst_3 = arith.constant dense<0.000000e+00> : vector<64x768xf32>
    %3 = tpu.matmul %1, %2, %cst_3 {dimension_numbers = #tpu.dot_dimension_numbers<[1], [0], [0], [1], [0, 0, 1, 1], [], []>} : vector<64x128xbf16>, vector<128x768xbf16>, vector<64x768xf32> -> vector<64x768xf32>
    %c0_4 = arith.constant 0 : index
    %c0_5 = arith.constant 0 : index
    %4 = vector.load %arg4[%c0_4, %c0_5] : memref<1x768xf32, #tpu.memory_space<vmem>>, vector<1x768xf32>
    %5 = vector.broadcast %4 : vector<1x768xf32> to vector<64x768xf32>
    %6 = arith.addf %3, %5 : vector<64x768xf32>
    %c0_6 = arith.constant 0 : index
    %c0_7 = arith.constant 0 : index
    %7 = vector.load %arg21[%c0_6, %c0_7] : memref<64x768xf32, #tpu.memory_space<vmem>>, vector<64x768xf32>
    tpu.vector_store %arg21[%c0_6, %c0_7], %6 {strides = array<i32>} : memref<64x768xf32, #tpu.memory_space<vmem>>, vector<64x768xf32>,
    %c0_i32 = arith.constant 0 : i32
    %c8_i32 = arith.constant 8 : i32
    %8 = arith.addi %c0_i32, %c8_i32 : i32
    %c1_i32 = arith.constant 1 : i32
    %9:2 = scf.for %arg25 = %c0_i32 to %8 step %c1_i32 iter_args(%arg26 = %0, %arg27 = %0) -> (vector<8x128xf32>, vector<8x128xf32>)  : i32 {
      %c7_i32 = arith.constant 7 : i32
      %45 = arith.subi %c7_i32, %arg25 : i32
      %c8_i32_44 = arith.constant 8 : i32
      %46 = arith.muli %arg25, %c8_i32_44 : i32
      %47 = tpu.assume_multiple %46, 8 : i32
      %c8_i32_45 = arith.constant 8 : i32
      %48 = arith.muli %45, %c8_i32_45 : i32
      %49 = tpu.assume_multiple %48, 8 : i32
      %50 = arith.index_cast %47 : i32 to index
      %c0_46 = arith.constant 0 : index
      %51 = vector.load %arg21[%50, %c0_46] : memref<64x768xf32, #tpu.memory_space<vmem>>, vector<8x768xf32>
      %52 = arith.index_cast %49 : i32 to index
      %c0_47 = arith.constant 0 : index
      %53 = vector.load %arg21[%52, %c0_47] : memref<64x768xf32, #tpu.memory_space<vmem>>, vector<8x768xf32>
      %54 = arith.truncf %arg26 : vector<8x128xf32> to vector<8x128xbf16>
      %c0_48 = arith.constant 0 : index
      %c0_49 = arith.constant 0 : index
      %55 = vector.load %arg2[%c0_48, %c0_49] : memref<128x384xbf16, #tpu.memory_space<vmem>>, vector<128x384xbf16>
      %cst_50 = arith.constant dense<0.000000e+00> : vector<8x384xf32>
      %56 = tpu.matmul %54, %55, %cst_50 {dimension_numbers = #tpu.dot_dimension_numbers<[1], [0], [0], [1], [0, 0, 1, 1], [], []>} : vector<8x128xbf16>, vector<128x384xbf16>, vector<8x384xf32> -> vector<8x384xf32>
      %c0_51 = arith.constant 0 : index
      %c0_52 = arith.constant 0 : index
      %57 = vector.load %arg5[%c0_51, %c0_52] : memref<1x384xf32, #tpu.memory_space<vmem>>, vector<1x384xf32>
      %58 = vector.broadcast %57 : vector<1x384xf32> to vector<8x384xf32>
      %59 = arith.addf %56, %58 : vector<8x384xf32>
      %60 = arith.truncf %arg27 : vector<8x128xf32> to vector<8x128xbf16>
      %c0_53 = arith.constant 0 : index
      %c0_54 = arith.constant 0 : index
      %61 = vector.load %arg3[%c0_53, %c0_54] : memref<128x384xbf16, #tpu.memory_space<vmem>>, vector<128x384xbf16>
      %cst_55 = arith.constant dense<0.000000e+00> : vector<8x384xf32>
      %62 = tpu.matmul %60, %61, %cst_55 {dimension_numbers = #tpu.dot_dimension_numbers<[1], [0], [0], [1], [0, 0, 1, 1], [], []>} : vector<8x128xbf16>, vector<128x384xbf16>, vector<8x384xf32> -> vector<8x384xf32>
      %c0_56 = arith.constant 0 : index
      %c0_57 = arith.constant 0 : index
      %63 = vector.load %arg6[%c0_56, %c0_57] : memref<1x384xf32, #tpu.memory_space<vmem>>, vector<1x384xf32>
      %64 = vector.broadcast %63 : vector<1x384xf32> to vector<8x384xf32>
      %65 = arith.addf %62, %64 : vector<8x384xf32>
      %66 = vector.extract_strided_slice %51 {offsets = [0, 0], sizes = [8, 384], strides = [1, 1]} : vector<8x768xf32> to vector<8x384xf32>
      %67 = vector.extract_strided_slice %66 {offsets = [0, 0], sizes = [8, 128], strides = [1, 1]} : vector<8x384xf32> to vector<8x128xf32>
      %68 = vector.extract_strided_slice %59 {offsets = [0, 0], sizes = [8, 128], strides = [1, 1]} : vector<8x384xf32> to vector<8x128xf32>
      %69 = arith.addf %67, %68 : vector<8x128xf32>
      %70 = arith.negf %69 : vector<8x128xf32>
      %71 = math.exp %70 : vector<8x128xf32>
      %cst_58 = arith.constant 1.000000e+00 : f32
      %72 = vector.broadcast %cst_58 : f32 to vector<8x128xf32>
      %73 = arith.addf %72, %71 : vector<8x128xf32>
      %74 = arith.divf %72, %73 : vector<8x128xf32>
      %75 = vector.extract_strided_slice %66 {offsets = [0, 128], sizes = [8, 128], strides = [1, 1]} : vector<8x384xf32> to vector<8x128xf32>
      %76 = vector.extract_strided_slice %59 {offsets = [0, 128], sizes = [8, 128], strides = [1, 1]} : vector<8x384xf32> to vector<8x128xf32>
      %77 = arith.addf %75, %76 : vector<8x128xf32>
      %78 = arith.negf %77 : vector<8x128xf32>
      %79 = math.exp %78 : vector<8x128xf32>
      %cst_59 = arith.constant 1.000000e+00 : f32
      %80 = vector.broadcast %cst_59 : f32 to vector<8x128xf32>
      %81 = arith.addf %80, %79 : vector<8x128xf32>
      %82 = arith.divf %80, %81 : vector<8x128xf32>
      %83 = vector.extract_strided_slice %66 {offsets = [0, 256], sizes = [8, 128], strides = [1, 1]} : vector<8x384xf32> to vector<8x128xf32>
      %84 = vector.extract_strided_slice %59 {offsets = [0, 256], sizes = [8, 128], strides = [1, 1]} : vector<8x384xf32> to vector<8x128xf32>
      %85 = arith.mulf %74, %84 : vector<8x128xf32>
      %86 = arith.addf %83, %85 : vector<8x128xf32>
      %87 = math.tanh %86 : vector<8x128xf32>
      %cst_60 = arith.constant 1.000000e+00 : f32
      %88 = vector.broadcast %cst_60 : f32 to vector<8x128xf32>
      %89 = arith.subf %88, %82 : vector<8x128xf32>
      %90 = arith.mulf %89, %87 : vector<8x128xf32>
      %91 = arith.mulf %82, %arg26 : vector<8x128xf32>
      %92 = arith.addf %90, %91 : vector<8x128xf32>
      %93 = vector.extract_strided_slice %53 {offsets = [0, 384], sizes = [8, 384], strides = [1, 1]} : vector<8x768xf32> to vector<8x384xf32>
      %94 = vector.extract_strided_slice %93 {offsets = [0, 0], sizes = [8, 128], strides = [1, 1]} : vector<8x384xf32> to vector<8x128xf32>
      %95 = vector.extract_strided_slice %65 {offsets = [0, 0], sizes = [8, 128], strides = [1, 1]} : vector<8x384xf32> to vector<8x128xf32>
      %96 = arith.addf %94, %95 : vector<8x128xf32>
      %97 = arith.negf %96 : vector<8x128xf32>
      %98 = math.exp %97 : vector<8x128xf32>
      %cst_61 = arith.constant 1.000000e+00 : f32
      %99 = vector.broadcast %cst_61 : f32 to vector<8x128xf32>
      %100 = arith.addf %99, %98 : vector<8x128xf32>
      %101 = arith.divf %99, %100 : vector<8x128xf32>
      %102 = vector.extract_strided_slice %93 {offsets = [0, 128], sizes = [8, 128], strides = [1, 1]} : vector<8x384xf32> to vector<8x128xf32>
      %103 = vector.extract_strided_slice %65 {offsets = [0, 128], sizes = [8, 128], strides = [1, 1]} : vector<8x384xf32> to vector<8x128xf32>
      %104 = arith.addf %102, %103 : vector<8x128xf32>
      %105 = arith.negf %104 : vector<8x128xf32>
      %106 = math.exp %105 : vector<8x128xf32>
      %cst_62 = arith.constant 1.000000e+00 : f32
      %107 = vector.broadcast %cst_62 : f32 to vector<8x128xf32>
      %108 = arith.addf %107, %106 : vector<8x128xf32>
      %109 = arith.divf %107, %108 : vector<8x128xf32>
      %110 = vector.extract_strided_slice %93 {offsets = [0, 256], sizes = [8, 128], strides = [1, 1]} : vector<8x384xf32> to vector<8x128xf32>
      %111 = vector.extract_strided_slice %65 {offsets = [0, 256], sizes = [8, 128], strides = [1, 1]} : vector<8x384xf32> to vector<8x128xf32>
      %112 = arith.mulf %101, %111 : vector<8x128xf32>
      %113 = arith.addf %110, %112 : vector<8x128xf32>
      %114 = math.tanh %113 : vector<8x128xf32>
      %cst_63 = arith.constant 1.000000e+00 : f32
      %115 = vector.broadcast %cst_63 : f32 to vector<8x128xf32>
      %116 = arith.subf %115, %109 : vector<8x128xf32>
      %117 = arith.mulf %116, %114 : vector<8x128xf32>
      %118 = arith.mulf %109, %arg27 : vector<8x128xf32>
      %119 = arith.addf %117, %118 : vector<8x128xf32>
      %120 = arith.index_cast %47 : i32 to index
      %c0_64 = arith.constant 0 : index
      %121 = vector.load %arg22[%120, %c0_64] : memref<64x128xf32, #tpu.memory_space<vmem>>, vector<8x128xf32>
      tpu.vector_store %arg22[%120, %c0_64], %92 {strides = array<i32>} : memref<64x128xf32, #tpu.memory_space<vmem>>, vector<8x128xf32>,
      %122 = arith.index_cast %49 : i32 to index
      %c0_65 = arith.constant 0 : index
      %123 = vector.load %arg23[%122, %c0_65] : memref<64x128xf32, #tpu.memory_space<vmem>>, vector<8x128xf32>
      tpu.vector_store %arg23[%122, %c0_65], %119 {strides = array<i32>} : memref<64x128xf32, #tpu.memory_space<vmem>>, vector<8x128xf32>,
      scf.yield %92, %119 : vector<8x128xf32>, vector<8x128xf32>
    }
    %c8_i32_8 = arith.constant 8 : i32
    %c0_9 = arith.constant 0 : index
    %c0_10 = arith.constant 0 : index
    %10 = vector.load %arg22[%c0_9, %c0_10] : memref<64x128xf32, #tpu.memory_space<vmem>>, vector<64x128xf32>
    %c0_11 = arith.constant 0 : index
    %c0_12 = arith.constant 0 : index
    %11 = vector.load %arg23[%c0_11, %c0_12] : memref<64x128xf32, #tpu.memory_space<vmem>>, vector<64x128xf32>
    %12 = tpu.concatenate %10, %11 in 1 : vector<64x128xf32>, vector<64x128xf32> -> vector<64x256xf32>
    %13 = arith.truncf %12 : vector<64x256xf32> to vector<64x256xbf16>
    %c0_13 = arith.constant 0 : index
    %c0_14 = arith.constant 0 : index
    %14 = vector.load %arg7[%c0_13, %c0_14] : memref<256x768xbf16, #tpu.memory_space<vmem>>, vector<256x768xbf16>
    %cst_15 = arith.constant dense<0.000000e+00> : vector<64x768xf32>
    %15 = tpu.matmul %13, %14, %cst_15 {dimension_numbers = #tpu.dot_dimension_numbers<[1], [0], [0], [1], [0, 0, 1, 1], [], []>} : vector<64x256xbf16>, vector<256x768xbf16>, vector<64x768xf32> -> vector<64x768xf32>
    %c0_16 = arith.constant 0 : index
    %c0_17 = arith.constant 0 : index
    %16 = vector.load %arg10[%c0_16, %c0_17] : memref<1x768xf32, #tpu.memory_space<vmem>>, vector<1x768xf32>
    %17 = vector.broadcast %16 : vector<1x768xf32> to vector<64x768xf32>
    %18 = arith.addf %15, %17 : vector<64x768xf32>
    %c0_18 = arith.constant 0 : index
    %c0_19 = arith.constant 0 : index
    %19 = vector.load %arg24[%c0_18, %c0_19] : memref<64x768xf32, #tpu.memory_space<vmem>>, vector<64x768xf32>
    tpu.vector_store %arg24[%c0_18, %c0_19], %18 {strides = array<i32>} : memref<64x768xf32, #tpu.memory_space<vmem>>, vector<64x768xf32>,
    %c0_i32_20 = arith.constant 0 : i32
    %c8_i32_21 = arith.constant 8 : i32
    %20 = arith.addi %c0_i32_20, %c8_i32_21 : i32
    %c1_i32_22 = arith.constant 1 : i32
    %21:4 = scf.for %arg25 = %c0_i32_20 to %20 step %c1_i32_22 iter_args(%arg26 = %0, %arg27 = %0, %arg28 = %0, %arg29 = %0) -> (vector<8x128xf32>, vector<8x128xf32>, vector<8x128xf32>, vector<8x128xf32>)  : i32 {
      %c7_i32 = arith.constant 7 : i32
      %45 = arith.subi %c7_i32, %arg25 : i32
      %c8_i32_44 = arith.constant 8 : i32
      %46 = arith.muli %arg25, %c8_i32_44 : i32
      %47 = tpu.assume_multiple %46, 8 : i32
      %c8_i32_45 = arith.constant 8 : i32
      %48 = arith.muli %45, %c8_i32_45 : i32
      %49 = tpu.assume_multiple %48, 8 : i32
      %50 = arith.index_cast %47 : i32 to index
      %c0_46 = arith.constant 0 : index
      %51 = vector.load %arg24[%50, %c0_46] : memref<64x768xf32, #tpu.memory_space<vmem>>, vector<8x768xf32>
      %52 = arith.index_cast %49 : i32 to index
      %c0_47 = arith.constant 0 : index
      %53 = vector.load %arg24[%52, %c0_47] : memref<64x768xf32, #tpu.memory_space<vmem>>, vector<8x768xf32>
      %54 = arith.truncf %arg26 : vector<8x128xf32> to vector<8x128xbf16>
      %c0_48 = arith.constant 0 : index
      %c0_49 = arith.constant 0 : index
      %55 = vector.load %arg8[%c0_48, %c0_49] : memref<128x384xbf16, #tpu.memory_space<vmem>>, vector<128x384xbf16>
      %cst_50 = arith.constant dense<0.000000e+00> : vector<8x384xf32>
      %56 = tpu.matmul %54, %55, %cst_50 {dimension_numbers = #tpu.dot_dimension_numbers<[1], [0], [0], [1], [0, 0, 1, 1], [], []>} : vector<8x128xbf16>, vector<128x384xbf16>, vector<8x384xf32> -> vector<8x384xf32>
      %c0_51 = arith.constant 0 : index
      %c0_52 = arith.constant 0 : index
      %57 = vector.load %arg11[%c0_51, %c0_52] : memref<1x384xf32, #tpu.memory_space<vmem>>, vector<1x384xf32>
      %58 = vector.broadcast %57 : vector<1x384xf32> to vector<8x384xf32>
      %59 = arith.addf %56, %58 : vector<8x384xf32>
      %60 = arith.truncf %arg27 : vector<8x128xf32> to vector<8x128xbf16>
      %c0_53 = arith.constant 0 : index
      %c0_54 = arith.constant 0 : index
      %61 = vector.load %arg9[%c0_53, %c0_54] : memref<128x384xbf16, #tpu.memory_space<vmem>>, vector<128x384xbf16>
      %cst_55 = arith.constant dense<0.000000e+00> : vector<8x384xf32>
      %62 = tpu.matmul %60, %61, %cst_55 {dimension_numbers = #tpu.dot_dimension_numbers<[1], [0], [0], [1], [0, 0, 1, 1], [], []>} : vector<8x128xbf16>, vector<128x384xbf16>, vector<8x384xf32> -> vector<8x384xf32>
      %c0_56 = arith.constant 0 : index
      %c0_57 = arith.constant 0 : index
      %63 = vector.load %arg12[%c0_56, %c0_57] : memref<1x384xf32, #tpu.memory_space<vmem>>, vector<1x384xf32>
      %64 = vector.broadcast %63 : vector<1x384xf32> to vector<8x384xf32>
      %65 = arith.addf %62, %64 : vector<8x384xf32>
      %66 = vector.extract_strided_slice %51 {offsets = [0, 0], sizes = [8, 384], strides = [1, 1]} : vector<8x768xf32> to vector<8x384xf32>
      %67 = vector.extract_strided_slice %66 {offsets = [0, 0], sizes = [8, 128], strides = [1, 1]} : vector<8x384xf32> to vector<8x128xf32>
      %68 = vector.extract_strided_slice %59 {offsets = [0, 0], sizes = [8, 128], strides = [1, 1]} : vector<8x384xf32> to vector<8x128xf32>
      %69 = arith.addf %67, %68 : vector<8x128xf32>
      %70 = arith.negf %69 : vector<8x128xf32>
      %71 = math.exp %70 : vector<8x128xf32>
      %cst_58 = arith.constant 1.000000e+00 : f32
      %72 = vector.broadcast %cst_58 : f32 to vector<8x128xf32>
      %73 = arith.addf %72, %71 : vector<8x128xf32>
      %74 = arith.divf %72, %73 : vector<8x128xf32>
      %75 = vector.extract_strided_slice %66 {offsets = [0, 128], sizes = [8, 128], strides = [1, 1]} : vector<8x384xf32> to vector<8x128xf32>
      %76 = vector.extract_strided_slice %59 {offsets = [0, 128], sizes = [8, 128], strides = [1, 1]} : vector<8x384xf32> to vector<8x128xf32>
      %77 = arith.addf %75, %76 : vector<8x128xf32>
      %78 = arith.negf %77 : vector<8x128xf32>
      %79 = math.exp %78 : vector<8x128xf32>
      %cst_59 = arith.constant 1.000000e+00 : f32
      %80 = vector.broadcast %cst_59 : f32 to vector<8x128xf32>
      %81 = arith.addf %80, %79 : vector<8x128xf32>
      %82 = arith.divf %80, %81 : vector<8x128xf32>
      %83 = vector.extract_strided_slice %66 {offsets = [0, 256], sizes = [8, 128], strides = [1, 1]} : vector<8x384xf32> to vector<8x128xf32>
      %84 = vector.extract_strided_slice %59 {offsets = [0, 256], sizes = [8, 128], strides = [1, 1]} : vector<8x384xf32> to vector<8x128xf32>
      %85 = arith.mulf %74, %84 : vector<8x128xf32>
      %86 = arith.addf %83, %85 : vector<8x128xf32>
      %87 = math.tanh %86 : vector<8x128xf32>
      %cst_60 = arith.constant 1.000000e+00 : f32
      %88 = vector.broadcast %cst_60 : f32 to vector<8x128xf32>
      %89 = arith.subf %88, %82 : vector<8x128xf32>
      %90 = arith.mulf %89, %87 : vector<8x128xf32>
      %91 = arith.mulf %82, %arg26 : vector<8x128xf32>
      %92 = arith.addf %90, %91 : vector<8x128xf32>
      %93 = vector.extract_strided_slice %53 {offsets = [0, 384], sizes = [8, 384], strides = [1, 1]} : vector<8x768xf32> to vector<8x384xf32>
      %94 = vector.extract_strided_slice %93 {offsets = [0, 0], sizes = [8, 128], strides = [1, 1]} : vector<8x384xf32> to vector<8x128xf32>
      %95 = vector.extract_strided_slice %65 {offsets = [0, 0], sizes = [8, 128], strides = [1, 1]} : vector<8x384xf32> to vector<8x128xf32>
      %96 = arith.addf %94, %95 : vector<8x128xf32>
      %97 = arith.negf %96 : vector<8x128xf32>
      %98 = math.exp %97 : vector<8x128xf32>
      %cst_61 = arith.constant 1.000000e+00 : f32
      %99 = vector.broadcast %cst_61 : f32 to vector<8x128xf32>
      %100 = arith.addf %99, %98 : vector<8x128xf32>
      %101 = arith.divf %99, %100 : vector<8x128xf32>
      %102 = vector.extract_strided_slice %93 {offsets = [0, 128], sizes = [8, 128], strides = [1, 1]} : vector<8x384xf32> to vector<8x128xf32>
      %103 = vector.extract_strided_slice %65 {offsets = [0, 128], sizes = [8, 128], strides = [1, 1]} : vector<8x384xf32> to vector<8x128xf32>
      %104 = arith.addf %102, %103 : vector<8x128xf32>
      %105 = arith.negf %104 : vector<8x128xf32>
      %106 = math.exp %105 : vector<8x128xf32>
      %cst_62 = arith.constant 1.000000e+00 : f32
      %107 = vector.broadcast %cst_62 : f32 to vector<8x128xf32>
      %108 = arith.addf %107, %106 : vector<8x128xf32>
      %109 = arith.divf %107, %108 : vector<8x128xf32>
      %110 = vector.extract_strided_slice %93 {offsets = [0, 256], sizes = [8, 128], strides = [1, 1]} : vector<8x384xf32> to vector<8x128xf32>
      %111 = vector.extract_strided_slice %65 {offsets = [0, 256], sizes = [8, 128], strides = [1, 1]} : vector<8x384xf32> to vector<8x128xf32>
      %112 = arith.mulf %101, %111 : vector<8x128xf32>
      %113 = arith.addf %110, %112 : vector<8x128xf32>
      %114 = math.tanh %113 : vector<8x128xf32>
      %cst_63 = arith.constant 1.000000e+00 : f32
      %115 = vector.broadcast %cst_63 : f32 to vector<8x128xf32>
      %116 = arith.subf %115, %109 : vector<8x128xf32>
      %117 = arith.mulf %116, %114 : vector<8x128xf32>
      %118 = arith.mulf %109, %arg27 : vector<8x128xf32>
      %119 = arith.addf %117, %118 : vector<8x128xf32>
      %120 = arith.addf %arg28, %92 : vector<8x128xf32>
      %121 = arith.addf %arg29, %119 : vector<8x128xf32>
      scf.yield %92, %119, %120, %121 : vector<8x128xf32>, vector<8x128xf32>, vector<8x128xf32>, vector<8x128xf32>
    }
    %c8_i32_23 = arith.constant 8 : i32
    %22 = tpu.concatenate %21#2, %21#3 in 1 : vector<8x128xf32>, vector<8x128xf32> -> vector<8x256xf32>
    %cst_24 = arith.constant 1.250000e-01 : f32
    %23 = vector.broadcast %cst_24 : f32 to vector<8x256xf32>
    %24 = arith.mulf %22, %23 : vector<8x256xf32>
    %25 = arith.truncf %24 : vector<8x256xf32> to vector<8x256xbf16>
    %c0_25 = arith.constant 0 : index
    %c0_26 = arith.constant 0 : index
    %26 = vector.load %arg13[%c0_25, %c0_26] : memref<256x128xbf16, #tpu.memory_space<vmem>>, vector<256x128xbf16>
    %cst_27 = arith.constant dense<0.000000e+00> : vector<8x128xf32>
    %27 = tpu.matmul %25, %26, %cst_27 {dimension_numbers = #tpu.dot_dimension_numbers<[1], [0], [0], [1], [0, 0, 1, 1], [], []>} : vector<8x256xbf16>, vector<256x128xbf16>, vector<8x128xf32> -> vector<8x128xf32>
    %c0_28 = arith.constant 0 : index
    %c0_29 = arith.constant 0 : index
    %28 = vector.load %arg14[%c0_28, %c0_29] : memref<1x128xf32, #tpu.memory_space<vmem>>, vector<1x128xf32>
    %29 = vector.broadcast %28 : vector<1x128xf32> to vector<8x128xf32>
    %30 = arith.addf %27, %29 : vector<8x128xf32>
    %c0_30 = arith.constant 0 : index
    %c0_31 = arith.constant 0 : index
    %31 = vector.load %arg15[%c0_30, %c0_31] : memref<256x128xbf16, #tpu.memory_space<vmem>>, vector<256x128xbf16>
    %cst_32 = arith.constant dense<0.000000e+00> : vector<8x128xf32>
    %32 = tpu.matmul %25, %31, %cst_32 {dimension_numbers = #tpu.dot_dimension_numbers<[1], [0], [0], [1], [0, 0, 1, 1], [], []>} : vector<8x256xbf16>, vector<256x128xbf16>, vector<8x128xf32> -> vector<8x128xf32>
    %c0_33 = arith.constant 0 : index
    %c0_34 = arith.constant 0 : index
    %33 = vector.load %arg16[%c0_33, %c0_34] : memref<1x128xf32, #tpu.memory_space<vmem>>, vector<1x128xf32>
    %34 = vector.broadcast %33 : vector<1x128xf32> to vector<8x128xf32>
    %35 = arith.addf %32, %34 : vector<8x128xf32>
    %c0_35 = arith.constant 0 : index
    %c0_36 = arith.constant 0 : index
    %36 = vector.load %arg17[%c0_35, %c0_36] : memref<8x128xf32, #tpu.memory_space<vmem>>, vector<8x128xf32>
    %cst_37 = arith.constant 5.000000e-01 : f32
    %37 = vector.broadcast %cst_37 : f32 to vector<8x128xf32>
    %38 = arith.mulf %37, %35 : vector<8x128xf32>
    %39 = math.exp %38 : vector<8x128xf32>
    %40 = arith.mulf %36, %39 : vector<8x128xf32>
    %41 = arith.addf %30, %40 : vector<8x128xf32>
    %c0_38 = arith.constant 0 : index
    %c0_39 = arith.constant 0 : index
    %42 = vector.load %arg18[%c0_38, %c0_39] : memref<8x128xf32, #tpu.memory_space<vmem>>, vector<8x128xf32>
    tpu.vector_store %arg18[%c0_38, %c0_39], %41 {strides = array<i32>} : memref<8x128xf32, #tpu.memory_space<vmem>>, vector<8x128xf32>,
    %c0_40 = arith.constant 0 : index
    %c0_41 = arith.constant 0 : index
    %43 = vector.load %arg19[%c0_40, %c0_41] : memref<8x128xf32, #tpu.memory_space<vmem>>, vector<8x128xf32>
    tpu.vector_store %arg19[%c0_40, %c0_41], %30 {strides = array<i32>} : memref<8x128xf32, #tpu.memory_space<vmem>>, vector<8x128xf32>,
    %c0_42 = arith.constant 0 : index
    %c0_43 = arith.constant 0 : index
    %44 = vector.load %arg20[%c0_42, %c0_43] : memref<8x128xf32, #tpu.memory_space<vmem>>, vector<8x128xf32>
    tpu.vector_store %arg20[%c0_42, %c0_43], %35 {strides = array<i32>} : memref<8x128xf32, #tpu.memory_space<vmem>>, vector<8x128xf32>,
    return
  }
}

</mosaic_0001>

<bundles_post_ra>
// kernel: fwd.3
= control target key start
LH: loop header
LB: loop body
LE: loop exit
PB: predicated region body
PF: predicated region fallthrough
CT: control target
= control target key end

     0   :  { %vm96_vm0 = vcmask 916480   ;;  %vm258_vm1 = vcmask 1040384   ;;  %s449_s1 = inlined_call_operand.vmem [shape: bf16[112,128], index: 1, kind: input, shape index: {}]   ;;  %s450_s0 = inlined_call_operand.vmem [shape: bf16[64,112], index: 0, kind: input, shape index: {}]   ;;  %s451_s2 = inlined_call_operand.vmem [shape: f32[2,16,128], index: 2, kind: output, shape index: {}]  }
   0x1   :  { %v354_v0 = vld [vmem:[%s449_s1] sm:$0xff]   ;;  %v355_v1 = vld [vmem:[%s449_s1 + $0x8] sm:$0xff]   ;;  %v356_v2 = vld [vmem:[%s449_s1 + $0x10] sm:$0xff]  }
   0x2   :  { %318 = vmatprep.subr.bf16.mxu0 %v354_v0  ;;  %340 = vmatprep.subr.bf16.mxu1 %v354_v0  ;;  %v361_v3 = vld [vmem:[%s450_s0] sm:$0xff]   ;;  %v357_v4 = vld [vmem:[%s449_s1 + $0x18] sm:$0xff]   ;;  %v363_v5 = vld [vmem:[%s450_s0 + $0x10] sm:$0xff]  }
   0x3   :  { %319 = vmatpush3.bf16.msra.mxu0 %v354_v0  ;;  %347 = vmatpush3.bf16.msra.mxu1 %v354_v0  ;;  %v358_v6 = vld [vmem:[%s449_s1 + $0x20] sm:$0xff]   ;;  %v359_v7 = vld [vmem:[%s449_s1 + $0x28] sm:$0xff]   ;;  %v360_v8 = vld [vmem:[%s449_s1 + $0x30] sm:$0xff]  }
   0x4   :  { %320 = vmatprep.subr.bf16.mxu0 %v355_v1  ;;  %341 = vmatprep.subr.bf16.mxu1 %v355_v1  ;;  %v362_v9 = vld [vmem:[%s450_s0 + $0x8] sm:$0xff]   ;;  %v364_v10 = vld [vmem:[%s450_s0 + $0x18] sm:$0xff]  }
   0x5   :  { %332 = vmatprep.mubr.msk.bf16.mxu0 %vm96_vm0, %v361_v3  ;;  %336 = vmatprep.mubr.msk.bf16.mxu1 %vm96_vm0, %v363_v5 }
   0x7   :  { %321 = vmatpush3.bf16.msra.mxu0 %v355_v1  ;;  %348 = vmatpush3.bf16.msra.mxu1 %v355_v1 }
   0x8   :  { %322 = vmatprep.subr.bf16.mxu0 %v356_v2  ;;  %342 = vmatprep.subr.bf16.mxu1 %v356_v2 }
   0xb   :  { %323 = vmatpush3.bf16.msra.mxu0 %v356_v2  ;;  %349 = vmatpush3.bf16.msra.mxu1 %v356_v2 }
   0xc   :  { %324 = vmatprep.subr.bf16.mxu0 %v357_v4  ;;  %343 = vmatprep.subr.bf16.mxu1 %v357_v4 }
   0xf   :  { %325 = vmatpush3.bf16.msra.mxu0 %v357_v4  ;;  %350 = vmatpush3.bf16.msra.mxu1 %v357_v4 }
  0x10   :  { %326 = vmatprep.subr.bf16.mxu0 %v358_v6  ;;  %344 = vmatprep.subr.bf16.mxu1 %v358_v6 }
  0x13   :  { %327 = vmatpush3.bf16.msra.mxu0 %v358_v6  ;;  %351 = vmatpush3.bf16.msra.mxu1 %v358_v6 }
  0x14   :  { %328 = vmatprep.subr.bf16.mxu0 %v359_v7  ;;  %345 = vmatprep.subr.bf16.mxu1 %v359_v7 }
  0x17   :  { %329 = vmatpush3.bf16.msra.mxu0 %v359_v7  ;;  %352 = vmatpush3.bf16.msra.mxu1 %v359_v7 }
  0x18   :  { %330 = vmatprep.subr.bf16.mxu0 %v360_v8  ;;  %346 = vmatprep.subr.bf16.mxu1 %v360_v8 }
  0x1b   :  { %331 = vmatpush3.bf16.msra.mxu0 %v360_v8  ;;  %353 = vmatpush3.bf16.msra.mxu1 %v360_v8 }
  0x1e   :  { %333 = vmatmul.mubr.msk.bf16.vlgmr.msra.gmra.mrb[0].mxu0 %vm96_vm0, %v362_v9  ;;  %337 = vmatmul.mubr.msk.bf16.vlgmr.msra.gmra.mrb[0].mxu1 %vm96_vm0, %v364_v10 }
  0xf1   :  { %v334_v11 = vpop.f32.mrb[0].mxu0  ;;  %v419_v12 = vpop.f32.mrb[0].mxu1 }
  0xf2   :  { %v143_v13 = vpop.f32.mrb[1].mxu0  ;;  %v159_v14 = vpop.f32.mrb[1].mxu1  ;;  %v191_v22 = vmul.f32 %v334_v11, %v334_v11  ;;  %v195_v34 = vmul.f32 %v419_v12, %v419_v12 }
  0xf3   :  { %v335_v15 = vpop.f32.mrb[2].mxu0  ;;  %v339_v16 = vpop.f32.mrb[2].mxu1  ;;  %v189_v19 = vmul.f32 %v143_v13, %v143_v13  ;;  %v193_v28 = vmul.f32 %v159_v14, %v159_v14 }
  0xf4   :  { %v146_v17 = vpop.f32.mrb[3].mxu0  ;;  %v162_v18 = vpop.f32.mrb[3].mxu1  ;;  %v192_v25 = vmul.f32 %v335_v15, %v335_v15  ;;  %v196_v37 = vmul.f32 %v339_v16, %v339_v16 }
  0xf5   :  { %v174_v20 = vadd.f32 %v146_v17, %v143_v13  ;;  %v190_v21 = vmul.f32 %v146_v17, %v146_v17  ;;  %v194_v33 = vmul.f32 %v162_v18, %v162_v18 }
  0xf7   :  { %v175_v23 = vadd.f32 %v334_v11, %v174_v20  ;;  %v197_v24 = vadd.f32 %v190_v21, %v189_v19 }
  0xf9   :  { %v198_v26 = vadd.f32 %v197_v24, %v191_v22  ;;  %v176_v27 = vadd.f32 %v335_v15, %v175_v23 }
  0xfb   :  { %v177_v29 = vadd.f32 %v176_v27, %v159_v14  ;;  %v199_v30 = vadd.f32 %v198_v26, %v192_v25 }
  0xfd   :  { %v200_v31 = vadd.f32 %v199_v30, %v193_v28  ;;  %v178_v32 = vadd.f32 %v177_v29, %v162_v18 }
  0xff   :  { %v179_v35 = vadd.f32 %v419_v12, %v178_v32  ;;  %v201_v36 = vadd.f32 %v200_v31, %v194_v33 }
 0x101   :  { %v180_v38 = vadd.f32 %v339_v16, %v179_v35  ;;  %v202_v39 = vadd.f32 %v201_v36, %v195_v34 }
 0x103   :  { %v181_v40 = vrot.slane %v180_v38, 4  ;;  %v203_v41 = vadd.f32 %v202_v39, %v196_v37 }
 0x105   :  { %v182_v42 = vadd.f32 %v181_v40, %v180_v38  ;;  %v204_v43 = vrot.slane %v203_v41, 4 }
 0x107   :  { %v183_v44 = vrot.slane %v182_v42, 2  ;;  %v205_v45 = vadd.f32 %v204_v43, %v203_v41 }
 0x109   :  { %v184_v46 = vadd.f32 %v183_v44, %v182_v42  ;;  %v206_v47 = vrot.slane %v205_v45, 2 }
 0x10b   :  { %v185_v48 = vrot.slane %v184_v46, 1  ;;  %v207_v49 = vadd.f32 %v206_v47, %v205_v45 }
 0x10d   :  { %v186_v50 = vadd.f32 %v185_v48, %v184_v46  ;;  %v208_v51 = vrot.slane %v207_v49, 1 }
 0x10f   :  { %v188_v52 = vmul.f32 0.015625, %v186_v50  ;;  %v209_v53 = vadd.f32 %v208_v51, %v207_v49 }
 0x111   :  { %v210_v54 = vmul.f32 0.015625, %v209_v53  ;;  %v211_v55 = vmul.f32 %v188_v52, %v188_v52  ;;  %v214_v56 = vsub.f32 %v143_v13, %v188_v52  ;;  %v215_v57 = vsub.f32 %v146_v17, %v188_v52 }
 0x112   :  { %v216_v58 = vsub.f32 %v334_v11, %v188_v52  ;;  %v217_v59 = vsub.f32 %v335_v15, %v188_v52  ;;  %v218_v60 = vsub.f32 %v159_v14, %v188_v52  ;;  %v219_v61 = vsub.f32 %v162_v18, %v188_v52 }
 0x113   :  { %v212_v62 = vsub.f32 %v210_v54, %v211_v55  ;;  %v220_v63 = vsub.f32 %v419_v12, %v188_v52  ;;  %v221_v0 = vsub.f32 %v339_v16, %v188_v52 }
 0x115   :  { %v213_v1 = vmax.f32 %v212_v62, 0.0 }
 0x117   :  { %v222_v2 = vadd.f32 1e-05, %v213_v1 }
 0x119   :  { %365 = vrsqrt.f32 %v222_v2 }
 0x123   :  { %v366_v3 = vpop.eup %365 }
 0x124   :  { %v224_v4 = vmul.f32 %v366_v3, %v214_v56  ;;  %v225_v5 = vmul.f32 %v366_v3, %v215_v57  ;;  %v226_v6 = vmul.f32 %v366_v3, %v216_v58  ;;  %v227_v7 = vmul.f32 %v366_v3, %v217_v59 }
 0x125   :  { %v228_v8 = vmul.f32 %v366_v3, %v218_v60  ;;  %v229_v9 = vmul.f32 %v366_v3, %v219_v61  ;;  %v230_v10 = vmul.f32 %v366_v3, %v220_v63  ;;  %v231_v11 = vmul.f32 %v366_v3, %v221_v0 }
 0x126   :  { %vm232_vm2 = vcmp.gt.f32.partialorder %v224_v4, 0.0  ;;  %vm233_vm3 = vcmp.gt.f32.partialorder %v225_v5, 0.0  ;;  %vm234_vm4 = vcmp.gt.f32.partialorder %v226_v6, 0.0  ;;  %vm235_vm5 = vcmp.gt.f32.partialorder %v227_v7, 0.0 }
 0x127   :  { %vm236_vm6 = vcmp.gt.f32.partialorder %v228_v8, 0.0  ;;  %vm237_vm7 = vcmp.gt.f32.partialorder %v229_v9, 0.0  ;;  %vm238_vm8 = vcmp.gt.f32.partialorder %v230_v10, 0.0  ;;  %vm239_vm9 = vcmp.gt.f32.partialorder %v231_v11, 0.0 }
 0x128   :  { %v240_v12 = vmul.f32 0.01, %v224_v4  ;;  %v241_v13 = vmul.f32 0.01, %v225_v5  ;;  %v242_v14 = vmul.f32 0.01, %v226_v6 }
 0x129   :  { %v243_v15 = vmul.f32 0.01, %v227_v7  ;;  %v244_v16 = vmul.f32 0.01, %v228_v8  ;;  %v245_v17 = vmul.f32 0.01, %v229_v9 }
 0x12a   :  { %v246_v18 = vmul.f32 0.01, %v230_v10  ;;  %v247_v19 = vmul.f32 0.01, %v231_v11  ;;  %v248_v20 = vsel %vm232_vm2, %v224_v4, %v240_v12  ;;  %v249_v21 = vsel %vm233_vm3, %v225_v5, %v241_v13 }
 0x12b   :  { %v250_v22 = vsel %vm234_vm4, %v226_v6, %v242_v14  ;;  %v251_v23 = vsel %vm235_vm5, %v227_v7, %v243_v15  ;;  %v252_v24 = vsel %vm236_vm6, %v228_v8, %v244_v16  ;;  %v253_v25 = vsel %vm237_vm7, %v229_v9, %v245_v17 }
 0x12c   :  { %v254_v26 = vsel %vm238_vm8, %v230_v10, %v246_v18  ;;  %v255_v27 = vsel %vm239_vm9, %v231_v11, %v247_v19  ;;  %v259_v28 = vrot.slane %v250_v22, 7  ;;  %v260_v29 = vrot.slane %v251_v23, 7 }
 0x12d   :  { %v265_v30 = vmax.f32 %v248_v20, %v250_v22  ;;  %v266_v31 = vmax.f32 %v249_v21, %v251_v23  ;;  %v273_v32 = vrot.slane %v254_v26, 7  ;;  %v274_v33 = vrot.slane %v255_v27, 7 }
 0x12e   :  { %v261_v34 = vsel %vm258_vm1, %v259_v28, %v260_v29  ;;  %v264_v35 = vsel %vm258_vm1, -inf, %v259_v28  ;;  %v279_v36 = vmax.f32 %v252_v24, %v254_v26  ;;  %v280_v37 = vmax.f32 %v253_v25, %v255_v27 }
 0x12f   :  { %v267_v38 = vmax.f32 %v265_v30, %v264_v35  ;;  %v268_v39 = vmax.f32 %v266_v31, %v261_v34  ;;  %v275_v40 = vsel %vm258_vm1, %v273_v32, %v274_v33  ;;  %v278_v41 = vsel %vm258_vm1, -inf, %v273_v32 }
 0x130   :  { %v281_v42 = vmax.f32 %v279_v36, %v278_v41  ;;  %v282_v43 = vmax.f32 %v280_v37, %v275_v40 }
 0x131   :  { %269 = vst [vmem:[%s451_s2] sm:$0xff] %v267_v38  ;;  %270 = vst [vmem:[%s451_s2 + $0x8] sm:$0xff] %v268_v39 }
 0x132   :  { %305 = vst [vmem:[%s451_s2 + $0x10] sm:$0xff] %v281_v42  ;;  %306 = vst [vmem:[%s451_s2 + $0x18] sm:$0xff] %v282_v43 }

// kernel: fwd.4
= control target key start
LH: loop header
LB: loop body
LE: loop exit
PB: predicated region body
PF: predicated region fallthrough
CT: control target
= control target key end

     0   :  { %v237_v0 = vmov 0   ;;  %vm119_vm0 = vcmask 523264   ;;  %s301_s1 = inlined_call_operand.vmem [shape: bf16[192,128], index: 1, kind: input, shape index: {}]   ;;  %s302_s0 = inlined_call_operand.vmem [shape: bf16[16,192], index: 0, kind: input, shape index: {}]   ;;  %s303_s2 = inlined_call_operand.vmem [shape: f32[16,128], index: 2, kind: output, shape index: {}]  }
   0x1   :  { %123 = vmatprep.subr.bf16.mxu0 %v237_v0  ;;  %v220_v1 = vld [vmem:[%s301_s1] sm:$0xff]   ;;  %v221_v2 = vld [vmem:[%s301_s1 + $0x8] sm:$0xff]   ;;  %v222_v3 = vld [vmem:[%s301_s1 + $0x10] sm:$0xff]  }
   0x2   :  { %124 = vmatpush1.bf16.msra.mxu0 %v220_v1  ;;  %v223_v4 = vld [vmem:[%s301_s1 + $0x18] sm:$0xff]   ;;  %v234_v5 = vld [vmem:[%s302_s0 + $0x4] ss:$8 sps:$4 sm:$0xff]   ;;  %v226_v8 = vld [vmem:[%s301_s1 + $0x30] sm:$0xff]  }
   0x3   :  { %125 = vmatprep.subr.bf16.mxu0 %v237_v0  ;;  %v224_v6 = vld [vmem:[%s301_s1 + $0x20] sm:$0xff]   ;;  %218 = vmatprep.mubr.msk.bf16.mxu0 %vm119_vm0, %v234_v5  ;;  %v225_v7 = vld [vmem:[%s301_s1 + $0x28] sm:$0xff]   ;;  %v227_v9 = vld [vmem:[%s301_s1 + $0x38] sm:$0xff]  }
   0x4   :  { %v228_v10 = vld [vmem:[%s301_s1 + $0x40] sm:$0xff]   ;;  %v229_v11 = vld [vmem:[%s301_s1 + $0x48] sm:$0xff]   ;;  %v230_v12 = vld [vmem:[%s301_s1 + $0x50] sm:$0xff]  }
   0x5   :  { %v231_v13 = vld [vmem:[%s301_s1 + $0x58] sm:$0xff]   ;;  %v232_v14 = vld [vmem:[%s302_s0] ss:$8 sps:$4 sm:$0xff]  }
   0x6   :  { %126 = vmatpush1.bf16.msra.mxu0 %v221_v2 }
   0x7   :  { %127 = vmatprep.subr.bf16.mxu0 %v237_v0 }
   0xa   :  { %128 = vmatpush1.bf16.msra.mxu0 %v222_v3 }
   0xb   :  { %129 = vmatprep.subr.bf16.mxu0 %v237_v0 }
   0xe   :  { %130 = vmatpush1.bf16.msra.mxu0 %v223_v4 }
   0xf   :  { %131 = vmatprep.subr.bf16.mxu0 %v237_v0 }
  0x12   :  { %132 = vmatpush1.bf16.msra.mxu0 %v224_v6 }
  0x13   :  { %133 = vmatprep.subr.bf16.mxu0 %v237_v0 }
  0x16   :  { %134 = vmatpush1.bf16.msra.mxu0 %v225_v7 }
  0x17   :  { %135 = vmatprep.subr.bf16.mxu0 %v237_v0 }
  0x1a   :  { %136 = vmatpush1.bf16.msra.mxu0 %v226_v8 }
  0x1b   :  { %137 = vmatprep.subr.bf16.mxu0 %v237_v0 }
  0x1e   :  { %138 = vmatpush1.bf16.msra.mxu0 %v227_v9 }
  0x1f   :  { %139 = vmatprep.subr.bf16.mxu0 %v237_v0 }
  0x22   :  { %140 = vmatpush1.bf16.msra.mxu0 %v228_v10 }
  0x23   :  { %141 = vmatprep.subr.bf16.mxu0 %v237_v0 }
  0x26   :  { %142 = vmatpush1.bf16.msra.mxu0 %v229_v11 }
  0x27   :  { %143 = vmatprep.subr.bf16.mxu0 %v237_v0 }
  0x2a   :  { %144 = vmatpush1.bf16.msra.mxu0 %v230_v12 }
  0x2b   :  { %145 = vmatprep.subr.bf16.mxu0 %v237_v0 }
  0x2e   :  { %146 = vmatpush1.bf16.msra.mxu0 %v231_v13 }
  0x31   :  { %156 = vmatmul.mubr.bf16.vlgmr.msra.gmra.mrb[0].mxu0 %v232_v14 }
 0x104   :  { %v157_v15 = vpop.f32.mrb[0].mxu0 }
 0x105   :  { %v159_v16 = vpop.f32.mrb[1].mxu0  ;;  %v173_v18 = vmul.f32 %v157_v15, %v157_v15 }
 0x106   :  { %v160_v17 = vpop.f32.mrb[2].mxu0 }
 0x107   :  { %v164_v19 = vadd.f32 %v160_v17, %v157_v15  ;;  %v174_v20 = vmul.f32 %v160_v17, %v160_v17  ;;  %v162_v21 = vpop.f32.mrb[3].mxu0 }
 0x109   :  { %v165_v22 = vrot.slane %v164_v19, 4  ;;  %v175_v23 = vadd.f32 %v174_v20, %v173_v18 }
 0x10b   :  { %v166_v24 = vadd.f32 %v165_v22, %v164_v19  ;;  %v176_v25 = vrot.slane %v175_v23, 4 }
 0x10d   :  { %v167_v26 = vrot.slane %v166_v24, 2  ;;  %v177_v27 = vadd.f32 %v176_v25, %v175_v23 }
 0x10f   :  { %v168_v28 = vadd.f32 %v167_v26, %v166_v24  ;;  %v178_v29 = vrot.slane %v177_v27, 2 }
 0x111   :  { %v169_v30 = vrot.slane %v168_v28, 1  ;;  %v179_v31 = vadd.f32 %v178_v29, %v177_v27 }
 0x113   :  { %v170_v32 = vadd.f32 %v169_v30, %v168_v28  ;;  %v180_v33 = vrot.slane %v179_v31, 1 }
 0x115   :  { %v172_v34 = vmul.f32 0.0625, %v170_v32  ;;  %v181_v35 = vadd.f32 %v180_v33, %v179_v31 }
 0x117   :  { %v182_v36 = vmul.f32 0.0625, %v181_v35  ;;  %v183_v37 = vmul.f32 %v172_v34, %v172_v34  ;;  %v186_v38 = vsub.f32 %v157_v15, %v172_v34  ;;  %v187_v39 = vsub.f32 %v160_v17, %v172_v34 }
 0x119   :  { %v184_v40 = vsub.f32 %v182_v36, %v183_v37 }
 0x11b   :  { %v185_v41 = vmax.f32 %v184_v40, 0.0 }
 0x11d   :  { %v188_v42 = vadd.f32 1e-05, %v185_v41 }
 0x11f   :  { %235 = vrsqrt.f32 %v188_v42 }
 0x129   :  { %v236_v43 = vpop.eup %235 }
 0x12a   :  { %v190_v44 = vmul.f32 %v236_v43, %v186_v38  ;;  %v191_v45 = vmul.f32 %v236_v43, %v187_v39 }
 0x12c   :  { %vm192_vm1 = vcmp.gt.f32.partialorder %v190_v44, 0.0  ;;  %vm193_vm2 = vcmp.gt.f32.partialorder %v191_v45, 0.0  ;;  %v194_v46 = vmul.f32 0.01, %v190_v44  ;;  %v195_v47 = vmul.f32 0.01, %v191_v45 }
 0x12e   :  { %v196_v48 = vsel %vm192_vm1, %v190_v44, %v194_v46  ;;  %v197_v49 = vsel %vm193_vm2, %v191_v45, %v195_v47 }
 0x12f   :  { %198 = vst [vmem:[%s303_s2] sm:$0xff] %v196_v48  ;;  %199 = vst [vmem:[%s303_s2 + $0x8] sm:$0xff] %v197_v49 }

// kernel: fwd.5
= control target key start
LH: loop header
LB: loop body
LE: loop exit
PB: predicated region body
PF: predicated region fallthrough
CT: control target
= control target key end

     0   :  { %v4241_v1 = vmov 0   ;;  %v121_v53 = vlaneseq  ;;  %s5557_s1 = inlined_call_operand.vmem [shape: bf16[128,768], index: 1, kind: input, shape index: {}]   ;;  %s5558_s2 = inlined_call_operand.vmem [shape: bf16[128,384], index: 2, kind: input, shape index: {}]   ;;  %s5559_s3 = inlined_call_operand.vmem [shape: bf16[128,384], index: 3, kind: input, shape index: {}]   ;;  %s5560_s5 = inlined_call_operand.vmem [shape: f32[1,384], index: 5, kind: input, shape index: {}]   ;;  %s5561_s6 = inlined_call_operand.vmem [shape: f32[1,384], index: 6, kind: input, shape index: {}]   ;;  %s5562_s7 = inlined_call_operand.vmem [shape: bf16[256,768], index: 7, kind: input, shape index: {}]   ;;  %s5563_s8 = inlined_call_operand.vmem [shape: bf16[128,384], index: 8, kind: input, shape index: {}]   ;;  %s5564_s9 = inlined_call_operand.vmem [shape: bf16[128,384], index: 9, kind: input, shape index: {}]   ;;  %s5565_s10 = inlined_call_operand.vmem [shape: f32[1,768], index: 10, kind: input, shape index: {}]   ;;  %s5566_s11 = inlined_call_operand.vmem [shape: f32[1,384], index: 11, kind: input, shape index: {}]   ;;  %s5567_s12 = inlined_call_operand.vmem [shape: f32[1,384], index: 12, kind: input, shape index: {}]   ;;  %s5568_s13 = inlined_call_operand.vmem [shape: bf16[256,128], index: 13, kind: input, shape index: {}]   ;;  %s5569_s14 = inlined_call_operand.vmem [shape: f32[1,128], index: 14, kind: input, shape index: {}, may-alias: {14,16}]   ;;  %s5570_s15 = inlined_call_operand.vmem [shape: bf16[256,128], index: 15, kind: input, shape index: {}]   ;;  %s5571_s16 = inlined_call_operand.vmem [shape: f32[1,128], index: 16, kind: input, shape index: {}, may-alias: {14,16}]   ;;  %s5572_s17 = inlined_call_operand.vmem [shape: f32[8,128], index: 17, kind: input, shape index: {}]   ;;  %s5573_s18 = inlined_call_operand.vmem [shape: f32[8,128], index: 18, kind: output, shape index: {0}]   ;;  %s5574_s19 = inlined_call_operand.vmem [shape: f32[8,128], index: 19, kind: output, shape index: {1}]   ;;  %s5575_s20 = inlined_call_operand.vmem [shape: f32[8,128], index: 20, kind: output, shape index: {2}]   ;;  %s5576_s0 = inlined_call_operand.vmem [shape: bf16[64,128], index: 0, kind: input, shape index: {}]   ;;  %s5577_s4 = inlined_call_operand.vmem [shape: f32[1,768], index: 4, kind: input, shape index: {}]  }
   0x1   :  { %5581 = sst [smem:[#allocation6_spill]] %s5557_s1  ;;  %447 = vmatprep.mubr.bf16.mxu0 %v4241_v1  ;;  %520 = vmatprep.mubr.bf16.mxu1 %v4241_v1  ;;  %v4457_v34 = vld [vmem:[%s5576_s0] sm:$0xff]   ;;  %v3810_v39 = vld [vmem:[%s5576_s0 + $0x8] sm:$0xff]   ;;  %v3817_v44 = vld [vmem:[%s5576_s0 + $0x10] sm:$0xff]  }
   0x2   :  { %5582 = sst [smem:[#allocation7_spill]] %s5558_s2  ;;  %s5586_s23 = sld [smem:[#allocation6_spill]]  ;;  %v3824_v49 = vld [vmem:[%s5576_s0 + $0x18] sm:$0xff]   ;;  %v4526_v54 = vshrl.u32 %v121_v53, 7  ;;  %v4537_v57 = vld [vmem:[%s5577_s4] sm:$0x3f] }
   0x3   :  { %5583 = sst [smem:[#allocation8_spill]] %s5559_s3  ;;  %s4604_s4 = smov 0  }
   0x4   :  { %5584 = sst [smem:[#allocation9_spill]] %s5560_s5  ;;  %v4529_v55 = vsub.s32 0, %v4526_v54  ;;  %v4532_v56 = vsub.s32 2, %v4526_v54  ;;  %v4540_v58 = vsub.s32 1, %v4526_v54  ;;  %v135_v59 = vsub.s32 3, %v4526_v54 }
   0x5   :  { %5585 = sst [smem:[#allocation10_spill]] %s5561_s6 }
   0x6   :  { %v4545_v60 = vrot.slane %v4537_v57, %v4529_v55  ;;  %v4549_v61 = vrot.slane %v4537_v57, %v4532_v56  ;;  %v4553_v62 = vrot.slane %v4537_v57, %v4540_v58  ;;  %v4558_v63 = vrot.slane %v4537_v57, %v135_v59 }
   0x8   :  { %v3755_v0 = vld [vmem:[%s5586_s23 + $0x4] ss:$24 sps:$4 sm:$0xff]   ;;  %v3759_v3 = vld [vmem:[%s5586_s23] ss:$24 sps:$4 sm:$0xff]   ;;  %v3761_v5 = vld [vmem:[%s5586_s23 + $0x34] ss:$24 sps:$4 sm:$0xff]  }
   0x9   :  { %v3757_v2 = vld [vmem:[%s5586_s23 + $0xc] ss:$24 sps:$4 sm:$0xff]   ;;  %415 = vmatprep.subr.bf16.mxu0 %v3755_v0  ;;  %v3760_v4 = vld [vmem:[%s5586_s23 + $0x8] ss:$24 sps:$4 sm:$0xff]   ;;  %v3763_v6 = vld [vmem:[%s5586_s23 + $0x3c] ss:$24 sps:$4 sm:$0xff]  }
   0xa   :  { %488 = vmatprep.subr.bf16.mxu1 %v3757_v2  ;;  %416 = vmatpush1.bf16.msra.mxu0 %v3759_v3  ;;  %v3765_v7 = vld [vmem:[%s5586_s23 + $0x30] ss:$24 sps:$4 sm:$0xff]   ;;  %v3767_v9 = vld [vmem:[%s5586_s23 + $0x64] ss:$24 sps:$4 sm:$0xff]   ;;  %v3771_v11 = vld [vmem:[%s5586_s23 + $0x60] ss:$24 sps:$4 sm:$0xff]  }
   0xb   :  { %489 = vmatpush1.bf16.msra.mxu1 %v3760_v4  ;;  %417 = vmatprep.subr.bf16.mxu0 %v3761_v5  ;;  %v3766_v8 = vld [vmem:[%s5586_s23 + $0x38] ss:$24 sps:$4 sm:$0xff]   ;;  %v3769_v10 = vld [vmem:[%s5586_s23 + $0x6c] ss:$24 sps:$4 sm:$0xff]   ;;  %v3772_v12 = vld [vmem:[%s5586_s23 + $0x68] ss:$24 sps:$4 sm:$0xff]  }
   0xc   :  { %490 = vmatprep.subr.bf16.mxu1 %v3763_v6  ;;  %v3773_v13 = vld [vmem:[%s5586_s23 + $0x94] ss:$24 sps:$4 sm:$0xff]   ;;  %v3777_v15 = vld [vmem:[%s5586_s23 + $0x90] ss:$24 sps:$4 sm:$0xff]   ;;  %v3779_v17 = vld [vmem:[%s5586_s23 + $0xc4] ss:$24 sps:$4 sm:$0xff]  }
   0xd   :  { %v3775_v14 = vld [vmem:[%s5586_s23 + $0x9c] ss:$24 sps:$4 sm:$0xff]   ;;  %v3778_v16 = vld [vmem:[%s5586_s23 + $0x98] ss:$24 sps:$4 sm:$0xff]   ;;  %v3781_v18 = vld [vmem:[%s5586_s23 + $0xcc] ss:$24 sps:$4 sm:$0xff]  }
   0xe   :  { %418 = vmatpush1.bf16.msra.mxu0 %v3765_v7  ;;  %v3783_v19 = vld [vmem:[%s5586_s23 + $0xc0] ss:$24 sps:$4 sm:$0xff]   ;;  %v3785_v21 = vld [vmem:[%s5586_s23 + $0xf4] ss:$24 sps:$4 sm:$0xff]   ;;  %v3789_v23 = vld [vmem:[%s5586_s23 + $0xf0] ss:$24 sps:$4 sm:$0xff]  }
   0xf   :  { %491 = vmatpush1.bf16.msra.mxu1 %v3766_v8  ;;  %419 = vmatprep.subr.bf16.mxu0 %v3767_v9  ;;  %v3784_v20 = vld [vmem:[%s5586_s23 + $0xc8] ss:$24 sps:$4 sm:$0xff]   ;;  %v3787_v22 = vld [vmem:[%s5586_s23 + $0xfc] ss:$24 sps:$4 sm:$0xff]   ;;  %v3790_v24 = vld [vmem:[%s5586_s23 + $0xf8] ss:$24 sps:$4 sm:$0xff]  }
  0x10   :  { %492 = vmatprep.subr.bf16.mxu1 %v3769_v10  ;;  %v3791_v25 = vld [vmem:[%s5586_s23 + $0x124] ss:$24 sps:$4 sm:$0xff]   ;;  %v3795_v27 = vld [vmem:[%s5586_s23 + $0x120] ss:$24 sps:$4 sm:$0xff]   ;;  %v3797_v29 = vld [vmem:[%s5586_s23 + $0x154] ss:$24 sps:$4 sm:$0xff]  }
  0x11   :  { %v3793_v26 = vld [vmem:[%s5586_s23 + $0x12c] ss:$24 sps:$4 sm:$0xff]   ;;  %v3796_v28 = vld [vmem:[%s5586_s23 + $0x128] ss:$24 sps:$4 sm:$0xff]   ;;  %v3799_v30 = vld [vmem:[%s5586_s23 + $0x15c] ss:$24 sps:$4 sm:$0xff]  }
  0x12   :  { %420 = vmatpush1.bf16.msra.mxu0 %v3771_v11  ;;  %v3801_v31 = vld [vmem:[%s5586_s23 + $0x150] ss:$24 sps:$4 sm:$0xff]   ;;  %v3806_v33 = vld [vmem:[%s5586_s23 + $0x14] ss:$24 sps:$4 sm:$0xff]   ;;  %v3809_v36 = vld [vmem:[%s5586_s23 + $0x44] ss:$24 sps:$4 sm:$0xff]  }
  0x13   :  { %493 = vmatpush1.bf16.msra.mxu1 %v3772_v12  ;;  %421 = vmatprep.subr.bf16.mxu0 %v3773_v13  ;;  %v3802_v32 = vld [vmem:[%s5586_s23 + $0x158] ss:$24 sps:$4 sm:$0xff]   ;;  %v3813_v38 = vld [vmem:[%s5586_s23 + $0x74] ss:$24 sps:$4 sm:$0xff]   ;;  %v3816_v41 = vld [vmem:[%s5586_s23 + $0xa4] ss:$24 sps:$4 sm:$0xff]  }
  0x14   :  { %494 = vmatprep.subr.bf16.mxu1 %v3775_v14  ;;  %v3804_v35 = vld [vmem:[%s5586_s23 + $0x10] ss:$24 sps:$4 sm:$0xff]   ;;  %v3807_v37 = vld [vmem:[%s5586_s23 + $0x40] ss:$24 sps:$4 sm:$0xff]   ;;  %v3820_v43 = vld [vmem:[%s5586_s23 + $0xd4] ss:$24 sps:$4 sm:$0xff]  }
  0x15   :  { %v3811_v40 = vld [vmem:[%s5586_s23 + $0x70] ss:$24 sps:$4 sm:$0xff]   ;;  %v3814_v42 = vld [vmem:[%s5586_s23 + $0xa0] ss:$24 sps:$4 sm:$0xff]   ;;  %v3823_v46 = vld [vmem:[%s5586_s23 + $0x104] ss:$24 sps:$4 sm:$0xff]  }
  0x16   :  { %422 = vmatpush1.bf16.msra.mxu0 %v3777_v15  ;;  %v3818_v45 = vld [vmem:[%s5586_s23 + $0xd0] ss:$24 sps:$4 sm:$0xff]   ;;  %v3821_v47 = vld [vmem:[%s5586_s23 + $0x100] ss:$24 sps:$4 sm:$0xff]   ;;  %v3827_v48 = vld [vmem:[%s5586_s23 + $0x134] ss:$24 sps:$4 sm:$0xff]  }
  0x17   :  { %495 = vmatpush1.bf16.msra.mxu1 %v3778_v16  ;;  %423 = vmatprep.subr.bf16.mxu0 %v3779_v17  ;;  %v3825_v50 = vld [vmem:[%s5586_s23 + $0x130] ss:$24 sps:$4 sm:$0xff]   ;;  %v3830_v51 = vld [vmem:[%s5586_s23 + $0x164] ss:$24 sps:$4 sm:$0xff]   ;;  %v3828_v52 = vld [vmem:[%s5586_s23 + $0x160] ss:$24 sps:$4 sm:$0xff]  }
  0x18   :  { %496 = vmatprep.subr.bf16.mxu1 %v3781_v18 }
  0x1a   :  { %424 = vmatpush1.bf16.msra.mxu0 %v3783_v19 }
  0x1b   :  { %497 = vmatpush1.bf16.msra.mxu1 %v3784_v20  ;;  %425 = vmatprep.subr.bf16.mxu0 %v3785_v21 }
  0x1c   :  { %498 = vmatprep.subr.bf16.mxu1 %v3787_v22 }
  0x1e   :  { %426 = vmatpush1.bf16.msra.mxu0 %v3789_v23 }
  0x1f   :  { %499 = vmatpush1.bf16.msra.mxu1 %v3790_v24  ;;  %427 = vmatprep.subr.bf16.mxu0 %v3791_v25 }
  0x20   :  { %500 = vmatprep.subr.bf16.mxu1 %v3793_v26 }
  0x22   :  { %428 = vmatpush1.bf16.msra.mxu0 %v3795_v27 }
  0x23   :  { %501 = vmatpush1.bf16.msra.mxu1 %v3796_v28  ;;  %429 = vmatprep.subr.bf16.mxu0 %v3797_v29 }
  0x24   :  { %502 = vmatprep.subr.bf16.mxu1 %v3799_v30 }
  0x26   :  { %430 = vmatpush1.bf16.msra.mxu0 %v3801_v31 }
  0x27   :  { %503 = vmatpush1.bf16.msra.mxu1 %v3802_v32  ;;  %561 = vmatprep.subr.bf16.mxu0 %v3806_v33 }
  0x28   :  { %3636 = vmatprep.subr.bf16.mxu1 %v3806_v33 }
  0x29   :  { %448 = vmatmul.mubr.bf16.vlgmr.msra.gmra.mrb[0].mxu0 %v4457_v34 }
  0x2a   :  { %521 = vmatmul.mubr.bf16.vlgmr.msra.gmra.mrb[0].mxu1 %v4457_v34  ;;  %562 = vmatpush1.bf16.msra.mxu0 %v3804_v35 }
  0x2b   :  { %3644 = vmatpush1.bf16.msra.mxu1 %v3804_v35  ;;  %563 = vmatprep.subr.bf16.mxu0 %v3809_v36 }
  0x2c   :  { %3637 = vmatprep.subr.bf16.mxu1 %v3809_v36  ;;  %457 = vmatprep.mubr.bf16.mxu0 %v4241_v1 }
  0x2d   :  { %530 = vmatprep.mubr.bf16.mxu1 %v4241_v1 }
  0x2e   :  { %564 = vmatpush1.bf16.msra.mxu0 %v3807_v37 }
  0x2f   :  { %3645 = vmatpush1.bf16.msra.mxu1 %v3807_v37  ;;  %565 = vmatprep.subr.bf16.mxu0 %v3813_v38 }
  0x30   :  { %3638 = vmatprep.subr.bf16.mxu1 %v3813_v38 }
  0x31   :  { %458 = vmatmul.mubr.bf16.gmra.mrb[4].mxu0 %v3810_v39 }
  0x32   :  { %531 = vmatmul.mubr.bf16.gmra.mrb[4].mxu1 %v3810_v39  ;;  %566 = vmatpush1.bf16.msra.mxu0 %v3811_v40 }
  0x33   :  { %3646 = vmatpush1.bf16.msra.mxu1 %v3811_v40  ;;  %567 = vmatprep.subr.bf16.mxu0 %v3816_v41 }
  0x34   :  { %3639 = vmatprep.subr.bf16.mxu1 %v3816_v41  ;;  %467 = vmatprep.mubr.bf16.mxu0 %v4241_v1 }
  0x35   :  { %540 = vmatprep.mubr.bf16.mxu1 %v4241_v1 }
  0x36   :  { %568 = vmatpush1.bf16.msra.mxu0 %v3814_v42 }
  0x37   :  { %3647 = vmatpush1.bf16.msra.mxu1 %v3814_v42  ;;  %569 = vmatprep.subr.bf16.mxu0 %v3820_v43 }
  0x38   :  { %3640 = vmatprep.subr.bf16.mxu1 %v3820_v43 }
  0x39   :  { %468 = vmatmul.mubr.bf16.gmra.mrb[8].mxu0 %v3817_v44 }
  0x3a   :  { %541 = vmatmul.mubr.bf16.gmra.mrb[8].mxu1 %v3817_v44  ;;  %570 = vmatpush1.bf16.msra.mxu0 %v3818_v45 }
  0x3b   :  { %3648 = vmatpush1.bf16.msra.mxu1 %v3818_v45  ;;  %571 = vmatprep.subr.bf16.mxu0 %v3823_v46 }
  0x3c   :  { %3641 = vmatprep.subr.bf16.mxu1 %v3823_v46  ;;  %477 = vmatprep.mubr.bf16.mxu0 %v4241_v1 }
  0x3d   :  { %550 = vmatprep.mubr.bf16.mxu1 %v4241_v1 }
  0x3e   :  { %572 = vmatpush1.bf16.msra.mxu0 %v3821_v47 }
  0x3f   :  { %3649 = vmatpush1.bf16.msra.mxu1 %v3821_v47  ;;  %573 = vmatprep.subr.bf16.mxu0 %v3827_v48 }
  0x40   :  { %3642 = vmatprep.subr.bf16.mxu1 %v3827_v48 }
  0x41   :  { %478 = vmatmul.mubr.bf16.gmra.mrb[12].mxu0 %v3824_v49 }
  0x42   :  { %551 = vmatmul.mubr.bf16.gmra.mrb[12].mxu1 %v3824_v49  ;;  %574 = vmatpush1.bf16.msra.mxu0 %v3825_v50 }
  0x43   :  { %3650 = vmatpush1.bf16.msra.mxu1 %v3825_v50  ;;  %575 = vmatprep.subr.bf16.mxu0 %v3830_v51 }
  0x44   :  { %3643 = vmatprep.subr.bf16.mxu1 %v3830_v51  ;;  %593 = vmatprep.mubr.bf16.mxu0 %v4241_v1 }
  0x45   :  { %613 = vmatprep.mubr.bf16.mxu1 %v4241_v1 }
  0x46   :  { %576 = vmatpush1.bf16.msra.mxu0 %v3828_v52 }
  0x47   :  { %3651 = vmatpush1.bf16.msra.mxu1 %v3828_v52 }
  0x49   :  { %594 = vmatmul.mubr.bf16.vlgmr.msra.gmra.mrb[16].mxu0 %v4457_v34 }
  0x4a   :  { %614 = vmatmul.mubr.bf16.vlgmr.msra.gmra.mrb[16].mxu1 %v3817_v44  ;;  %603 = vmatprep.mubr.bf16.mxu0 %v4241_v1 }
  0x4b   :  { %623 = vmatprep.mubr.bf16.mxu1 %v4241_v1 }
  0x51   :  { %604 = vmatmul.mubr.bf16.gmra.mrb[20].mxu0 %v3810_v39 }
  0x52   :  { %624 = vmatmul.mubr.bf16.gmra.mrb[20].mxu1 %v3824_v49 }
  0xfc   :  { %v449_v0 = vpop.f32.mrb[0].mxu0 }
  0xfd   :  { %v522_v1 = vpop.f32.mrb[0].mxu1  ;;  %v450_v2 = vadd.f32 %v449_v0, %v4545_v60  ;;  %v451_v4 = vpop.f32.mrb[1].mxu0  ;;  %v139_v0 = vsub.s32 4, %v4526_v54 }
  0xfe   :  { %v523_v3 = vadd.f32 %v522_v1, %v4549_v61  ;;  %v524_v5 = vpop.f32.mrb[1].mxu1  ;;  %v452_v6 = vadd.f32 %v451_v4, %v4553_v62  ;;  %v453_v8 = vpop.f32.mrb[2].mxu0 }
  0xff   :  { %v525_v7 = vadd.f32 %v524_v5, %v4558_v63  ;;  %v526_v9 = vpop.f32.mrb[2].mxu1  ;;  %634 = vst [vmem:[#allocation2] sm:$0xff] %v450_v2  ;;  %v454_v10 = vadd.f32 %v453_v8, %v4545_v60  ;;  %v455_v12 = vpop.f32.mrb[3].mxu0  ;;  %v143_v5 = vsub.s32 5, %v4526_v54 }
 0x100   :  { %636 = vst [vmem:[#allocation2 + $0x10] sm:$0xff] %v523_v3  ;;  %v527_v11 = vadd.f32 %v526_v9, %v4549_v61  ;;  %v528_v13 = vpop.f32.mrb[3].mxu1  ;;  %635 = vst [vmem:[#allocation2 + $0x8] sm:$0xff] %v452_v6  ;;  %v456_v14 = vadd.f32 %v455_v12, %v4553_v62  ;;  %v140_v12 = vrot.slane %v4537_v57, %v139_v0 }
 0x101   :  { %637 = vst [vmem:[#allocation2 + $0x18] sm:$0xff] %v525_v7  ;;  %v529_v15 = vadd.f32 %v528_v13, %v4558_v63  ;;  %640 = vst [vmem:[#allocation2 + $0x30] sm:$0xff] %v454_v10 }
 0x102   :  { %642 = vst [vmem:[#allocation2 + $0x40] sm:$0xff] %v527_v11  ;;  %641 = vst [vmem:[#allocation2 + $0x38] sm:$0xff] %v456_v14 }
 0x103   :  { %643 = vst [vmem:[#allocation2 + $0x48] sm:$0xff] %v529_v15 }
 0x104   :  { %v459_v16 = vpop.f32.mrb[4].mxu0 }
 0x105   :  { %v532_v17 = vpop.f32.mrb[4].mxu1  ;;  %v460_v18 = vadd.f32 %v459_v16, %v4545_v60  ;;  %v461_v20 = vpop.f32.mrb[5].mxu0 }
 0x106   :  { %v533_v19 = vadd.f32 %v532_v17, %v4549_v61  ;;  %v534_v21 = vpop.f32.mrb[5].mxu1  ;;  %v462_v22 = vadd.f32 %v461_v20, %v4553_v62  ;;  %v463_v24 = vpop.f32.mrb[6].mxu0 }
 0x107   :  { %v535_v23 = vadd.f32 %v534_v21, %v4558_v63  ;;  %v536_v25 = vpop.f32.mrb[6].mxu1  ;;  %646 = vst [vmem:[#allocation2 + $0x60] sm:$0xff] %v460_v18  ;;  %v464_v26 = vadd.f32 %v463_v24, %v4545_v60  ;;  %v465_v28 = vpop.f32.mrb[7].mxu0 }
 0x108   :  { %648 = vst [vmem:[#allocation2 + $0x70] sm:$0xff] %v533_v19  ;;  %v537_v27 = vadd.f32 %v536_v25, %v4549_v61  ;;  %v538_v29 = vpop.f32.mrb[7].mxu1  ;;  %647 = vst [vmem:[#allocation2 + $0x68] sm:$0xff] %v462_v22  ;;  %v466_v30 = vadd.f32 %v465_v28, %v4553_v62 }
 0x109   :  { %649 = vst [vmem:[#allocation2 + $0x78] sm:$0xff] %v535_v23  ;;  %v539_v31 = vadd.f32 %v538_v29, %v4558_v63  ;;  %652 = vst [vmem:[#allocation2 + $0x90] sm:$0xff] %v464_v26 }
 0x10a   :  { %654 = vst [vmem:[#allocation2 + $0xa0] sm:$0xff] %v537_v27  ;;  %653 = vst [vmem:[#allocation2 + $0x98] sm:$0xff] %v466_v30 }
 0x10b   :  { %655 = vst [vmem:[#allocation2 + $0xa8] sm:$0xff] %v539_v31 }
 0x10c   :  { %v469_v32 = vpop.f32.mrb[8].mxu0 }
 0x10d   :  { %v542_v33 = vpop.f32.mrb[8].mxu1  ;;  %v470_v34 = vadd.f32 %v469_v32, %v4545_v60  ;;  %v471_v36 = vpop.f32.mrb[9].mxu0 }
 0x10e   :  { %v543_v35 = vadd.f32 %v542_v33, %v4549_v61  ;;  %v544_v37 = vpop.f32.mrb[9].mxu1  ;;  %v472_v38 = vadd.f32 %v471_v36, %v4553_v62  ;;  %v473_v40 = vpop.f32.mrb[10].mxu0 }
 0x10f   :  { %v545_v39 = vadd.f32 %v544_v37, %v4558_v63  ;;  %v546_v41 = vpop.f32.mrb[10].mxu1  ;;  %658 = vst [vmem:[#allocation2 + $0xc0] sm:$0xff] %v470_v34  ;;  %v474_v42 = vadd.f32 %v473_v40, %v4545_v60  ;;  %v475_v44 = vpop.f32.mrb[11].mxu0 }
 0x110   :  { %660 = vst [vmem:[#allocation2 + $0xd0] sm:$0xff] %v543_v35  ;;  %v547_v43 = vadd.f32 %v546_v41, %v4549_v61  ;;  %v548_v45 = vpop.f32.mrb[11].mxu1  ;;  %659 = vst [vmem:[#allocation2 + $0xc8] sm:$0xff] %v472_v38  ;;  %v476_v46 = vadd.f32 %v475_v44, %v4553_v62  ;;  %v4600_v41 = vmov 0.0  }
 0x111   :  { %661 = vst [vmem:[#allocation2 + $0xd8] sm:$0xff] %v545_v39  ;;  %v549_v47 = vadd.f32 %v548_v45, %v4558_v63  ;;  %664 = vst [vmem:[#allocation2 + $0xf0] sm:$0xff] %v474_v42  ;;  %v4602_v42 = vmov 0.0  }
 0x112   :  { %666 = vst [vmem:[#allocation2 + $0x100] sm:$0xff] %v547_v43  ;;  %665 = vst [vmem:[#allocation2 + $0xf8] sm:$0xff] %v476_v46 }
 0x113   :  { %667 = vst [vmem:[#allocation2 + $0x108] sm:$0xff] %v549_v47 }
 0x114   :  { %v479_v48 = vpop.f32.mrb[12].mxu0 }
 0x115   :  { %v552_v49 = vpop.f32.mrb[12].mxu1  ;;  %v480_v50 = vadd.f32 %v479_v48, %v4545_v60  ;;  %v481_v52 = vpop.f32.mrb[13].mxu0 }
 0x116   :  { %v553_v51 = vadd.f32 %v552_v49, %v4549_v61  ;;  %v554_v53 = vpop.f32.mrb[13].mxu1  ;;  %v482_v1 = vadd.f32 %v481_v52, %v4553_v62  ;;  %v483_v3 = vpop.f32.mrb[14].mxu0 }
 0x117   :  { %v555_v2 = vadd.f32 %v554_v53, %v4558_v63  ;;  %v556_v4 = vpop.f32.mrb[14].mxu1  ;;  %670 = vst [vmem:[#allocation2 + $0x120] sm:$0xff] %v480_v50  ;;  %v484_v6 = vadd.f32 %v483_v3, %v4545_v60  ;;  %v485_v8 = vpop.f32.mrb[15].mxu0  ;;  %v144_v60 = vrot.slane %v4537_v57, %v143_v5 }
 0x118   :  { %672 = vst [vmem:[#allocation2 + $0x130] sm:$0xff] %v553_v51  ;;  %v557_v7 = vadd.f32 %v556_v4, %v4549_v61  ;;  %v558_v9 = vpop.f32.mrb[15].mxu1  ;;  %671 = vst [vmem:[#allocation2 + $0x128] sm:$0xff] %v482_v1  ;;  %v486_v10 = vadd.f32 %v485_v8, %v4553_v62 }
 0x119   :  { %673 = vst [vmem:[#allocation2 + $0x138] sm:$0xff] %v555_v2  ;;  %v559_v11 = vadd.f32 %v558_v9, %v4558_v63  ;;  %676 = vst [vmem:[#allocation2 + $0x150] sm:$0xff] %v484_v6 }
 0x11a   :  { %678 = vst [vmem:[#allocation2 + $0x160] sm:$0xff] %v557_v7  ;;  %677 = vst [vmem:[#allocation2 + $0x158] sm:$0xff] %v486_v10 }
 0x11b   :  { %679 = vst [vmem:[#allocation2 + $0x168] sm:$0xff] %v559_v11 }
 0x11c   :  { %v595_v61 = vpop.f32.mrb[16].mxu0 }
 0x11d   :  { %v615_v13 = vpop.f32.mrb[16].mxu1  ;;  %v596_v14 = vadd.f32 %v595_v61, %v140_v12  ;;  %v597_v16 = vpop.f32.mrb[17].mxu0 }
 0x11e   :  { %v616_v15 = vadd.f32 %v615_v13, %v140_v12  ;;  %v617_v62 = vpop.f32.mrb[17].mxu1  ;;  %v598_v17 = vadd.f32 %v597_v16, %v144_v60  ;;  %v599_v18 = vpop.f32.mrb[18].mxu0 }
 0x11f   :  { %v618_v63 = vadd.f32 %v617_v62, %v144_v60  ;;  %v619_v19 = vpop.f32.mrb[18].mxu1  ;;  %638 = vst [vmem:[#allocation2 + $0x20] sm:$0xff] %v596_v14  ;;  %v600_v20 = vadd.f32 %v599_v18, %v140_v12  ;;  %v601_v22 = vpop.f32.mrb[19].mxu0 }
 0x120   :  { %662 = vst [vmem:[#allocation2 + $0xe0] sm:$0xff] %v616_v15  ;;  %v620_v21 = vadd.f32 %v619_v19, %v140_v12  ;;  %v621_v23 = vpop.f32.mrb[19].mxu1  ;;  %639 = vst [vmem:[#allocation2 + $0x28] sm:$0xff] %v598_v17  ;;  %v602_v24 = vadd.f32 %v601_v22, %v144_v60 }
 0x121   :  { %663 = vst [vmem:[#allocation2 + $0xe8] sm:$0xff] %v618_v63  ;;  %v622_v57 = vadd.f32 %v621_v23, %v144_v60  ;;  %644 = vst [vmem:[#allocation2 + $0x50] sm:$0xff] %v600_v20 }
 0x122   :  { %668 = vst [vmem:[#allocation2 + $0x110] sm:$0xff] %v620_v21  ;;  %645 = vst [vmem:[#allocation2 + $0x58] sm:$0xff] %v602_v24 }
 0x123   :  { %669 = vst [vmem:[#allocation2 + $0x118] sm:$0xff] %v622_v57 }
 0x124   :  { %v605_v25 = vpop.f32.mrb[20].mxu0 }
 0x125   :  { %v625_v26 = vpop.f32.mrb[20].mxu1  ;;  %v606_v27 = vadd.f32 %v605_v25, %v140_v12  ;;  %v607_v29 = vpop.f32.mrb[21].mxu0 }
 0x126   :  { %v626_v28 = vadd.f32 %v625_v26, %v140_v12  ;;  %v627_v30 = vpop.f32.mrb[21].mxu1  ;;  %v608_v31 = vadd.f32 %v607_v29, %v144_v60  ;;  %v609_v33 = vpop.f32.mrb[22].mxu0 }
 0x127   :  { %v628_v32 = vadd.f32 %v627_v30, %v144_v60  ;;  %v629_v34 = vpop.f32.mrb[22].mxu1  ;;  %650 = vst [vmem:[#allocation2 + $0x80] sm:$0xff] %v606_v27  ;;  %v610_v35 = vadd.f32 %v609_v33, %v140_v12  ;;  %v611_v37 = vpop.f32.mrb[23].mxu0 }
 0x128   :  { %674 = vst [vmem:[#allocation2 + $0x140] sm:$0xff] %v626_v28  ;;  %v630_v36 = vadd.f32 %v629_v34, %v140_v12  ;;  %v631_v38 = vpop.f32.mrb[23].mxu1  ;;  %651 = vst [vmem:[#allocation2 + $0x88] sm:$0xff] %v608_v31  ;;  %v612_v39 = vadd.f32 %v611_v37, %v144_v60 }
 0x129   :  { %675 = vst [vmem:[#allocation2 + $0x148] sm:$0xff] %v628_v32  ;;  %v632_v40 = vadd.f32 %v631_v38, %v144_v60  ;;  %656 = vst [vmem:[#allocation2 + $0xb0] sm:$0xff] %v610_v35 }
 0x12a   :  { %680 = vst [vmem:[#allocation2 + $0x170] sm:$0xff] %v630_v36  ;;  %657 = vst [vmem:[#allocation2 + $0xb8] sm:$0xff] %v612_v39 }
 0x12b   :  { %681 = vst [vmem:[#allocation2 + $0x178] sm:$0xff] %v632_v40 }
 0x12c LB: > { %s5587_s28 = sld [smem:[#allocation7_spill]]  ;;  %v4242_v45 = vmov 0.0   ;;  %v4243_v46 = vmov 0   ;;  %vm4244_vm0 = vmmov 0   ;;  %s5588_s23 = sld [smem:[#allocation8_spill]]  ;;  %v709_v14 = vpack.c.bf16 %v4215_v42, %v4215_v42  ;;  %s4219_s4 = sphi %s4604_s4, %s687_s4   ;;  %v4215_v42 = vphi %v4602_v42, %v1247_v42   ;;  %v4211_v41 = vphi %v4600_v41, %v1268_v41  }
 0x12d   : > { %3556 = vmatprep.subr.bf16.mxu1 %v4242_v45  ;;  %919 = vmatprep.mubr.bf16.mxu0 %v4243_v46  ;;  %v968_v35 = vpack.c.bf16 %v4211_v41, %v4211_v41  ;;  %s3230_s3 = sshll.u32 %s4219_s4, 3  ;;  %s5589_s27 = sld [smem:[#allocation9_spill]] }
 0x12e   : > { %3572 = vmatprep.mubr.msk.bf16.mxu1 %vm4244_vm0, %v4242_v45  ;;  %s693_s25 = sshra.s32 %s3230_s3, 3  ;;  %s690_s29 = ssub.s32 7, %s4219_s4 }
 0x12f   : > { %s3472_s5 = smul.u32 48, %s693_s25  ;;  %s4796_s30 = sshll.u32 %s690_s29, 3 }
 0x130   : > { %s701_s1 = sshra.s32 %s4796_s30, 3  ;;  %s5590_s24 = sld [smem:[#allocation10_spill]] }
 0x131   : > { %s4791_s6 = scalar_lea.vmem [#allocation2], %s3472_s5  ;;  %s3473_s21 = smul.u32 48, %s701_s1 }
 0x132   : > { %v3831_v43 = vld [vmem:[%s5587_s28 + $0x4] ss:$12 sps:$4 sm:$0xff]   ;;  %v3833_v44 = vld [vmem:[%s5587_s28] ss:$12 sps:$4 sm:$0xff]   ;;  %v3834_v47 = vld [vmem:[%s5587_s28 + $0x1c] ss:$12 sps:$4 sm:$0xff]  }
 0x133   : > { %887 = vmatprep.subr.bf16.mxu0 %v3831_v43  ;;  %v3836_v48 = vld [vmem:[%s5587_s28 + $0x18] ss:$12 sps:$4 sm:$0xff]   ;;  %v3837_v49 = vld [vmem:[%s5587_s28 + $0x34] ss:$12 sps:$4 sm:$0xff]   ;;  %v3839_v50 = vld [vmem:[%s5587_s28 + $0x30] ss:$12 sps:$4 sm:$0xff]  }
 0x134   : > { %888 = vmatpush1.bf16.msra.mxu0 %v3833_v44  ;;  %v3840_v51 = vld [vmem:[%s5587_s28 + $0x4c] ss:$12 sps:$4 sm:$0xff]   ;;  %v3852_v52 = vld [vmem:[%s5587_s28 + $0x8] ss:$12 sps:$4 sm:$0xff]   ;;  %v3843_v1 = vld [vmem:[%s5587_s28 + $0x64] ss:$12 sps:$4 sm:$0xff]  }
 0x135   : > { %889 = vmatprep.subr.bf16.mxu0 %v3834_v47  ;;  %v3842_v53 = vld [vmem:[%s5587_s28 + $0x48] ss:$12 sps:$4 sm:$0xff]   ;;  %3557 = vmatpush3.bf16.msra.mxu1 %v3852_v52  ;;  %v3856_v2 = vld [vmem:[%s5587_s28 + $0x20] ss:$12 sps:$4 sm:$0xff]   ;;  %v3860_v6 = vld [vmem:[%s5587_s28 + $0x38] ss:$12 sps:$4 sm:$0xff]  }
 0x136   : > { %3558 = vmatprep.subr.bf16.mxu1 %v4242_v45  ;;  %v3845_v3 = vld [vmem:[%s5587_s28 + $0x60] ss:$12 sps:$4 sm:$0xff]   ;;  %v3846_v4 = vld [vmem:[%s5587_s28 + $0x7c] ss:$12 sps:$4 sm:$0xff]   ;;  %v3848_v7 = vld [vmem:[%s5587_s28 + $0x78] ss:$12 sps:$4 sm:$0xff]  }
 0x137   : > { %v3849_v8 = vld [vmem:[%s5587_s28 + $0x94] ss:$12 sps:$4 sm:$0xff]   ;;  %v3864_v9 = vld [vmem:[%s5587_s28 + $0x50] ss:$12 sps:$4 sm:$0xff]   ;;  %v3853_v11 = vld [vmem:[%s5587_s28 + $0xac] ss:$12 sps:$4 sm:$0xff]  }
 0x138   : > { %890 = vmatpush1.bf16.msra.mxu0 %v3836_v48  ;;  %v3851_v10 = vld [vmem:[%s5587_s28 + $0x90] ss:$12 sps:$4 sm:$0xff]   ;;  %v3868_v12 = vld [vmem:[%s5587_s28 + $0x68] ss:$12 sps:$4 sm:$0xff]   ;;  %v3872_v13 = vld [vmem:[%s5587_s28 + $0x80] ss:$12 sps:$4 sm:$0xff]  }
 0x139   : > { %891 = vmatprep.subr.bf16.mxu0 %v3837_v49  ;;  %3559 = vmatpush3.bf16.msra.mxu1 %v3856_v2  ;;  %v3855_v60 = vld [vmem:[%s5587_s28 + $0xa8] ss:$12 sps:$4 sm:$0xff]   ;;  %v3859_v61 = vld [vmem:[%s5588_s23 + $0x4] ss:$12 sps:$4 sm:$0xff]   ;;  %v3857_v15 = vld [vmem:[%s5588_s23] ss:$12 sps:$4 sm:$0xff]  }
 0x13a   : > { %3560 = vmatprep.subr.bf16.mxu1 %v4242_v45  ;;  %v3863_v16 = vld [vmem:[%s5588_s23 + $0x1c] ss:$12 sps:$4 sm:$0xff]   ;;  %v3876_v62 = vld [vmem:[%s5587_s28 + $0x98] ss:$12 sps:$4 sm:$0xff]   ;;  %v3867_v63 = vld [vmem:[%s5588_s23 + $0x34] ss:$12 sps:$4 sm:$0xff]  }
 0x13b   : > { %v3861_v17 = vld [vmem:[%s5588_s23 + $0x18] ss:$12 sps:$4 sm:$0xff]   ;;  %v3880_v18 = vld [vmem:[%s5587_s28 + $0xb0] ss:$12 sps:$4 sm:$0xff]   ;;  %v3884_v21 = vld [vmem:[%s5588_s23 + $0x8] ss:$12 sps:$4 sm:$0xff]  }
 0x13c   : > { %892 = vmatpush1.bf16.msra.mxu0 %v3839_v50  ;;  %v3865_v19 = vld [vmem:[%s5588_s23 + $0x30] ss:$12 sps:$4 sm:$0xff]   ;;  %v3871_v20 = vld [vmem:[%s5588_s23 + $0x4c] ss:$12 sps:$4 sm:$0xff]   ;;  %v3869_v22 = vld [vmem:[%s5588_s23 + $0x48] ss:$12 sps:$4 sm:$0xff]  }
 0x13d   : > { %893 = vmatprep.subr.bf16.mxu0 %v3840_v51  ;;  %3561 = vmatpush3.bf16.msra.mxu1 %v3860_v6  ;;  %v3875_v23 = vld [vmem:[%s5588_s23 + $0x64] ss:$12 sps:$4 sm:$0xff]   ;;  %v3888_v24 = vld [vmem:[%s5588_s23 + $0x20] ss:$12 sps:$4 sm:$0xff]   ;;  %v3879_v25 = vld [vmem:[%s5588_s23 + $0x7c] ss:$12 sps:$4 sm:$0xff]  }
 0x13e   : > { %3562 = vmatprep.subr.bf16.mxu1 %v4242_v45  ;;  %v3873_v57 = vld [vmem:[%s5588_s23 + $0x60] ss:$12 sps:$4 sm:$0xff]   ;;  %v3889_v26 = vld [vmem:[%s5588_s23 + $0x38] ss:$12 sps:$4 sm:$0xff]   ;;  %v3890_v29 = vld [vmem:[%s5588_s23 + $0x50] ss:$12 sps:$4 sm:$0xff]  }
 0x13f   : > { %v3877_v27 = vld [vmem:[%s5588_s23 + $0x78] ss:$12 sps:$4 sm:$0xff]   ;;  %v3883_v28 = vld [vmem:[%s5588_s23 + $0x94] ss:$12 sps:$4 sm:$0xff]   ;;  %v3881_v30 = vld [vmem:[%s5588_s23 + $0x90] ss:$12 sps:$4 sm:$0xff]  }
 0x140   : > { %894 = vmatpush1.bf16.msra.mxu0 %v3842_v53  ;;  %v3887_v31 = vld [vmem:[%s5588_s23 + $0xac] ss:$12 sps:$4 sm:$0xff]   ;;  %v3891_v32 = vld [vmem:[%s5588_s23 + $0x68] ss:$12 sps:$4 sm:$0xff]   ;;  %v3894_v37 = vld [vmem:[%s5588_s23 + $0xb0] ss:$12 sps:$4 sm:$0xff]  }
 0x141   : > { %895 = vmatprep.subr.bf16.mxu0 %v3843_v1  ;;  %3563 = vmatpush3.bf16.msra.mxu1 %v3864_v9  ;;  %v3885_v33 = vld [vmem:[%s5588_s23 + $0xa8] ss:$12 sps:$4 sm:$0xff]   ;;  %v3892_v34 = vld [vmem:[%s5588_s23 + $0x80] ss:$12 sps:$4 sm:$0xff]   ;;  %v3893_v36 = vld [vmem:[%s5588_s23 + $0x98] ss:$12 sps:$4 sm:$0xff]  }
 0x142   : > { %3564 = vmatprep.subr.bf16.mxu1 %v4242_v45  ;;  %v742_v38 = vld [vmem:[%s5589_s27] sm:$0x7]  ;;  %v699_v50 = vld [vmem:[%s4791_s6 + $0x8] sm:$0xff]  ;;  %s4806_s25 = scalar_lea.vmem [#allocation2], %s3473_s21  ;;  %s1269_s5 = scalar_lea.vmem [#allocation3], %s3230_s3 }
 0x143   : > { %v747_v39 = vrot.slane %v742_v38, %v4529_v55  ;;  %v751_v40 = vrot.slane %v742_v38, %v4540_v58  ;;  %v698_v43 = vld [vmem:[%s4791_s6] sm:$0xff]  ;;  %v755_v9 = vrot.slane %v742_v38, %v4532_v56  ;;  %s1271_s3 = scalar_lea.vmem [#allocation4], %s4796_s30  ;;  %s687_s4 = sadd.s32 1, %s4219_s4  }
 0x144   : > { %896 = vmatpush1.bf16.msra.mxu0 %v3845_v3  ;;  %p684_p0 = scmp.ge.s32.totalorder %s687_s4, 8  }
 0x145   : > { %897 = vmatprep.subr.bf16.mxu0 %v3846_v4  ;;  %3565 = vmatpush3.bf16.msra.mxu1 %v3868_v12 }
 0x146   : > { %3566 = vmatprep.subr.bf16.mxu1 %v4242_v45 }
 0x148   : > { %898 = vmatpush1.bf16.msra.mxu0 %v3848_v7 }
 0x149   : > { %899 = vmatprep.subr.bf16.mxu0 %v3849_v8  ;;  %3567 = vmatpush3.bf16.msra.mxu1 %v3872_v13 }
 0x14a   : > { %3568 = vmatprep.subr.bf16.mxu1 %v4242_v45 }
 0x14c   : > { %900 = vmatpush1.bf16.msra.mxu0 %v3851_v10 }
 0x14d   : > { %901 = vmatprep.subr.bf16.mxu0 %v3853_v11  ;;  %3569 = vmatpush3.bf16.msra.mxu1 %v3876_v62  ;;  %v1001_v11 = vld [vmem:[%s5590_s24] sm:$0x7]  ;;  %v706_v62 = vld [vmem:[%s4806_s25 + $0x18] sm:$0xff] }
 0x14e   : > { %3570 = vmatprep.subr.bf16.mxu1 %v4242_v45  ;;  %v1014_v38 = vrot.slane %v1001_v11, %v4532_v56 }
 0x150   : > { %902 = vmatpush1.bf16.msra.mxu0 %v3855_v60 }
 0x151   : > { %1146 = vmatprep.subr.bf16.mxu0 %v3859_v61  ;;  %3571 = vmatpush3.bf16.msra.mxu1 %v3880_v18  ;;  %v1006_v61 = vrot.slane %v1001_v11, %v4529_v55 }
 0x152   : > { %3576 = vmatprep.subr.bf16.mxu1 %v4242_v45 }
 0x153   : > { %920 = vmatmul.mubr.bf16.vlgmr.msra.gmra.mrb[0].mxu0 %v709_v14 }
 0x154   : > { %1147 = vmatpush1.bf16.msra.mxu0 %v3857_v15  ;;  %1178 = vmatprep.mubr.bf16.mxu0 %v4243_v46  ;;  %v1010_v15 = vrot.slane %v1001_v11, %v4540_v58  ;;  %v3933_v11 = vld [vmem:[%s5562_s7 + $0x94] ss:$24 sps:$4 sm:$0xff] (%p684_p0)  }
 0x155   : > { %1148 = vmatprep.subr.bf16.mxu0 %v3863_v16  ;;  %3573 = vmatmul.mubr.bf16.vlgmr.msra.gmra.mrb[0].mxu1 %v709_v14  ;;  %v700_v14 = vld [vmem:[%s4791_s6 + $0x10] sm:$0xff] }
 0x156   : > { %3577 = vmatpush3.bf16.msra.mxu1 %v3884_v21  ;;  %3592 = vmatprep.mubr.msk.bf16.mxu1 %vm4244_vm0, %v4242_v45 }
 0x157   : > { %3578 = vmatprep.subr.bf16.mxu1 %v4242_v45 }
 0x158   : > { %1149 = vmatpush1.bf16.msra.mxu0 %v3861_v17 }
 0x159   : > { %1150 = vmatprep.subr.bf16.mxu0 %v3867_v63 }
 0x15a   : > { %3579 = vmatpush3.bf16.msra.mxu1 %v3888_v24 }
 0x15b   : > { %3580 = vmatprep.subr.bf16.mxu1 %v4242_v45 }
 0x15c   : > { %1151 = vmatpush1.bf16.msra.mxu0 %v3865_v19 }
 0x15d   : > { %1152 = vmatprep.subr.bf16.mxu0 %v3871_v20 }
 0x15e   : > { %3581 = vmatpush3.bf16.msra.mxu1 %v3889_v26 }
 0x15f   : > { %3582 = vmatprep.subr.bf16.mxu1 %v4242_v45 }
 0x160   : > { %1153 = vmatpush1.bf16.msra.mxu0 %v3869_v22 }
 0x161   : > { %1154 = vmatprep.subr.bf16.mxu0 %v3875_v23  ;;  %v707_v23 = vld [vmem:[%s4806_s25 + $0x20] sm:$0xff] }
 0x162   : > { %3583 = vmatpush3.bf16.msra.mxu1 %v3890_v29 }
 0x163   : > { %3584 = vmatprep.subr.bf16.mxu1 %v4242_v45 }
 0x164   : > { %1155 = vmatpush1.bf16.msra.mxu0 %v3873_v57 }
 0x165   : > { %1156 = vmatprep.subr.bf16.mxu0 %v3879_v25 }
 0x166   : > { %3585 = vmatpush3.bf16.msra.mxu1 %v3891_v32 }
 0x167   : > { %3586 = vmatprep.subr.bf16.mxu1 %v4242_v45 }
 0x168   : > { %1157 = vmatpush1.bf16.msra.mxu0 %v3877_v27 }
 0x169   : > { %1158 = vmatprep.subr.bf16.mxu0 %v3883_v28 }
 0x16a   : > { %3587 = vmatpush3.bf16.msra.mxu1 %v3892_v34 }
 0x16b   : > { %3588 = vmatprep.subr.bf16.mxu1 %v4242_v45 }
 0x16c   : > { %1159 = vmatpush1.bf16.msra.mxu0 %v3881_v30 }
 0x16d   : > { %1160 = vmatprep.subr.bf16.mxu0 %v3887_v31 }
 0x16e   : > { %3589 = vmatpush3.bf16.msra.mxu1 %v3893_v36 }
 0x16f   : > { %3590 = vmatprep.subr.bf16.mxu1 %v4242_v45 }
 0x170   : > { %1161 = vmatpush1.bf16.msra.mxu0 %v3885_v33 }
 0x172   : > { %3591 = vmatpush3.bf16.msra.mxu1 %v3894_v37 }
 0x173   : > { %1179 = vmatmul.mubr.bf16.vlgmr.msra.gmra.mrb[4].mxu0 %v968_v35 }
 0x175   : > { %3593 = vmatmul.mubr.bf16.vlgmr.msra.gmra.mrb[4].mxu1 %v968_v35 }
 0x226   : > { %v921_v44 = vpop.f32.mrb[0].mxu0 }
 0x227   : > { %v922_v45 = vadd.f32 %v921_v44, %v747_v39  ;;  %v923_v46 = vpop.f32.mrb[1].mxu0 }
 0x228   : > { %v924_v47 = vadd.f32 %v923_v46, %v751_v40  ;;  %v925_v48 = vpop.f32.mrb[2].mxu0  ;;  %v962_v1 = vpop.f32.mrb[0].mxu1 }
 0x229   : > { %v1227_v49 = vadd.f32 %v922_v45, %v698_v43  ;;  %v926_v51 = vpop.f32.mrb[3].mxu0  ;;  %v3574_v3 = vpop.f32.mrb[1].mxu1  ;;  %v963_v60 = vadd.f32 %v962_v1, %v755_v9  ;;  %v708_v45 = vld [vmem:[%s4806_s25 + $0x28] sm:$0xff]  ;;  %v3931_v9 = vld [vmem:[%s5562_s7 + $0x60] ss:$24 sps:$4 sm:$0xff] (%p684_p0)  }
 0x22a   : > { %v1234_v53 = vadd.f32 %v924_v47, %v699_v50  ;;  %v965_v4 = vpop.f32.mrb[2].mxu1  ;;  %v3917_v1 = vld [vmem:[%s5562_s7 + $0xc] ss:$24 sps:$4 sm:$0xff] (%p684_p0)   ;;  %v3923_v3 = vld [vmem:[%s5562_s7 + $0x3c] ss:$24 sps:$4 sm:$0xff] (%p684_p0)  }
 0x22b   : > { %v3282_v52 = vmul.f32 -1.442695, %v1227_v49  ;;  %v3575_v6 = vpop.f32.mrb[3].mxu1  ;;  %1978 = vmatprep.subr.bf16.mxu1 (%p684_p0), %v3917_v1  ;;  %v3925_v4 = vld [vmem:[%s5562_s7 + $0x30] ss:$24 sps:$4 sm:$0xff] (%p684_p0)  }
 0x22c   : > { %v3283_v2 = vmul.f32 -1.442695, %v1234_v53  ;;  %v3915_v53 = vld [vmem:[%s5562_s7 + $0x4] ss:$24 sps:$4 sm:$0xff] (%p684_p0)   ;;  %v3926_v6 = vld [vmem:[%s5562_s7 + $0x38] ss:$24 sps:$4 sm:$0xff] (%p684_p0)  }
 0x22d   : > { %3895 = vpow2.f32 %v3282_v52  ;;  %1905 = vmatprep.subr.bf16.mxu0 (%p684_p0), %v3915_v53  ;;  %v3997_v53 = vld [vmem:[%s5562_s7 + $0x270] ss:$24 sps:$4 sm:$0xff] (%p684_p0)  }
 0x22e   : > { %3897 = vpow2.f32 %v3283_v2  ;;  %v3919_v2 = vld [vmem:[%s5562_s7] ss:$24 sps:$4 sm:$0xff] (%p684_p0)  }
 0x22f   :  { %1906 = vmatpush1.bf16.msra.mxu0 (%p684_p0), %v3919_v2  ;;  %v3998_v1 = vld [vmem:[%s5562_s7 + $0x278] ss:$24 sps:$4 sm:$0xff] (%p684_p0)   ;;  %v3999_v2 = vld [vmem:[%s5562_s7 + $0x2a4] ss:$24 sps:$4 sm:$0xff] (%p684_p0)  }
 0x237   : > { %v3896_v7 = vpop.eup %3895 }
 0x238   : > { %v1231_v8 = vadd.f32 1.0, %v3896_v7  ;;  %v3898_v10 = vpop.eup %3897  ;;  %v3927_v7 = vld [vmem:[%s5562_s7 + $0x64] ss:$24 sps:$4 sm:$0xff] (%p684_p0)  }
 0x239   : > { %v1238_v12 = vadd.f32 1.0, %v3898_v10  ;;  %v3932_v10 = vld [vmem:[%s5562_s7 + $0x68] ss:$24 sps:$4 sm:$0xff] (%p684_p0)  }
 0x23a   : > { %3899 = vrcp.f32 %v1231_v8  ;;  %v3929_v8 = vld [vmem:[%s5562_s7 + $0x6c] ss:$24 sps:$4 sm:$0xff] (%p684_p0)  }
 0x23b   : > { %3901 = vrcp.f32 %v1238_v12  ;;  %v3935_v12 = vld [vmem:[%s5562_s7 + $0x9c] ss:$24 sps:$4 sm:$0xff] (%p684_p0)  }
 0x244   : > { %v3900_v13 = vpop.eup %3899 }
 0x245   : > { %v1241_v16 = vmul.f32 %v3900_v13, %v963_v60  ;;  %v3902_v26 = vpop.eup %3901  ;;  %v3937_v60 = vld [vmem:[%s5562_s7 + $0x90] ss:$24 sps:$4 sm:$0xff] (%p684_p0)   ;;  %v3939_v13 = vld [vmem:[%s5562_s7 + $0xc4] ss:$24 sps:$4 sm:$0xff] (%p684_p0)  }
 0x246   : > { %v1180_v17 = vpop.f32.mrb[4].mxu0  ;;  %v1244_v31 = vsub.f32 1.0, %v3902_v26  ;;  %v1246_v34 = vmul.f32 %v4215_v42, %v3902_v26  ;;  %v3963_v26 = vld [vmem:[%s5562_s7 + $0x184] ss:$24 sps:$4 sm:$0xff] (%p684_p0)  }
 0x247   : > { %v1242_v63 = vadd.f32 %v1241_v16, %v700_v14  ;;  %v1181_v18 = vadd.f32 %v1180_v17, %v1006_v61  ;;  %v1182_v19 = vpop.f32.mrb[5].mxu0  ;;  %v3938_v61 = vld [vmem:[%s5562_s7 + $0x98] ss:$24 sps:$4 sm:$0xff] (%p684_p0)   ;;  %v3941_v14 = vld [vmem:[%s5562_s7 + $0xcc] ss:$24 sps:$4 sm:$0xff] (%p684_p0)  }
 0x248   : > { %v1183_v20 = vadd.f32 %v1182_v19, %v1010_v15  ;;  %v1184_v21 = vpop.f32.mrb[6].mxu0  ;;  %v1221_v27 = vpop.f32.mrb[4].mxu1  ;;  %v3943_v15 = vld [vmem:[%s5562_s7 + $0xc0] ss:$24 sps:$4 sm:$0xff] (%p684_p0)   ;;  %v3947_v17 = vld [vmem:[%s5562_s7 + $0xfc] ss:$24 sps:$4 sm:$0xff] (%p684_p0)  }
 0x249   : > { %3903 = vtanh.f32 %v1242_v63  ;;  %v1248_v22 = vadd.f32 %v1181_v18, %v706_v62  ;;  %v1185_v24 = vpop.f32.mrb[7].mxu0  ;;  %v3594_v29 = vpop.f32.mrb[5].mxu1  ;;  %v1222_v43 = vadd.f32 %v1221_v27, %v1014_v38  ;;  %v3944_v16 = vld [vmem:[%s5562_s7 + $0xc8] ss:$24 sps:$4 sm:$0xff] (%p684_p0)   ;;  %v3945_v62 = vld [vmem:[%s5562_s7 + $0xf4] ss:$24 sps:$4 sm:$0xff] (%p684_p0)  }
 0x24a   : > { %v1255_v25 = vadd.f32 %v1183_v20, %v707_v23  ;;  %v1224_v30 = vpop.f32.mrb[6].mxu1  ;;  %v3949_v63 = vld [vmem:[%s5562_s7 + $0xf0] ss:$24 sps:$4 sm:$0xff] (%p684_p0)   ;;  %v3951_v19 = vld [vmem:[%s5562_s7 + $0x124] ss:$24 sps:$4 sm:$0xff] (%p684_p0)  }
 0x24b   : > { %v3284_v57 = vmul.f32 -1.442695, %v1248_v22  ;;  %v3595_v32 = vpop.f32.mrb[7].mxu1  ;;  %v3950_v18 = vld [vmem:[%s5562_s7 + $0xf8] ss:$24 sps:$4 sm:$0xff] (%p684_p0)  }
 0x24c   : > { %v3285_v28 = vmul.f32 -1.442695, %v1255_v25  ;;  %v3953_v20 = vld [vmem:[%s5562_s7 + $0x12c] ss:$24 sps:$4 sm:$0xff] (%p684_p0)   ;;  %v3955_v21 = vld [vmem:[%s5562_s7 + $0x120] ss:$24 sps:$4 sm:$0xff] (%p684_p0)  }
 0x24d   : > { %3905 = vpow2.f32 %v3284_v57  ;;  %v3956_v22 = vld [vmem:[%s5562_s7 + $0x128] ss:$24 sps:$4 sm:$0xff] (%p684_p0)   ;;  %v3957_v23 = vld [vmem:[%s5562_s7 + $0x154] ss:$24 sps:$4 sm:$0xff] (%p684_p0)   ;;  %v3962_v25 = vld [vmem:[%s5562_s7 + $0x158] ss:$24 sps:$4 sm:$0xff] (%p684_p0)  }
 0x24e   : > { %3907 = vpow2.f32 %v3285_v28  ;;  %v3959_v24 = vld [vmem:[%s5562_s7 + $0x15c] ss:$24 sps:$4 sm:$0xff] (%p684_p0)   ;;  %v3961_v57 = vld [vmem:[%s5562_s7 + $0x150] ss:$24 sps:$4 sm:$0xff] (%p684_p0)   ;;  %v3965_v27 = vld [vmem:[%s5562_s7 + $0x18c] ss:$24 sps:$4 sm:$0xff] (%p684_p0)  }
 0x24f   :  { %v3967_v28 = vld [vmem:[%s5562_s7 + $0x180] ss:$24 sps:$4 sm:$0xff] (%p684_p0)   ;;  %v3969_v30 = vld [vmem:[%s5562_s7 + $0x1b4] ss:$24 sps:$4 sm:$0xff] (%p684_p0)   ;;  %v3973_v32 = vld [vmem:[%s5562_s7 + $0x1b0] ss:$24 sps:$4 sm:$0xff] (%p684_p0)  }
 0x250   :  { %v3968_v29 = vld [vmem:[%s5562_s7 + $0x188] ss:$24 sps:$4 sm:$0xff] (%p684_p0)   ;;  %v3981_v38 = vld [vmem:[%s5562_s7 + $0x214] ss:$24 sps:$4 sm:$0xff] (%p684_p0)  }
 0x253   : > { %v3904_v33 = vpop.eup %3903 }
 0x254   : > { %v1245_v35 = vmul.f32 %v3904_v33, %v1244_v31  ;;  %v3971_v31 = vld [vmem:[%s5562_s7 + $0x1bc] ss:$24 sps:$4 sm:$0xff] (%p684_p0)   ;;  %v3974_v33 = vld [vmem:[%s5562_s7 + $0x1b8] ss:$24 sps:$4 sm:$0xff] (%p684_p0)  }
 0x256   : > { %v1247_v42 = vadd.f32 %v1246_v34, %v1245_v35   ;;  %v3975_v34 = vld [vmem:[%s5562_s7 + $0x1e4] ss:$24 sps:$4 sm:$0xff] (%p684_p0)  }
 0x257   : > { %v3906_v36 = vpop.eup %3905  ;;  %v3977_v35 = vld [vmem:[%s5562_s7 + $0x1ec] ss:$24 sps:$4 sm:$0xff] (%p684_p0)  }
 0x258   : > { %1270 = vst [vmem:[%s1269_s5] sm:$0xff] %v1247_v42  ;;  %v1252_v37 = vadd.f32 1.0, %v3906_v36  ;;  %v3908_v39 = vpop.eup %3907  ;;  %v3920_v42 = vld [vmem:[%s5562_s7 + $0x8] ss:$24 sps:$4 sm:$0xff] (%p684_p0)  }
 0x259   : > { %v1259_v40 = vadd.f32 1.0, %v3908_v39  ;;  %1979 = vmatpush1.bf16.msra.mxu1 (%p684_p0), %v3920_v42  ;;  %v3979_v36 = vld [vmem:[%s5562_s7 + $0x1e0] ss:$24 sps:$4 sm:$0xff] (%p684_p0)   ;;  %v3983_v39 = vld [vmem:[%s5562_s7 + $0x21c] ss:$24 sps:$4 sm:$0xff] (%p684_p0)  }
 0x25a   : > { %3909 = vrcp.f32 %v1252_v37  ;;  %1980 = vmatprep.subr.bf16.mxu1 (%p684_p0), %v3923_v3  ;;  %v3980_v37 = vld [vmem:[%s5562_s7 + $0x1e8] ss:$24 sps:$4 sm:$0xff] (%p684_p0)   ;;  %v4001_v42 = vld [vmem:[%s5562_s7 + $0x2ac] ss:$24 sps:$4 sm:$0xff] (%p684_p0)  }
 0x25b   : > { %3911 = vrcp.f32 %v1259_v40  ;;  %v4004_v3 = vld [vmem:[%s5562_s7 + $0x2a8] ss:$24 sps:$4 sm:$0xff] (%p684_p0)  }
 0x25d   :  { %1981 = vmatpush1.bf16.msra.mxu1 (%p684_p0), %v3926_v6  ;;  %v4007_v6 = vld [vmem:[%s5562_s7 + $0x2dc] ss:$24 sps:$4 sm:$0xff] (%p684_p0)  }
 0x25e   :  { %1982 = vmatprep.subr.bf16.mxu1 (%p684_p0), %v3929_v8  ;;  %v4010_v8 = vld [vmem:[%s5562_s7 + $0x2d8] ss:$24 sps:$4 sm:$0xff] (%p684_p0)  }
 0x261   :  { %1983 = vmatpush1.bf16.msra.mxu1 (%p684_p0), %v3932_v10  ;;  %v1274_v10 = vld [vmem:[#allocation3 + $0x8] sm:$0xff] (%p684_p0) }
 0x262   :  { %1984 = vmatprep.subr.bf16.mxu1 (%p684_p0), %v3935_v12 }
 0x264   : > { %v3910_v44 = vpop.eup %3909 }
 0x265   : > { %v1262_v46 = vmul.f32 %v3910_v44, %v1222_v43  ;;  %v3912_v48 = vpop.eup %3911  ;;  %1985 = vmatpush1.bf16.msra.mxu1 (%p684_p0), %v3938_v61  ;;  %v3985_v43 = vld [vmem:[%s5562_s7 + $0x210] ss:$24 sps:$4 sm:$0xff] (%p684_p0)  }
 0x266   : > { %v1265_v49 = vsub.f32 1.0, %v3912_v48  ;;  %v1267_v51 = vmul.f32 %v4211_v41, %v3912_v48  ;;  %1986 = vmatprep.subr.bf16.mxu1 (%p684_p0), %v3941_v14  ;;  %v3986_v44 = vld [vmem:[%s5562_s7 + $0x218] ss:$24 sps:$4 sm:$0xff] (%p684_p0)   ;;  %v3989_v48 = vld [vmem:[%s5562_s7 + $0x24c] ss:$24 sps:$4 sm:$0xff] (%p684_p0)  }
 0x267   : > { %v1263_v47 = vadd.f32 %v1262_v46, %v708_v45  ;;  %v3987_v46 = vld [vmem:[%s5562_s7 + $0x244] ss:$24 sps:$4 sm:$0xff] (%p684_p0)  }
 0x268   :  { %v4016_v14 = vld [vmem:[%s5562_s7 + $0x44] ss:$24 sps:$4 sm:$0xff] (%p684_p0)  }
 0x269   : > { %3913 = vtanh.f32 %v1263_v47  ;;  %1987 = vmatpush1.bf16.msra.mxu1 (%p684_p0), %v3944_v16  ;;  %v4014_v16 = vld [vmem:[%s5562_s7 + $0x40] ss:$24 sps:$4 sm:$0xff] (%p684_p0)  }
 0x26a   :  { %1988 = vmatprep.subr.bf16.mxu1 (%p684_p0), %v3947_v17  ;;  %v1276_v17 = vld [vmem:[#allocation3 + $0x18] sm:$0xff] (%p684_p0) }
 0x26d   :  { %1989 = vmatpush1.bf16.msra.mxu1 (%p684_p0), %v3950_v18 }
 0x26e   :  { %1990 = vmatprep.subr.bf16.mxu1 (%p684_p0), %v3953_v20 }
 0x271   :  { %1991 = vmatpush1.bf16.msra.mxu1 (%p684_p0), %v3956_v22  ;;  %v4022_v22 = vld [vmem:[%s5562_s7 + $0xa4] ss:$24 sps:$4 sm:$0xff] (%p684_p0)  }
 0x272   :  { %686 = sbr.rel (!%p684_p0) target bundleno = 300 (0x12c), region = 128  ;;  %1992 = vmatprep.subr.bf16.mxu1 (%p684_p0), %v3959_v24  ;;  %v4020_v24 = vld [vmem:[%s5562_s7 + $0xa0] ss:$24 sps:$4 sm:$0xff] (%p684_p0)  }
 0x273   : > { %v3914_v50 = vpop.eup %3913 }
 0x274   : > { %v1266_v52 = vmul.f32 %v3914_v50, %v1265_v49  ;;  %v3991_v49 = vld [vmem:[%s5562_s7 + $0x240] ss:$24 sps:$4 sm:$0xff] (%p684_p0)  }
 0x275   :  { %1993 = vmatpush1.bf16.msra.mxu1 (%p684_p0), %v3962_v25  ;;  %v3992_v50 = vld [vmem:[%s5562_s7 + $0x248] ss:$24 sps:$4 sm:$0xff] (%p684_p0)  }
 0x276   : > { %v1268_v41 = vadd.f32 %v1267_v51, %v1266_v52   ;;  %1994 = vmatprep.subr.bf16.mxu1 (%p684_p0), %v3965_v27  ;;  %v3993_v51 = vld [vmem:[%s5562_s7 + $0x274] ss:$24 sps:$4 sm:$0xff] (%p684_p0)  }
 0x277   :  { %v3995_v52 = vld [vmem:[%s5562_s7 + $0x27c] ss:$24 sps:$4 sm:$0xff] (%p684_p0)   ;;  %v1278_v25 = vld [vmem:[#allocation3 + $0x28] sm:$0xff] (%p684_p0) }
 0x278   : > { %1272 = vst [vmem:[%s1271_s3] sm:$0xff] %v1268_v41  ;;  %v3921_v41 = vld [vmem:[%s5562_s7 + $0x34] ss:$24 sps:$4 sm:$0xff] (%p684_p0)  }
 0x279   :  { %1907 = vmatprep.subr.bf16.mxu0 %v3921_v41  ;;  %1995 = vmatpush1.bf16.msra.mxu1 %v3968_v29  ;;  %v4003_v41 = vld [vmem:[%s5562_s7 + $0x2a0] ss:$24 sps:$4 sm:$0xff]  }
 0x27a   :  { %1908 = vmatpush1.bf16.msra.mxu0 %v3925_v4  ;;  %1996 = vmatprep.subr.bf16.mxu1 %v3971_v31  ;;  %v4005_v4 = vld [vmem:[%s5562_s7 + $0x2d4] ss:$24 sps:$4 sm:$0xff]   ;;  %v4028_v31 = vld [vmem:[%s5562_s7 + $0x104] ss:$24 sps:$4 sm:$0xff]  }
 0x27b   :  { %1909 = vmatprep.subr.bf16.mxu0 %v3927_v7  ;;  %v4009_v7 = vld [vmem:[%s5562_s7 + $0x2d0] ss:$24 sps:$4 sm:$0xff]  }
 0x27d   :  { %1997 = vmatpush1.bf16.msra.mxu1 %v3974_v33  ;;  %v4026_v33 = vld [vmem:[%s5562_s7 + $0x100] ss:$24 sps:$4 sm:$0xff]  }
 0x27e   :  { %1910 = vmatpush1.bf16.msra.mxu0 %v3931_v9  ;;  %1998 = vmatprep.subr.bf16.mxu1 %v3977_v35  ;;  %v1273_v9 = vld [vmem:[#allocation3] sm:$0xff]  ;;  %v1280_v35 = vld [vmem:[#allocation3 + $0x38] sm:$0xff] }
 0x27f   :  { %1911 = vmatprep.subr.bf16.mxu0 %v3933_v11  ;;  %v1281_v40 = vld [vmem:[#allocation4] sm:$0xff]  ;;  %v1282_v45 = vld [vmem:[#allocation4 + $0x8] sm:$0xff]  ;;  %v5023_v12 = vpack.c.bf16 %v1274_v10, %v1273_v9  ;;  %v1284_v61 = vld [vmem:[#allocation4 + $0x18] sm:$0xff] }
 0x280   :  { %v4971_v47 = vpack.c.bf16 %v1282_v45, %v1281_v40  ;;  %v4013_v11 = vld [vmem:[%s5562_s7 + $0x14] ss:$24 sps:$4 sm:$0xff]   ;;  %v1288_v29 = vld [vmem:[#allocation4 + $0x38] sm:$0xff] }
 0x281   :  { %1999 = vmatpush1.bf16.msra.mxu1 %v3980_v37  ;;  %v1286_v20 = vld [vmem:[#allocation4 + $0x28] sm:$0xff]  ;;  %v4032_v40 = vld [vmem:[%s5562_s7 + $0x160] ss:$24 sps:$4 sm:$0xff]   ;;  %v4040_v45 = vld [vmem:[%s5562_s7 + $0x1c4] ss:$24 sps:$4 sm:$0xff]  }
 0x282   :  { %1912 = vmatpush1.bf16.msra.mxu0 %v3937_v60  ;;  %2000 = vmatprep.subr.bf16.mxu1 %v3983_v39  ;;  %v1283_v60 = vld [vmem:[#allocation4 + $0x10] sm:$0xff]  ;;  %v4034_v39 = vld [vmem:[%s5562_s7 + $0x164] ss:$24 sps:$4 sm:$0xff]  }
 0x283   :  { %1913 = vmatprep.subr.bf16.mxu0 %v3939_v13  ;;  %1937 = vmatprep.mubr.bf16.mxu0 %v4971_v47  ;;  %v4011_v13 = vld [vmem:[%s5562_s7 + $0x10] ss:$24 sps:$4 sm:$0xff]  }
 0x284   :  { %2010 = vmatprep.mubr.bf16.mxu1 %v4971_v47 }
 0x285   :  { %2001 = vmatpush1.bf16.msra.mxu1 %v3986_v44  ;;  %v4035_v44 = vld [vmem:[%s5562_s7 + $0x190] ss:$24 sps:$4 sm:$0xff]  }
 0x286   :  { %1914 = vmatpush1.bf16.msra.mxu0 %v3943_v15  ;;  %2002 = vmatprep.subr.bf16.mxu1 %v3989_v48  ;;  %v5031_v15 = vpack.c.bf16 %v1284_v61, %v1283_v60  ;;  %v4041_v48 = vld [vmem:[%s5562_s7 + $0x1f0] ss:$24 sps:$4 sm:$0xff]  }
 0x287   :  { %1915 = vmatprep.subr.bf16.mxu0 %v3945_v62  ;;  %v1275_v62 = vld [vmem:[#allocation3 + $0x10] sm:$0xff] }
 0x288   :  { %v5043_v18 = vpack.c.bf16 %v1276_v17, %v1275_v62 }
 0x289   :  { %2003 = vmatpush1.bf16.msra.mxu1 %v3992_v50  ;;  %v4044_v50 = vld [vmem:[%s5562_s7 + $0x220] ss:$24 sps:$4 sm:$0xff]  }
 0x28a   :  { %1916 = vmatpush1.bf16.msra.mxu0 %v3949_v63  ;;  %2004 = vmatprep.subr.bf16.mxu1 %v3995_v52  ;;  %v4019_v63 = vld [vmem:[%s5562_s7 + $0x74] ss:$24 sps:$4 sm:$0xff]   ;;  %v4047_v52 = vld [vmem:[%s5562_s7 + $0x250] ss:$24 sps:$4 sm:$0xff]  }
 0x28b   :  { %1917 = vmatprep.subr.bf16.mxu0 %v3951_v19  ;;  %v1285_v19 = vld [vmem:[#allocation4 + $0x20] sm:$0xff] }
 0x28d   :  { %2005 = vmatpush1.bf16.msra.mxu1 %v3998_v1  ;;  %v4050_v1 = vld [vmem:[%s5562_s7 + $0x280] ss:$24 sps:$4 sm:$0xff]  }
 0x28e   :  { %1918 = vmatpush1.bf16.msra.mxu0 %v3955_v21  ;;  %2006 = vmatprep.subr.bf16.mxu1 %v4001_v42  ;;  %v4017_v21 = vld [vmem:[%s5562_s7 + $0x70] ss:$24 sps:$4 sm:$0xff]  }
 0x28f   :  { %1919 = vmatprep.subr.bf16.mxu0 %v3957_v23  ;;  %v1294_v23 = vpack.c.bf16 %v1286_v20, %v1285_v19  ;;  %v4053_v42 = vld [vmem:[%s5562_s7 + $0x2b0] ss:$24 sps:$4 sm:$0xff]  }
 0x291   :  { %2007 = vmatpush1.bf16.msra.mxu1 %v4004_v3  ;;  %v4056_v3 = vld [vmem:[%s5562_s7 + $0x2e0] ss:$24 sps:$4 sm:$0xff]  }
 0x292   :  { %1920 = vmatpush1.bf16.msra.mxu0 %v3961_v57  ;;  %2008 = vmatprep.subr.bf16.mxu1 %v4007_v6  ;;  %v1277_v57 = vld [vmem:[#allocation3 + $0x20] sm:$0xff] }
 0x293   :  { %1921 = vmatprep.subr.bf16.mxu0 %v3963_v26  ;;  %v4025_v26 = vld [vmem:[%s5562_s7 + $0xd4] ss:$24 sps:$4 sm:$0xff]   ;;  %v5059_v27 = vpack.c.bf16 %v1278_v25, %v1277_v57 }
 0x295   :  { %2009 = vmatpush1.bf16.msra.mxu1 %v4010_v8 }
 0x296   :  { %1922 = vmatpush1.bf16.msra.mxu0 %v3967_v28  ;;  %3652 = vmatprep.subr.bf16.mxu1 %v4013_v11  ;;  %v1287_v28 = vld [vmem:[#allocation4 + $0x30] sm:$0xff] }
 0x297   :  { %1923 = vmatprep.subr.bf16.mxu0 %v3969_v30  ;;  %v4023_v30 = vld [vmem:[%s5562_s7 + $0xd0] ss:$24 sps:$4 sm:$0xff]  }
 0x298   :  { %2011 = vmatmul.mubr.bf16.vlgmr.msra.gmra.mrb[0].mxu1 %v5023_v12 }
 0x299   :  { %3668 = vmatpush1.bf16.msra.mxu1 %v4011_v13  ;;  %2020 = vmatprep.mubr.bf16.mxu1 %v5031_v15 }
 0x29a   :  { %1924 = vmatpush1.bf16.msra.mxu0 %v3973_v32  ;;  %3653 = vmatprep.subr.bf16.mxu1 %v4016_v14  ;;  %v5067_v32 = vpack.c.bf16 %v1288_v29, %v1287_v28 }
 0x29b   :  { %1925 = vmatprep.subr.bf16.mxu0 %v3975_v34  ;;  %v1279_v34 = vld [vmem:[#allocation3 + $0x30] sm:$0xff] }
 0x29c   :  { %v5079_v37 = vpack.c.bf16 %v1280_v35, %v1279_v34 }
 0x29d   :  { %3669 = vmatpush1.bf16.msra.mxu1 %v4014_v16 }
 0x29e   :  { %1926 = vmatpush1.bf16.msra.mxu0 %v3979_v36  ;;  %3654 = vmatprep.subr.bf16.mxu1 %v4019_v63  ;;  %v4031_v36 = vld [vmem:[%s5562_s7 + $0x134] ss:$24 sps:$4 sm:$0xff]  }
 0x29f   :  { %1927 = vmatprep.subr.bf16.mxu0 %v3981_v38  ;;  %v4029_v38 = vld [vmem:[%s5562_s7 + $0x130] ss:$24 sps:$4 sm:$0xff]  }
 0x2a0   :  { %2021 = vmatmul.mubr.bf16.gmra.mrb[4].mxu1 %v5043_v18 }
 0x2a1   :  { %3670 = vmatpush1.bf16.msra.mxu1 %v4017_v21  ;;  %2030 = vmatprep.mubr.bf16.mxu1 %v1294_v23 }
 0x2a2   :  { %1928 = vmatpush1.bf16.msra.mxu0 %v3985_v43  ;;  %3655 = vmatprep.subr.bf16.mxu1 %v4022_v22  ;;  %v4037_v43 = vld [vmem:[%s5562_s7 + $0x194] ss:$24 sps:$4 sm:$0xff]  }
 0x2a3   :  { %1929 = vmatprep.subr.bf16.mxu0 %v3987_v46  ;;  %v4038_v46 = vld [vmem:[%s5562_s7 + $0x1c0] ss:$24 sps:$4 sm:$0xff]  }
 0x2a5   :  { %3671 = vmatpush1.bf16.msra.mxu1 %v4020_v24 }
 0x2a6   :  { %1930 = vmatpush1.bf16.msra.mxu0 %v3991_v49  ;;  %3656 = vmatprep.subr.bf16.mxu1 %v4025_v26  ;;  %v4046_v49 = vld [vmem:[%s5562_s7 + $0x224] ss:$24 sps:$4 sm:$0xff]  }
 0x2a7   :  { %1931 = vmatprep.subr.bf16.mxu0 %v3993_v51  ;;  %v4049_v51 = vld [vmem:[%s5562_s7 + $0x254] ss:$24 sps:$4 sm:$0xff]  }
 0x2a8   :  { %2031 = vmatmul.mubr.bf16.gmra.mrb[8].mxu1 %v5059_v27 }
 0x2a9   :  { %3672 = vmatpush1.bf16.msra.mxu1 %v4023_v30  ;;  %2040 = vmatprep.mubr.bf16.mxu1 %v5067_v32 }
 0x2aa   :  { %1932 = vmatpush1.bf16.msra.mxu0 %v3997_v53  ;;  %3657 = vmatprep.subr.bf16.mxu1 %v4028_v31  ;;  %v4052_v53 = vld [vmem:[%s5562_s7 + $0x284] ss:$24 sps:$4 sm:$0xff]  }
 0x2ab   :  { %1933 = vmatprep.subr.bf16.mxu0 %v3999_v2  ;;  %v4055_v2 = vld [vmem:[%s5562_s7 + $0x2b4] ss:$24 sps:$4 sm:$0xff]  }
 0x2ad   :  { %3673 = vmatpush1.bf16.msra.mxu1 %v4026_v33 }
 0x2ae   :  { %1934 = vmatpush1.bf16.msra.mxu0 %v4003_v41  ;;  %3658 = vmatprep.subr.bf16.mxu1 %v4031_v36  ;;  %v4058_v41 = vld [vmem:[%s5562_s7 + $0x2e4] ss:$24 sps:$4 sm:$0xff]  }
 0x2af   :  { %1935 = vmatprep.subr.bf16.mxu0 %v4005_v4  ;;  %v5150_v4 = vld [vmem:[%s5565_s10] sm:$0x3f] }
 0x2b0   :  { %2041 = vmatmul.mubr.bf16.gmra.mrb[12].mxu1 %v5079_v37  ;;  %v5154_v6 = vrot.slane %v5150_v4, %v4529_v55  ;;  %v5162_v8 = vrot.slane %v5150_v4, %v4540_v58  ;;  %v5167_v9 = vrot.slane %v5150_v4, %v135_v59 }
 0x2b1   :  { %3674 = vmatpush1.bf16.msra.mxu1 %v4029_v38  ;;  %2103 = vmatprep.mubr.bf16.mxu1 %v1294_v23 }
 0x2b2   :  { %1936 = vmatpush1.bf16.msra.mxu0 %v4009_v7  ;;  %3659 = vmatprep.subr.bf16.mxu1 %v4034_v39  ;;  %v5158_v7 = vrot.slane %v5150_v4, %v4532_v56 }
 0x2b3   :  { %2051 = vmatprep.subr.bf16.mxu0 %v4013_v11 }
 0x2b5   :  { %1938 = vmatmul.mubr.bf16.vlgmr.msra.gmra.mrb[0].mxu0 %v5023_v12  ;;  %3675 = vmatpush1.bf16.msra.mxu1 %v4032_v40 }
 0x2b6   :  { %2052 = vmatpush1.bf16.msra.mxu0 %v4011_v13  ;;  %1947 = vmatprep.mubr.bf16.mxu0 %v5031_v15 }
 0x2b7   :  { %2053 = vmatprep.subr.bf16.mxu0 %v4016_v14  ;;  %3660 = vmatprep.subr.bf16.mxu1 %v4037_v43 }
 0x2b9   :  { %3676 = vmatpush1.bf16.msra.mxu1 %v4035_v44 }
 0x2ba   :  { %2054 = vmatpush1.bf16.msra.mxu0 %v4014_v16  ;;  %3661 = vmatprep.subr.bf16.mxu1 %v4040_v45 }
 0x2bb   :  { %2055 = vmatprep.subr.bf16.mxu0 %v4019_v63 }
 0x2bd   :  { %1948 = vmatmul.mubr.bf16.gmra.mrb[4].mxu0 %v5043_v18  ;;  %3677 = vmatpush1.bf16.msra.mxu1 %v4038_v46 }
 0x2be   :  { %2056 = vmatpush1.bf16.msra.mxu0 %v4017_v21  ;;  %1957 = vmatprep.mubr.bf16.mxu0 %v1294_v23 }
 0x2bf   :  { %2057 = vmatprep.subr.bf16.mxu0 %v4022_v22 }
 0x2c2   :  { %2058 = vmatpush1.bf16.msra.mxu0 %v4020_v24 }
 0x2c3   :  { %2059 = vmatprep.subr.bf16.mxu0 %v4025_v26 }
 0x2c5   :  { %1958 = vmatmul.mubr.bf16.gmra.mrb[8].mxu0 %v5059_v27 }
 0x2c6   :  { %2060 = vmatpush1.bf16.msra.mxu0 %v4023_v30  ;;  %1967 = vmatprep.mubr.bf16.mxu0 %v5067_v32 }
 0x2c7   :  { %2061 = vmatprep.subr.bf16.mxu0 %v4028_v31 }
 0x2ca   :  { %2062 = vmatpush1.bf16.msra.mxu0 %v4026_v33 }
 0x2cb   :  { %2063 = vmatprep.subr.bf16.mxu0 %v4031_v36 }
 0x2cd   :  { %1968 = vmatmul.mubr.bf16.gmra.mrb[12].mxu0 %v5079_v37 }
 0x2ce   :  { %2064 = vmatpush1.bf16.msra.mxu0 %v4029_v38  ;;  %2083 = vmatprep.mubr.bf16.mxu0 %v4971_v47  ;;  %v4043_v47 = vld [vmem:[%s5562_s7 + $0x1f4] ss:$24 sps:$4 sm:$0xff]   ;;  %s5215_s7 = smov 0  }
 0x2cf   :  { %2065 = vmatprep.subr.bf16.mxu0 %v4034_v39  ;;  %3662 = vmatprep.subr.bf16.mxu1 %v4043_v47 }
 0x2d0   :  { %3678 = vmatpush1.bf16.msra.mxu1 %v4041_v48 }
 0x2d1   :  { %3663 = vmatprep.subr.bf16.mxu1 %v4046_v49 }
 0x2d2   :  { %2066 = vmatpush1.bf16.msra.mxu0 %v4032_v40 }
 0x2d3   :  { %2067 = vmatprep.subr.bf16.mxu0 %v4037_v43 }
 0x2d4   :  { %3679 = vmatpush1.bf16.msra.mxu1 %v4044_v50 }
 0x2d5   :  { %3664 = vmatprep.subr.bf16.mxu1 %v4049_v51 }
 0x2d6   :  { %2068 = vmatpush1.bf16.msra.mxu0 %v4035_v44 }
 0x2d7   :  { %2069 = vmatprep.subr.bf16.mxu0 %v4040_v45 }
 0x2d8   :  { %3680 = vmatpush1.bf16.msra.mxu1 %v4047_v52 }
 0x2d9   :  { %3665 = vmatprep.subr.bf16.mxu1 %v4052_v53 }
 0x2da   :  { %2070 = vmatpush1.bf16.msra.mxu0 %v4038_v46 }
 0x2db   :  { %2071 = vmatprep.subr.bf16.mxu0 %v4043_v47 }
 0x2dc   :  { %3681 = vmatpush1.bf16.msra.mxu1 %v4050_v1 }
 0x2dd   :  { %3666 = vmatprep.subr.bf16.mxu1 %v4055_v2 }
 0x2de   :  { %2072 = vmatpush1.bf16.msra.mxu0 %v4041_v48 }
 0x2df   :  { %2073 = vmatprep.subr.bf16.mxu0 %v4046_v49 }
 0x2e0   :  { %3682 = vmatpush1.bf16.msra.mxu1 %v4053_v42 }
 0x2e1   :  { %3667 = vmatprep.subr.bf16.mxu1 %v4058_v41 }
 0x2e2   :  { %2074 = vmatpush1.bf16.msra.mxu0 %v4044_v50 }
 0x2e3   :  { %2075 = vmatprep.subr.bf16.mxu0 %v4049_v51 }
 0x2e4   :  { %3683 = vmatpush1.bf16.msra.mxu1 %v4056_v3 }
 0x2e6   :  { %2076 = vmatpush1.bf16.msra.mxu0 %v4047_v52 }
 0x2e7   :  { %2077 = vmatprep.subr.bf16.mxu0 %v4052_v53  ;;  %2104 = vmatmul.mubr.bf16.vlgmr.msra.gmra.mrb[16].mxu1 %v5059_v27 }
 0x2e8   :  { %2113 = vmatprep.mubr.bf16.mxu1 %v5067_v32 }
 0x2ea   :  { %2078 = vmatpush1.bf16.msra.mxu0 %v4050_v1 }
 0x2eb   :  { %2079 = vmatprep.subr.bf16.mxu0 %v4055_v2 }
 0x2ee   :  { %2080 = vmatpush1.bf16.msra.mxu0 %v4053_v42 }
 0x2ef   :  { %2081 = vmatprep.subr.bf16.mxu0 %v4058_v41  ;;  %2114 = vmatmul.mubr.bf16.gmra.mrb[20].mxu1 %v5079_v37 }
 0x2f2   :  { %2082 = vmatpush1.bf16.msra.mxu0 %v4056_v3 }
 0x2f5   :  { %2084 = vmatmul.mubr.bf16.vlgmr.msra.gmra.mrb[16].mxu0 %v5023_v12 }
 0x2f6   :  { %2093 = vmatprep.mubr.bf16.mxu0 %v5031_v15 }
 0x2fd   :  { %2094 = vmatmul.mubr.bf16.gmra.mrb[20].mxu0 %v5043_v18 }
 0x36b   :  { %v2012_v11 = vpop.f32.mrb[0].mxu1 }
 0x36c   :  { %v2013_v60 = vadd.f32 %v2012_v11, %v5158_v7  ;;  %v2014_v13 = vpop.f32.mrb[1].mxu1 }
 0x36d   :  { %v2015_v15 = vadd.f32 %v2014_v13, %v5167_v9  ;;  %v2016_v62 = vpop.f32.mrb[2].mxu1 }
 0x36e   :  { %2126 = vst [vmem:[#allocation5 + $0x10] sm:$0xff] %v2013_v60  ;;  %v2017_v59 = vadd.f32 %v2016_v62, %v5158_v7  ;;  %v2018_v18 = vpop.f32.mrb[3].mxu1 }
 0x36f   :  { %2127 = vst [vmem:[#allocation5 + $0x18] sm:$0xff] %v2015_v15  ;;  %v2019_v20 = vadd.f32 %v2018_v18, %v5167_v9 }
 0x370   :  { %2132 = vst [vmem:[#allocation5 + $0x40] sm:$0xff] %v2017_v59  ;;  %v1414_v59 = vrot.slane %v5150_v4, %v139_v0 }
 0x371   :  { %2133 = vst [vmem:[#allocation5 + $0x48] sm:$0xff] %v2019_v20 }
 0x373   :  { %v2022_v22 = vpop.f32.mrb[4].mxu1 }
 0x374   :  { %v2023_v24 = vadd.f32 %v2022_v22, %v5158_v7  ;;  %v2024_v25 = vpop.f32.mrb[5].mxu1 }
 0x375   :  { %v2025_v27 = vadd.f32 %v2024_v25, %v5167_v9  ;;  %v2026_v29 = vpop.f32.mrb[6].mxu1 }
 0x376   :  { %2138 = vst [vmem:[#allocation5 + $0x70] sm:$0xff] %v2023_v24  ;;  %v2027_v31 = vadd.f32 %v2026_v29, %v5158_v7  ;;  %v2028_v33 = vpop.f32.mrb[7].mxu1 }
 0x377   :  { %2139 = vst [vmem:[#allocation5 + $0x78] sm:$0xff] %v2025_v27  ;;  %v2029_v35 = vadd.f32 %v2028_v33, %v5167_v9 }
 0x378   :  { %2144 = vst [vmem:[#allocation5 + $0xa0] sm:$0xff] %v2027_v31 }
 0x379   :  { %2145 = vst [vmem:[#allocation5 + $0xa8] sm:$0xff] %v2029_v35 }
 0x37b   :  { %v2032_v37 = vpop.f32.mrb[8].mxu1 }
 0x37c   :  { %v2033_v39 = vadd.f32 %v2032_v37, %v5158_v7  ;;  %v2034_v43 = vpop.f32.mrb[9].mxu1 }
 0x37d   :  { %v2035_v45 = vadd.f32 %v2034_v43, %v5167_v9  ;;  %v2036_v47 = vpop.f32.mrb[10].mxu1  ;;  %v5207_v43 = vmov 0.0  }
 0x37e   :  { %2150 = vst [vmem:[#allocation5 + $0xd0] sm:$0xff] %v2033_v39  ;;  %v2037_v49 = vadd.f32 %v2036_v47, %v5158_v7  ;;  %v2038_v51 = vpop.f32.mrb[11].mxu1 }
 0x37f   :  { %2151 = vst [vmem:[#allocation5 + $0xd8] sm:$0xff] %v2035_v45  ;;  %v2039_v53 = vadd.f32 %v2038_v51, %v5167_v9  ;;  %v5211_v45 = vmov 0.0  }
 0x380   :  { %2156 = vst [vmem:[#allocation5 + $0x100] sm:$0xff] %v2037_v49 }
 0x381   :  { %2157 = vst [vmem:[#allocation5 + $0x108] sm:$0xff] %v2039_v53 }
 0x383   :  { %v2042_v2 = vpop.f32.mrb[12].mxu1 }
 0x384   :  { %v2043_v41 = vadd.f32 %v2042_v2, %v5158_v7 }
 0x386   :  { %2162 = vst [vmem:[#allocation5 + $0x130] sm:$0xff] %v2043_v41 }
 0x388   :  { %v1939_v10 = vpop.f32.mrb[0].mxu0 }
 0x389   :  { %v1940_v12 = vadd.f32 %v1939_v10, %v5154_v6  ;;  %v1941_v61 = vpop.f32.mrb[1].mxu0  ;;  %v2044_v10 = vpop.f32.mrb[13].mxu1 }
 0x38a   :  { %v1942_v14 = vadd.f32 %v1941_v61, %v5162_v8  ;;  %v1943_v16 = vpop.f32.mrb[2].mxu0  ;;  %v2046_v61 = vpop.f32.mrb[14].mxu1 }
 0x38b   :  { %2124 = vst [vmem:[#allocation5] sm:$0xff] %v1940_v12  ;;  %v1944_v17 = vadd.f32 %v1943_v16, %v5154_v6  ;;  %v1945_v63 = vpop.f32.mrb[3].mxu0  ;;  %v2045_v12 = vadd.f32 %v2044_v10, %v5167_v9  ;;  %v2048_v16 = vpop.f32.mrb[15].mxu1 }
 0x38c   :  { %2125 = vst [vmem:[#allocation5 + $0x8] sm:$0xff] %v1942_v14  ;;  %v1946_v19 = vadd.f32 %v1945_v63, %v5162_v8  ;;  %v2047_v14 = vadd.f32 %v2046_v61, %v5158_v7 }
 0x38d   :  { %2130 = vst [vmem:[#allocation5 + $0x30] sm:$0xff] %v1944_v17  ;;  %2163 = vst [vmem:[#allocation5 + $0x138] sm:$0xff] %v2045_v12  ;;  %v2049_v17 = vadd.f32 %v2048_v16, %v5167_v9 }
 0x38e   :  { %2131 = vst [vmem:[#allocation5 + $0x38] sm:$0xff] %v1946_v19  ;;  %2168 = vst [vmem:[#allocation5 + $0x160] sm:$0xff] %v2047_v14 }
 0x38f   :  { %2169 = vst [vmem:[#allocation5 + $0x168] sm:$0xff] %v2049_v17 }
 0x390   :  { %v1949_v21 = vpop.f32.mrb[4].mxu0 }
 0x391   :  { %v1950_v23 = vadd.f32 %v1949_v21, %v5154_v6  ;;  %v1951_v57 = vpop.f32.mrb[5].mxu0 }
 0x392   :  { %v1952_v26 = vadd.f32 %v1951_v57, %v5162_v8  ;;  %v1953_v28 = vpop.f32.mrb[6].mxu0 }
 0x393   :  { %2136 = vst [vmem:[#allocation5 + $0x60] sm:$0xff] %v1950_v23  ;;  %v1954_v30 = vadd.f32 %v1953_v28, %v5154_v6  ;;  %v1955_v32 = vpop.f32.mrb[7].mxu0 }
 0x394   :  { %2137 = vst [vmem:[#allocation5 + $0x68] sm:$0xff] %v1952_v26  ;;  %v1956_v34 = vadd.f32 %v1955_v32, %v5162_v8 }
 0x395   :  { %2142 = vst [vmem:[#allocation5 + $0x90] sm:$0xff] %v1954_v30 }
 0x396   :  { %2143 = vst [vmem:[#allocation5 + $0x98] sm:$0xff] %v1956_v34 }
 0x398   :  { %v1959_v36 = vpop.f32.mrb[8].mxu0 }
 0x399   :  { %v1960_v38 = vadd.f32 %v1959_v36, %v5154_v6  ;;  %v1961_v40 = vpop.f32.mrb[9].mxu0 }
 0x39a   :  { %v1962_v44 = vadd.f32 %v1961_v40, %v5162_v8  ;;  %v1963_v46 = vpop.f32.mrb[10].mxu0 }
 0x39b   :  { %2148 = vst [vmem:[#allocation5 + $0xc0] sm:$0xff] %v1960_v38  ;;  %v1964_v48 = vadd.f32 %v1963_v46, %v5154_v6  ;;  %v1965_v50 = vpop.f32.mrb[11].mxu0  ;;  %v5213_v46 = vmov 0.0  }
 0x39c   :  { %2149 = vst [vmem:[#allocation5 + $0xc8] sm:$0xff] %v1962_v44  ;;  %v1966_v52 = vadd.f32 %v1965_v50, %v5162_v8  ;;  %v5209_v44 = vmov 0.0  }
 0x39d   :  { %2154 = vst [vmem:[#allocation5 + $0xf0] sm:$0xff] %v1964_v48 }
 0x39e   :  { %2155 = vst [vmem:[#allocation5 + $0xf8] sm:$0xff] %v1966_v52 }
 0x3a0   :  { %v1969_v1 = vpop.f32.mrb[12].mxu0 }
 0x3a1   :  { %v1970_v42 = vadd.f32 %v1969_v1, %v5154_v6  ;;  %v1971_v3 = vpop.f32.mrb[13].mxu0 }
 0x3a2   :  { %v1972_v11 = vadd.f32 %v1971_v3, %v5162_v8  ;;  %v1973_v60 = vpop.f32.mrb[14].mxu0 }
 0x3a3   :  { %2160 = vst [vmem:[#allocation5 + $0x120] sm:$0xff] %v1970_v42  ;;  %v1974_v13 = vadd.f32 %v1973_v60, %v5154_v6  ;;  %v1975_v15 = vpop.f32.mrb[15].mxu0  ;;  %v1418_v6 = vrot.slane %v5150_v4, %v143_v5 }
 0x3a4   :  { %2161 = vst [vmem:[#allocation5 + $0x128] sm:$0xff] %v1972_v11  ;;  %v1976_v62 = vadd.f32 %v1975_v15, %v5162_v8 }
 0x3a5   :  { %2166 = vst [vmem:[#allocation5 + $0x150] sm:$0xff] %v1974_v13 }
 0x3a6   :  { %2167 = vst [vmem:[#allocation5 + $0x158] sm:$0xff] %v1976_v62 }
 0x3ba   :  { %v2105_v63 = vpop.f32.mrb[16].mxu1 }
 0x3bb   :  { %v2106_v19 = vadd.f32 %v2105_v63, %v1414_v59  ;;  %v2107_v8 = vpop.f32.mrb[17].mxu1 }
 0x3bc   :  { %v2108_v9 = vadd.f32 %v2107_v8, %v1418_v6  ;;  %v2109_v23 = vpop.f32.mrb[18].mxu1 }
 0x3bd   :  { %2152 = vst [vmem:[#allocation5 + $0xe0] sm:$0xff] %v2106_v19  ;;  %v2110_v57 = vadd.f32 %v2109_v23, %v1414_v59  ;;  %v2111_v0 = vpop.f32.mrb[19].mxu1 }
 0x3be   :  { %2153 = vst [vmem:[#allocation5 + $0xe8] sm:$0xff] %v2108_v9  ;;  %v2112_v5 = vadd.f32 %v2111_v0, %v1418_v6 }
 0x3bf   :  { %2158 = vst [vmem:[#allocation5 + $0x110] sm:$0xff] %v2110_v57 }
 0x3c0   :  { %2159 = vst [vmem:[#allocation5 + $0x118] sm:$0xff] %v2112_v5 }
 0x3c2   :  { %v2115_v26 = vpop.f32.mrb[20].mxu1 }
 0x3c3   :  { %v2116_v28 = vadd.f32 %v2115_v26, %v1414_v59  ;;  %v2117_v30 = vpop.f32.mrb[21].mxu1 }
 0x3c4   :  { %v2118_v32 = vadd.f32 %v2117_v30, %v1418_v6  ;;  %v2119_v34 = vpop.f32.mrb[22].mxu1 }
 0x3c5   :  { %2164 = vst [vmem:[#allocation5 + $0x140] sm:$0xff] %v2116_v28  ;;  %v2120_v36 = vadd.f32 %v2119_v34, %v1414_v59  ;;  %v2121_v38 = vpop.f32.mrb[23].mxu1 }
 0x3c6   :  { %2165 = vst [vmem:[#allocation5 + $0x148] sm:$0xff] %v2118_v32  ;;  %v2122_v40 = vadd.f32 %v2121_v38, %v1418_v6 }
 0x3c7   :  { %2170 = vst [vmem:[#allocation5 + $0x170] sm:$0xff] %v2120_v36 }
 0x3c8   :  { %v2085_v7 = vpop.f32.mrb[16].mxu0  ;;  %2171 = vst [vmem:[#allocation5 + $0x178] sm:$0xff] %v2122_v40 }
 0x3c9   :  { %v2086_v18 = vadd.f32 %v2085_v7, %v1414_v59  ;;  %v2087_v20 = vpop.f32.mrb[17].mxu0 }
 0x3ca   :  { %v2088_v21 = vadd.f32 %v2087_v20, %v1418_v6  ;;  %v2089_v22 = vpop.f32.mrb[18].mxu0 }
 0x3cb   :  { %2128 = vst [vmem:[#allocation5 + $0x20] sm:$0xff] %v2086_v18  ;;  %v2090_v24 = vadd.f32 %v2089_v22, %v1414_v59  ;;  %v2091_v25 = vpop.f32.mrb[19].mxu0 }
 0x3cc   :  { %2129 = vst [vmem:[#allocation5 + $0x28] sm:$0xff] %v2088_v21  ;;  %v2092_v54 = vadd.f32 %v2091_v25, %v1418_v6 }
 0x3cd   :  { %2134 = vst [vmem:[#allocation5 + $0x50] sm:$0xff] %v2090_v24 }
 0x3ce   :  { %2135 = vst [vmem:[#allocation5 + $0x58] sm:$0xff] %v2092_v54 }
 0x3d0   :  { %v2095_v4 = vpop.f32.mrb[20].mxu0 }
 0x3d1   :  { %v2096_v27 = vadd.f32 %v2095_v4, %v1414_v59  ;;  %v2097_v29 = vpop.f32.mrb[21].mxu0 }
 0x3d2   :  { %v2098_v31 = vadd.f32 %v2097_v29, %v1418_v6  ;;  %v2099_v33 = vpop.f32.mrb[22].mxu0 }
 0x3d3   :  { %2140 = vst [vmem:[#allocation5 + $0x80] sm:$0xff] %v2096_v27  ;;  %v2100_v35 = vadd.f32 %v2099_v33, %v1414_v59  ;;  %v2101_v37 = vpop.f32.mrb[23].mxu0 }
 0x3d4   :  { %2141 = vst [vmem:[#allocation5 + $0x88] sm:$0xff] %v2098_v31  ;;  %v2102_v39 = vadd.f32 %v2101_v37, %v1418_v6 }
 0x3d5   :  { %2146 = vst [vmem:[#allocation5 + $0xb0] sm:$0xff] %v2100_v35 }
 0x3d6   :  { %2147 = vst [vmem:[#allocation5 + $0xb8] sm:$0xff] %v2102_v39 }
 0x3d7 LB: > { %v4059_v47 = vld [vmem:[%s5563_s8 + $0x4] ss:$12 sps:$4 sm:$0xff]   ;;  %v4061_v48 = vld [vmem:[%s5563_s8] ss:$12 sps:$4 sm:$0xff]   ;;  %v4245_v49 = vmov 0.0   ;;  %v4246_v50 = vmov 0   ;;  %v2201_v7 = vpack.c.bf16 %v4235_v46, %v4235_v46  ;;  %v2460_v33 = vpack.c.bf16 %v4231_v45, %v4231_v45  ;;  %s4239_s7 = sphi %s5215_s7, %s2177_s7   ;;  %v4235_v46 = vphi %v5213_v46, %v2739_v46   ;;  %v4231_v45 = vphi %v5211_v45, %v2760_v45   ;;  %v4227_v44 = vphi %v5209_v44, %v5593_v44   ;;  %v4223_v43 = vphi %v5207_v43, %v5592_v43  }
 0x3d8   : > { %3596 = vmatprep.subr.bf16.mxu1 %v4245_v49  ;;  %2411 = vmatprep.mubr.bf16.mxu0 %v4246_v50  ;;  %v4062_v51 = vld [vmem:[%s5563_s8 + $0x1c] ss:$12 sps:$4 sm:$0xff]   ;;  %vm4247_vm1 = vmmov 0   ;;  %v4064_v52 = vld [vmem:[%s5563_s8 + $0x18] ss:$12 sps:$4 sm:$0xff]   ;;  %s3382_s22 = sshll.u32 %s4239_s7, 3 }
 0x3d9   : > { %2379 = vmatprep.subr.bf16.mxu0 %v4059_v47  ;;  %3612 = vmatprep.mubr.msk.bf16.mxu1 %vm4247_vm1, %v4245_v49  ;;  %v4065_v53 = vld [vmem:[%s5563_s8 + $0x34] ss:$12 sps:$4 sm:$0xff]   ;;  %v4067_v1 = vld [vmem:[%s5563_s8 + $0x30] ss:$12 sps:$4 sm:$0xff]   ;;  %v4068_v2 = vld [vmem:[%s5563_s8 + $0x4c] ss:$12 sps:$4 sm:$0xff]  }
 0x3da   : > { %2380 = vmatpush1.bf16.msra.mxu0 %v4061_v48  ;;  %v4080_v42 = vld [vmem:[%s5563_s8 + $0x8] ss:$12 sps:$4 sm:$0xff]   ;;  %v4071_v3 = vld [vmem:[%s5563_s8 + $0x64] ss:$12 sps:$4 sm:$0xff]   ;;  %v4084_v10 = vld [vmem:[%s5563_s8 + $0x20] ss:$12 sps:$4 sm:$0xff]  }
 0x3db   : > { %2381 = vmatprep.subr.bf16.mxu0 %v4062_v51  ;;  %v4070_v41 = vld [vmem:[%s5563_s8 + $0x48] ss:$12 sps:$4 sm:$0xff]   ;;  %3597 = vmatpush3.bf16.msra.mxu1 %v4080_v42  ;;  %v4073_v11 = vld [vmem:[%s5563_s8 + $0x60] ss:$12 sps:$4 sm:$0xff]   ;;  %v4088_v60 = vld [vmem:[%s5563_s8 + $0x38] ss:$12 sps:$4 sm:$0xff]  }
 0x3dc   : > { %3598 = vmatprep.subr.bf16.mxu1 %v4245_v49  ;;  %v4074_v12 = vld [vmem:[%s5563_s8 + $0x7c] ss:$12 sps:$4 sm:$0xff]   ;;  %v4076_v61 = vld [vmem:[%s5563_s8 + $0x78] ss:$12 sps:$4 sm:$0xff]   ;;  %v4077_v13 = vld [vmem:[%s5563_s8 + $0x94] ss:$12 sps:$4 sm:$0xff]  }
 0x3dd   : > { %v4092_v14 = vld [vmem:[%s5563_s8 + $0x50] ss:$12 sps:$4 sm:$0xff]   ;;  %v4081_v16 = vld [vmem:[%s5563_s8 + $0xac] ss:$12 sps:$4 sm:$0xff]   ;;  %v4096_v62 = vld [vmem:[%s5563_s8 + $0x68] ss:$12 sps:$4 sm:$0xff]  }
 0x3de   : > { %2382 = vmatpush1.bf16.msra.mxu0 %v4064_v52  ;;  %v4079_v15 = vld [vmem:[%s5563_s8 + $0x90] ss:$12 sps:$4 sm:$0xff]   ;;  %v4083_v17 = vld [vmem:[%s5563_s8 + $0xa8] ss:$12 sps:$4 sm:$0xff]   ;;  %v4100_v6 = vld [vmem:[%s5563_s8 + $0x80] ss:$12 sps:$4 sm:$0xff]  }
 0x3df   : > { %2383 = vmatprep.subr.bf16.mxu0 %v4065_v53  ;;  %3599 = vmatpush3.bf16.msra.mxu1 %v4084_v10  ;;  %v4087_v59 = vld [vmem:[%s5564_s9 + $0x4] ss:$12 sps:$4 sm:$0xff]   ;;  %v4085_v63 = vld [vmem:[%s5564_s9] ss:$12 sps:$4 sm:$0xff]   ;;  %v4091_v18 = vld [vmem:[%s5564_s9 + $0x1c] ss:$12 sps:$4 sm:$0xff]  }
 0x3e0   : > { %3600 = vmatprep.subr.bf16.mxu1 %v4245_v49  ;;  %v4104_v19 = vld [vmem:[%s5563_s8 + $0x98] ss:$12 sps:$4 sm:$0xff]   ;;  %v4095_v8 = vld [vmem:[%s5564_s9 + $0x34] ss:$12 sps:$4 sm:$0xff]   ;;  %v4108_v21 = vld [vmem:[%s5563_s8 + $0xb0] ss:$12 sps:$4 sm:$0xff]  }
 0x3e1   : > { %v4089_v20 = vld [vmem:[%s5564_s9 + $0x18] ss:$12 sps:$4 sm:$0xff]   ;;  %v4093_v9 = vld [vmem:[%s5564_s9 + $0x30] ss:$12 sps:$4 sm:$0xff]   ;;  %v4112_v23 = vld [vmem:[%s5564_s9 + $0x8] ss:$12 sps:$4 sm:$0xff]  }
 0x3e2   : > { %2384 = vmatpush1.bf16.msra.mxu0 %v4067_v1  ;;  %v4099_v22 = vld [vmem:[%s5564_s9 + $0x4c] ss:$12 sps:$4 sm:$0xff]   ;;  %v4097_v24 = vld [vmem:[%s5564_s9 + $0x48] ss:$12 sps:$4 sm:$0xff]   ;;  %v4103_v57 = vld [vmem:[%s5564_s9 + $0x64] ss:$12 sps:$4 sm:$0xff]  }
 0x3e3   : > { %2385 = vmatprep.subr.bf16.mxu0 %v4068_v2  ;;  %3601 = vmatpush3.bf16.msra.mxu1 %v4088_v60  ;;  %v4116_v25 = vld [vmem:[%s5564_s9 + $0x20] ss:$12 sps:$4 sm:$0xff]   ;;  %v4107_v54 = vld [vmem:[%s5564_s9 + $0x7c] ss:$12 sps:$4 sm:$0xff]   ;;  %v4117_v5 = vld [vmem:[%s5564_s9 + $0x38] ss:$12 sps:$4 sm:$0xff]  }
 0x3e4   : > { %3602 = vmatprep.subr.bf16.mxu1 %v4245_v49  ;;  %v4101_v0 = vld [vmem:[%s5564_s9 + $0x60] ss:$12 sps:$4 sm:$0xff]   ;;  %v4105_v4 = vld [vmem:[%s5564_s9 + $0x78] ss:$12 sps:$4 sm:$0xff]   ;;  %v4118_v27 = vld [vmem:[%s5564_s9 + $0x50] ss:$12 sps:$4 sm:$0xff]  }
 0x3e5   : > { %v4111_v26 = vld [vmem:[%s5564_s9 + $0x94] ss:$12 sps:$4 sm:$0xff]   ;;  %v4109_v28 = vld [vmem:[%s5564_s9 + $0x90] ss:$12 sps:$4 sm:$0xff]   ;;  %v4115_v29 = vld [vmem:[%s5564_s9 + $0xac] ss:$12 sps:$4 sm:$0xff]  }
 0x3e6   : > { %2386 = vmatpush1.bf16.msra.mxu0 %v4070_v41  ;;  %v4119_v30 = vld [vmem:[%s5564_s9 + $0x68] ss:$12 sps:$4 sm:$0xff]   ;;  %v4120_v32 = vld [vmem:[%s5564_s9 + $0x80] ss:$12 sps:$4 sm:$0xff]   ;;  %v4121_v34 = vld [vmem:[%s5564_s9 + $0x98] ss:$12 sps:$4 sm:$0xff]  }
 0x3e7   : > { %2387 = vmatprep.subr.bf16.mxu0 %v4071_v3  ;;  %3603 = vmatpush3.bf16.msra.mxu1 %v4092_v14  ;;  %v4113_v31 = vld [vmem:[%s5564_s9 + $0xa8] ss:$12 sps:$4 sm:$0xff]   ;;  %v4122_v35 = vld [vmem:[%s5564_s9 + $0xb0] ss:$12 sps:$4 sm:$0xff]   ;;  %s2185_s24 = sshra.s32 %s3382_s22, 3  ;;  %s2182_s26 = ssub.s32 7, %s4239_s7 }
 0x3e8   : > { %3604 = vmatprep.subr.bf16.mxu1 %v4245_v49  ;;  %s3474_s25 = smul.u32 48, %s2185_s24  ;;  %v2234_v36 = vld [vmem:[%s5566_s11] sm:$0x7]  ;;  %s3383_s27 = sshll.u32 %s2182_s26, 3 }
 0x3e9   : > { %v2239_v37 = vrot.slane %v2234_v36, %v4529_v55  ;;  %v2243_v38 = vrot.slane %v2234_v36, %v4540_v58  ;;  %s2193_s6 = sshra.s32 %s3383_s27, 3  ;;  %v2493_v14 = vld [vmem:[%s5567_s12] sm:$0x7]  ;;  %s2177_s7 = sadd.s32 1, %s4239_s7  }
 0x3ea   : > { %2388 = vmatpush1.bf16.msra.mxu0 %v4073_v11  ;;  %s5406_s0 = scalar_lea.vmem [#allocation5], %s3474_s25  ;;  %s3475_s29 = smul.u32 48, %s2193_s6 }
 0x3eb   : > { %2389 = vmatprep.subr.bf16.mxu0 %v4074_v12  ;;  %3605 = vmatpush3.bf16.msra.mxu1 %v4096_v62  ;;  %v2190_v39 = vld [vmem:[%s5406_s0] sm:$0xff]  ;;  %v2191_v52 = vld [vmem:[%s5406_s0 + $0x8] sm:$0xff]  ;;  %v2498_v62 = vrot.slane %v2493_v14, %v4529_v55  ;;  %p2174_p1 = scmp.ge.s32.totalorder %s2177_s7, 8  }
 0x3ec   : > { %3606 = vmatprep.subr.bf16.mxu1 %v4245_v49  ;;  %s5418_s10 = scalar_lea.vmem [#allocation5], %s3475_s29  ;;  %v4147_v55 = vld [vmem:[%s5570_s15 + $0x50] sm:$0xff] (%p2174_p1)  }
 0x3ee   : > { %2390 = vmatpush1.bf16.msra.mxu0 %v4076_v61  ;;  %v2247_v61 = vrot.slane %v2234_v36, %v4532_v56 }
 0x3ef   : > { %2391 = vmatprep.subr.bf16.mxu0 %v4077_v13  ;;  %3607 = vmatpush3.bf16.msra.mxu1 %v4100_v6  ;;  %v2502_v6 = vrot.slane %v2493_v14, %v4540_v58  ;;  %v4149_v58 = vld [vmem:[%s5570_s15 + $0x58] sm:$0xff] (%p2174_p1)  }
 0x3f0   : > { %3608 = vmatprep.subr.bf16.mxu1 %v4245_v49 }
 0x3f2   : > { %2392 = vmatpush1.bf16.msra.mxu0 %v4079_v15 }
 0x3f3   : > { %2393 = vmatprep.subr.bf16.mxu0 %v4081_v16  ;;  %3609 = vmatpush3.bf16.msra.mxu1 %v4104_v19 }
 0x3f4   : > { %3610 = vmatprep.subr.bf16.mxu1 %v4245_v49 }
 0x3f6   : > { %2394 = vmatpush1.bf16.msra.mxu0 %v4083_v17 }
 0x3f7   : > { %2638 = vmatprep.subr.bf16.mxu0 %v4087_v59  ;;  %3611 = vmatpush3.bf16.msra.mxu1 %v4108_v21  ;;  %v2192_v59 = vld [vmem:[%s5406_s0 + $0x10] sm:$0xff] }
 0x3f8   : > { %3616 = vmatprep.subr.bf16.mxu1 %v4245_v49 }
 0x3f9   : > { %2412 = vmatmul.mubr.bf16.vlgmr.msra.gmra.mrb[0].mxu0 %v2201_v7 }
 0x3fa   : > { %2639 = vmatpush1.bf16.msra.mxu0 %v4085_v63  ;;  %2670 = vmatprep.mubr.bf16.mxu0 %v4246_v50  ;;  %v2198_v63 = vld [vmem:[%s5418_s10 + $0x18] sm:$0xff] }
 0x3fb   : > { %2640 = vmatprep.subr.bf16.mxu0 %v4091_v18  ;;  %3613 = vmatmul.mubr.bf16.vlgmr.msra.gmra.mrb[0].mxu1 %v2201_v7 }
 0x3fc   : > { %3617 = vmatpush3.bf16.msra.mxu1 %v4112_v23  ;;  %3632 = vmatprep.mubr.msk.bf16.mxu1 %vm4247_vm1, %v4245_v49  ;;  %v2199_v23 = vld [vmem:[%s5418_s10 + $0x20] sm:$0xff] }
 0x3fd   : > { %3618 = vmatprep.subr.bf16.mxu1 %v4245_v49 }
 0x3fe   : > { %2641 = vmatpush1.bf16.msra.mxu0 %v4089_v20 }
 0x3ff   : > { %2642 = vmatprep.subr.bf16.mxu0 %v4095_v8 }
 0x400   : > { %3619 = vmatpush3.bf16.msra.mxu1 %v4116_v25 }
 0x401   : > { %3620 = vmatprep.subr.bf16.mxu1 %v4245_v49 }
 0x402   : > { %2643 = vmatpush1.bf16.msra.mxu0 %v4093_v9 }
 0x403   : > { %2644 = vmatprep.subr.bf16.mxu0 %v4099_v22 }
 0x404   : > { %3621 = vmatpush3.bf16.msra.mxu1 %v4117_v5 }
 0x405   : > { %3622 = vmatprep.subr.bf16.mxu1 %v4245_v49 }
 0x406   : > { %2645 = vmatpush1.bf16.msra.mxu0 %v4097_v24 }
 0x407   : > { %2646 = vmatprep.subr.bf16.mxu0 %v4103_v57 }
 0x408   : > { %3623 = vmatpush3.bf16.msra.mxu1 %v4118_v27 }
 0x409   : > { %3624 = vmatprep.subr.bf16.mxu1 %v4245_v49 }
 0x40a   : > { %2647 = vmatpush1.bf16.msra.mxu0 %v4101_v0 }
 0x40b   : > { %2648 = vmatprep.subr.bf16.mxu0 %v4107_v54 }
 0x40c   : > { %3625 = vmatpush3.bf16.msra.mxu1 %v4119_v30 }
 0x40d   : > { %3626 = vmatprep.subr.bf16.mxu1 %v4245_v49 }
 0x40e   : > { %2649 = vmatpush1.bf16.msra.mxu0 %v4105_v4 }
 0x40f   : > { %2650 = vmatprep.subr.bf16.mxu0 %v4111_v26 }
 0x410   : > { %3627 = vmatpush3.bf16.msra.mxu1 %v4120_v32 }
 0x411   : > { %3628 = vmatprep.subr.bf16.mxu1 %v4245_v49 }
 0x412   : > { %2651 = vmatpush1.bf16.msra.mxu0 %v4109_v28 }
 0x413   : > { %2652 = vmatprep.subr.bf16.mxu0 %v4115_v29 }
 0x414   : > { %3629 = vmatpush3.bf16.msra.mxu1 %v4121_v34 }
 0x415   : > { %3630 = vmatprep.subr.bf16.mxu1 %v4245_v49 }
 0x416   : > { %2653 = vmatpush1.bf16.msra.mxu0 %v4113_v31 }
 0x418   : > { %3631 = vmatpush3.bf16.msra.mxu1 %v4122_v35  ;;  %v2506_v35 = vrot.slane %v2493_v14, %v4532_v56  ;;  %v4148_v56 = vld [vmem:[%s5570_s15 + $0x10] sm:$0xff] (%p2174_p1)  }
 0x419   : > { %2671 = vmatmul.mubr.bf16.vlgmr.msra.gmra.mrb[4].mxu0 %v2460_v33  ;;  %v4159_v14 = vld [vmem:[%s5568_s13 + $0x50] sm:$0xff] (%p2174_p1)  }
 0x41b   : > { %3633 = vmatmul.mubr.bf16.vlgmr.msra.gmra.mrb[4].mxu1 %v2460_v33 }
 0x4cc   : > { %v2413_v40 = vpop.f32.mrb[0].mxu0 }
 0x4cd   : > { %v2414_v47 = vadd.f32 %v2413_v40, %v2239_v37  ;;  %v2415_v48 = vpop.f32.mrb[1].mxu0  ;;  %v2200_v40 = vld [vmem:[%s5418_s10 + $0x28] sm:$0xff] }
 0x4ce   : > { %v2416_v49 = vadd.f32 %v2415_v48, %v2243_v38  ;;  %v2417_v50 = vpop.f32.mrb[2].mxu0  ;;  %v2454_v42 = vpop.f32.mrb[0].mxu1 }
 0x4cf   : > { %v2719_v51 = vadd.f32 %v2414_v47, %v2190_v39  ;;  %v2418_v53 = vpop.f32.mrb[3].mxu0  ;;  %v3614_v3 = vpop.f32.mrb[1].mxu1  ;;  %v2455_v16 = vadd.f32 %v2454_v42, %v2247_v61  ;;  %v4154_v61 = vld [vmem:[%s5570_s15 + $0x20] sm:$0xff] (%p2174_p1)  }
 0x4d0   : > { %v2726_v2 = vadd.f32 %v2416_v49, %v2191_v52  ;;  %v2457_v10 = vpop.f32.mrb[2].mxu1  ;;  %v4145_v3 = vld [vmem:[%s5570_s15 + $0x48] sm:$0xff] (%p2174_p1)  }
 0x4d1   : > { %v3434_v1 = vmul.f32 -1.442695, %v2719_v51  ;;  %v3615_v11 = vpop.f32.mrb[3].mxu1 }
 0x4d2   : > { %v3435_v41 = vmul.f32 -1.442695, %v2726_v2  ;;  %v4143_v2 = vld [vmem:[%s5570_s15 + $0x40] sm:$0xff] (%p2174_p1)  }
 0x4d3   : > { %4123 = vpow2.f32 %v3434_v1  ;;  %3534 = vmatprep.subr.bf16.mxu1 (%p2174_p1), %v4143_v2  ;;  %v4153_v11 = vld [vmem:[%s5570_s15 + $0x60] sm:$0xff] (%p2174_p1)  }
 0x4d4   : > { %4125 = vpow2.f32 %v3435_v41  ;;  %v4144_v41 = vld [vmem:[%s5570_s15] sm:$0xff] (%p2174_p1)  }
 0x4d5   :  { %3535 = vmatpush3.bf16.msra.mxu1 (%p2174_p1), %v4144_v41 }
 0x4d6   :  { %3536 = vmatprep.subr.bf16.mxu1 (%p2174_p1), %v4145_v3 }
 0x4dd   : > { %v4124_v12 = vpop.eup %4123 }
 0x4de   : > { %v2723_v60 = vadd.f32 1.0, %v4124_v12  ;;  %v4126_v13 = vpop.eup %4125  ;;  %v4155_v12 = vld [vmem:[%s5568_s13 + $0x48] sm:$0xff] (%p2174_p1)  }
 0x4df   : > { %v2730_v15 = vadd.f32 1.0, %v4126_v13  ;;  %v4157_v13 = vld [vmem:[%s5570_s15 + $0x68] sm:$0xff] (%p2174_p1)  }
 0x4e0   : > { %4127 = vrcp.f32 %v2723_v60  ;;  %v4156_v60 = vld [vmem:[%s5568_s13 + $0x8] sm:$0xff] (%p2174_p1)  }
 0x4e1   : > { %4129 = vrcp.f32 %v2730_v15  ;;  %v4160_v15 = vld [vmem:[%s5568_s13 + $0x10] sm:$0xff] (%p2174_p1)  }
 0x4ea   : > { %v4128_v17 = vpop.eup %4127 }
 0x4eb   : > { %v2733_v7 = vmul.f32 %v4128_v17, %v2455_v16  ;;  %v4130_v0 = vpop.eup %4129  ;;  %v4158_v16 = vld [vmem:[%s5570_s15 + $0x28] sm:$0xff] (%p2174_p1)   ;;  %v4163_v17 = vld [vmem:[%s5568_s13 + $0x58] sm:$0xff] (%p2174_p1)  }
 0x4ec   : > { %v2672_v18 = vpop.f32.mrb[4].mxu0  ;;  %v2736_v27 = vsub.f32 1.0, %v4130_v0  ;;  %v2738_v30 = vmul.f32 %v4235_v46, %v4130_v0  ;;  %v3455_v0 = vld [vmem:[%s5571_s16] ss:$0 sm:$0xff] (%p2174_p1) }
 0x4ed   : > { %v2734_v19 = vadd.f32 %v2733_v7, %v2192_v59  ;;  %v2673_v20 = vadd.f32 %v2672_v18, %v2498_v62  ;;  %v2674_v8 = vpop.f32.mrb[5].mxu0  ;;  %v4161_v62 = vld [vmem:[%s5570_s15 + $0x70] sm:$0xff] (%p2174_p1)   ;;  %v4164_v59 = vld [vmem:[%s5568_s13 + $0x18] sm:$0xff] (%p2174_p1)  }
 0x4ee   : > { %v2675_v21 = vadd.f32 %v2674_v8, %v2502_v6  ;;  %v2676_v9 = vpop.f32.mrb[6].mxu0  ;;  %v2713_v54 = vpop.f32.mrb[4].mxu1  ;;  %v4162_v6 = vld [vmem:[%s5570_s15 + $0x30] sm:$0xff] (%p2174_p1)   ;;  %v4165_v7 = vld [vmem:[%s5570_s15 + $0x78] sm:$0xff] (%p2174_p1)   ;;  %v4169_v8 = vld [vmem:[%s5568_s13 + $0x68] sm:$0xff] (%p2174_p1)  }
 0x4ef   : > { %4131 = vtanh.f32 %v2734_v19  ;;  %v2740_v22 = vadd.f32 %v2673_v20, %v2198_v63  ;;  %v2677_v24 = vpop.f32.mrb[7].mxu0  ;;  %v3634_v4 = vpop.f32.mrb[5].mxu1  ;;  %v2714_v38 = vadd.f32 %v2713_v54, %v2506_v35  ;;  %v4167_v63 = vld [vmem:[%s5568_s13 + $0x60] sm:$0xff] (%p2174_p1)   ;;  %v4166_v18 = vld [vmem:[%s5570_s15 + $0x38] sm:$0xff] (%p2174_p1)   ;;  %v4171_v9 = vld [vmem:[%s5568_s13 + $0x70] sm:$0xff] (%p2174_p1)  }
 0x4f0   : > { %v2747_v25 = vadd.f32 %v2675_v21, %v2199_v23  ;;  %v2716_v26 = vpop.f32.mrb[6].mxu1  ;;  %v4168_v19 = vld [vmem:[%s5568_s13 + $0x20] sm:$0xff] (%p2174_p1)   ;;  %v4170_v21 = vld [vmem:[%s5568_s13 + $0x28] sm:$0xff] (%p2174_p1)   ;;  %v4172_v23 = vld [vmem:[%s5568_s13 + $0x30] sm:$0xff] (%p2174_p1)  }
 0x4f1   : > { %v3436_v57 = vmul.f32 -1.442695, %v2740_v22  ;;  %v3635_v28 = vpop.f32.mrb[7].mxu1  ;;  %v4173_v24 = vld [vmem:[%s5568_s13 + $0x78] sm:$0xff] (%p2174_p1)  }
 0x4f2   : > { %v3437_v5 = vmul.f32 -1.442695, %v2747_v25 }
 0x4f3   : > { %4133 = vpow2.f32 %v3436_v57  ;;  %v4174_v57 = vld [vmem:[%s5568_s13 + $0x38] sm:$0xff] (%p2174_p1)  }
 0x4f4   : > { %4135 = vpow2.f32 %v3437_v5 }
 0x4f9   : > { %v4132_v29 = vpop.eup %4131 }
 0x4fa   : > { %v2737_v31 = vmul.f32 %v4132_v29, %v2736_v27 }
 0x4fc   : > { %v2739_v46 = vadd.f32 %v2738_v30, %v2737_v31   ;;  %v3438_v31 = vld [vmem:[%s5569_s14] ss:$0 sm:$0xff] (%p2174_p1) }
 0x4fd   : > { %v4134_v32 = vpop.eup %4133 }
 0x4fe   : > { %v5424_v44 = vadd.f32 %v4227_v44, %v2739_v46   ;;  %v2744_v34 = vadd.f32 1.0, %v4134_v32  ;;  %v4136_v36 = vpop.eup %4135  ;;  %v4146_v46 = vld [vmem:[%s5570_s15 + $0x8] sm:$0xff] (%p2174_p1)  }
 0x4ff   : > { %v2751_v37 = vadd.f32 1.0, %v4136_v36  ;;  %3537 = vmatpush3.bf16.msra.mxu1 (%p2174_p1), %v4146_v46 }
 0x500   : > { %v5591_v33 = vmov %v5424_v44  ;;  %4137 = vrcp.f32 %v2744_v34  ;;  %3538 = vmatprep.subr.bf16.mxu1 (%p2174_p1), %v4147_v55 }
 0x501   : > { %4139 = vrcp.f32 %v2751_v37  ;;  %v5593_v44 = vmov %v5591_v33  ;;  %v2763_v20 = vmul.f32 (%p2174_p1), 0.125, %v5591_v33  ;;  %v3117_v37 = vld [vmem:[%s5572_s17] sm:$0xff] (%p2174_p1) }
 0x502   :  { %v4152_v44 = vld [vmem:[%s5568_s13] sm:$0xff] (%p2174_p1)  }
 0x503   :  { %3539 = vmatpush3.bf16.msra.mxu1 (%p2174_p1), %v4148_v56  ;;  %v2765_v22 = vpack.c.bf16 (%p2174_p1), %v2763_v20, %v2763_v20 }
 0x504   :  { %3540 = vmatprep.subr.bf16.mxu1 (%p2174_p1), %v4149_v58 }
 0x50a   : > { %v4138_v39 = vpop.eup %4137 }
 0x50b   : > { %v2754_v47 = vmul.f32 %v4138_v39, %v2714_v38  ;;  %v4140_v49 = vpop.eup %4139 }
 0x50c   : > { %v2757_v50 = vsub.f32 1.0, %v4140_v49  ;;  %v2759_v52 = vmul.f32 %v4231_v45, %v4140_v49 }
 0x50d   : > { %v2755_v48 = vadd.f32 %v2754_v47, %v2200_v40 }
 0x50f   : > { %4141 = vtanh.f32 %v2755_v48 }
 0x519   : > { %v4142_v51 = vpop.eup %4141 }
 0x51a   : > { %v2758_v53 = vmul.f32 %v4142_v51, %v2757_v50  ;;  %2176 = sbr.rel (!%p2174_p1) target bundleno = 983 (0x3d7), region = 139 }
 0x51c   : > { %v2760_v45 = vadd.f32 %v2759_v52, %v2758_v53  }
 0x51e   : > { %v2762_v1 = vadd.f32 %v4223_v43, %v2760_v45   ;;  %v4150_v45 = vld [vmem:[%s5570_s15 + $0x18] sm:$0xff] (%p2174_p1)  }
 0x51f   :  { %3541 = vmatpush3.bf16.msra.mxu1 (%p2174_p1), %v4150_v45 }
 0x520   : > { %v5592_v43 = vmov %v2762_v1  ;;  %v2764_v42 = vmul.f32 (%p2174_p1), 0.125, %v2762_v1  ;;  %3542 = vmatprep.subr.bf16.mxu1 (%p2174_p1), %v4153_v11 }
 0x521   :  { %v4151_v43 = vld [vmem:[%s5568_s13 + $0x40] sm:$0xff]  }
 0x522   :  { %v2766_v10 = vpack.c.bf16 %v2764_v42, %v2764_v42  ;;  %3512 = vmatprep.subr.bf16.mxu0 %v4151_v43 }
 0x523   :  { %3513 = vmatpush3.bf16.msra.mxu0 %v4152_v44  ;;  %3543 = vmatpush3.bf16.msra.mxu1 %v4154_v61 }
 0x524   :  { %3109 = vmatprep.mubr.bf16.mxu1 %v2766_v10  ;;  %2934 = vmatprep.mubr.bf16.mxu0 %v2766_v10 }
 0x525   :  { %3514 = vmatprep.subr.bf16.mxu0 %v4155_v12  ;;  %3544 = vmatprep.subr.bf16.mxu1 %v4157_v13 }
 0x527   :  { %3515 = vmatpush3.bf16.msra.mxu0 %v4156_v60  ;;  %3545 = vmatpush3.bf16.msra.mxu1 %v4158_v16 }
 0x528   :  { %3516 = vmatprep.subr.bf16.mxu0 %v4159_v14  ;;  %3546 = vmatprep.subr.bf16.mxu1 %v4161_v62 }
 0x52b   :  { %3517 = vmatpush3.bf16.msra.mxu0 %v4160_v15  ;;  %3547 = vmatpush3.bf16.msra.mxu1 %v4162_v6 }
 0x52c   :  { %3518 = vmatprep.subr.bf16.mxu0 %v4163_v17  ;;  %3548 = vmatprep.subr.bf16.mxu1 %v4165_v7 }
 0x52f   :  { %3519 = vmatpush3.bf16.msra.mxu0 %v4164_v59  ;;  %3549 = vmatpush3.bf16.msra.mxu1 %v4166_v18 }
 0x530   :  { %3520 = vmatprep.subr.bf16.mxu0 %v4167_v63 }
 0x532   :  { %3110 = vmatmul.mubr.bf16.vlgmr.msra.gmra.mrb[0].mxu1 %v2765_v22 }
 0x533   :  { %3521 = vmatpush3.bf16.msra.mxu0 %v4168_v19 }
 0x534   :  { %3522 = vmatprep.subr.bf16.mxu0 %v4169_v8 }
 0x537   :  { %3523 = vmatpush3.bf16.msra.mxu0 %v4170_v21 }
 0x538   :  { %3524 = vmatprep.subr.bf16.mxu0 %v4171_v9 }
 0x53b   :  { %3525 = vmatpush3.bf16.msra.mxu0 %v4172_v23 }
 0x53c   :  { %3526 = vmatprep.subr.bf16.mxu0 %v4173_v24 }
 0x53f   :  { %3527 = vmatpush3.bf16.msra.mxu0 %v4174_v57 }
 0x542   :  { %2935 = vmatmul.mubr.bf16.vlgmr.msra.gmra.mrb[0].mxu0 %v2765_v22 }
 0x605   :  { %v3550_v25 = vpop.f32.mrb[0].mxu1 }
 0x606   :  { %v3551_v54 = vpop.f32.mrb[1].mxu1 }
 0x607   :  { %v3552_v5 = vadd.f32 %v3551_v54, %v3550_v25  ;;  %v3553_v4 = vpop.f32.mrb[2].mxu1 }
 0x608   :  { %v3554_v26 = vpop.f32.mrb[3].mxu1 }
 0x609   :  { %v3112_v27 = vadd.f32 %v3552_v5, %v3455_v0 }
 0x60b   :  { %v3118_v28 = vmul.f32 0.5, %v3112_v27  ;;  %3125 = vst [vmem:[%s5575_s20] sm:$0xff] %v3112_v27 }
 0x60d   :  { %v3119_v29 = vmul.f32 1.442695, %v3118_v28 }
 0x60f   :  { %4175 = vpow2.f32 %v3119_v29 }
 0x615   :  { %v3528_v30 = vpop.f32.mrb[0].mxu0 }
 0x616   :  { %v3529_v32 = vpop.f32.mrb[1].mxu0 }
 0x617   :  { %v3530_v33 = vadd.f32 %v3529_v32, %v3528_v30  ;;  %v3531_v34 = vpop.f32.mrb[2].mxu0 }
 0x618   :  { %v3532_v35 = vpop.f32.mrb[3].mxu0 }
 0x619   :  { %v2937_v36 = vadd.f32 %v3530_v33, %v3438_v31  ;;  %v4176_v38 = vpop.eup %4175 }
 0x61a   :  { %v3121_v39 = vmul.f32 %v4176_v38, %v3117_v37 }
 0x61b   :  { %3124 = vst [vmem:[%s5574_s19] sm:$0xff] %v2937_v36 }
 0x61c   :  { %v3122_v40 = vadd.f32 %v3121_v39, %v2937_v36 }
 0x61e   :  { %3123 = vst [vmem:[%s5573_s18] sm:$0xff] %v3122_v40 }

</bundles_post_ra>
